<compile_context>
chip_gen: v7x
topology: tpu7x:2x2x1
jax: 0.10.0
libtpu: 0.0.40
codegen_flags: <defaults>
</compile_context>

<pallas_src>
from functools import partial

import jax
import jax.numpy as jnp
import numpy as np
from jax.experimental import pallas as pl
from jax.experimental.pallas import tpu as pltpu


def _corr_kernel(f1_ref, f2_ref, out_ref, acc_ref, *, K, C, Wp, S):
    """One grid step = one (batch, channel-chunk) pair.

    f1_ref : (1, Ct, S)         VMEM, S = H*Wp  (flat spatial, row stride Wp)
    f2_ref : (1, Ct, Sp)        VMEM, Sp = Hp*Wp + 2d (flat padded feat2 + guard)
    out_ref: (1, K*K, S)        VMEM (same block revisited for every c chunk)
    acc_ref: (K*K, S) float32   VMEM scratch accumulator
    """
    c_idx = pl.program_id(1)

    @pl.when(c_idx == 0)
    def _init():
        acc_ref[...] = jnp.zeros_like(acc_ref)

    # Only the current channel chunk is hoisted (not all of C) -> no large live
    # f32 copy of feat1; the reduction over channels accumulates in f32.
    f1 = f1_ref[0].astype(jnp.float32)                              # (Ct, S)

    for i in range(K):                 # vertical displacement
        for j in range(K):             # horizontal displacement
            off = i * Wp + j           # static -> contiguous lane-dense window
            f2s = f2_ref[0, :, pl.ds(off, S)].astype(jnp.float32)   # (Ct, S)
            corr = jnp.sum(f1 * f2s, axis=0, keepdims=True)         # (1, S)
            acc_ref[pl.ds(i * K + j, 1), :] += corr

    @pl.when(c_idx == pl.num_programs(1) - 1)
    def _finalize():
        # Single 1/C scale + one bulk lane-dense store of the whole block.
        out_ref[0] = (acc_ref[...] * (1.0 / C)).astype(out_ref.dtype)


def correlation_layer(feat1, feat2, max_displacement=3):
    """JAX/Pallas equivalent of CorrelationLayer.forward (NCHW in, NCHW out)."""
    assert feat1.shape == feat2.shape
    B, C, H, W = feat1.shape
    d = int(max_displacement)
    K = 2 * d + 1
    KK = K * K
    Hp, Wp = H + 2 * d, W + 2 * d
    S = H * Wp                  # flattened spatial length (row stride Wp)
    Sp = Hp * Wp + 2 * d        # flattened padded feat2 (+ 2d tail guard so the
                                # largest window slice [off, off+S) is in bounds)

    # Channel-chunk size handled by the reduction grid axis.
    Ct = 8 if C % 8 == 0 else C
    nC = C // Ct

    # ---- wrapper-side layout plumbing (cheap reshapes + small zero pads) ----
    # feat1: pad W -> Wp on the right so its flat row stride matches the output.
    f1_flat = jnp.pad(feat1, ((0, 0), (0, 0), (0, 0), (0, 2 * d))).reshape(B, C, S)
    # feat2: correlation zero padding on both spatial dims, flattened, plus 2d
    # trailing zeros as an in-bounds guard for the largest displacement window.
    f2_flat = jnp.pad(feat2, ((0, 0), (0, 0), (d, d), (d, d))).reshape(B, C, Hp * Wp)
    f2_flat = jnp.pad(f2_flat, ((0, 0), (0, 0), (0, 2 * d)))

    itemsize = jnp.dtype(feat1.dtype).itemsize
    blk_bytes = (Ct * S + Ct * Sp + KK * S) * itemsize
    est_bytes = 2 * blk_bytes + KK * S * 4        # double-buffered blocks + f32 acc
    vmem_limit = int(min(64 << 20, max(32 << 20, 4 * est_bytes)))

    kernel = partial(_corr_kernel, K=K, C=C, Wp=Wp, S=S)

    out_flat = pl.pallas_call(
        kernel,
        out_shape=jax.ShapeDtypeStruct((B, KK, S), feat1.dtype),
        grid_spec=pltpu.PrefetchScalarGridSpec(
            num_scalar_prefetch=0,
            grid=(B, nC),                        # reduction (channel) axis last
            in_specs=[
                pl.BlockSpec((1, Ct, S), lambda b, c: (b, c, 0)),
                pl.BlockSpec((1, Ct, Sp), lambda b, c: (b, c, 0)),
            ],
            out_specs=pl.BlockSpec((1, KK, S), lambda b, c: (b, 0, 0)),
            scratch_shapes=[pltpu.VMEM((KK, S), jnp.float32)],
        ),
        compiler_params=pltpu.CompilerParams(
            dimension_semantics=("parallel", "arbitrary"),
            vmem_limit_bytes=vmem_limit,
        ),
    )(f1_flat, f2_flat)

    # Drop the stride-padding columns and restore NCHW: [B, K*K, H, W].
    return out_flat.reshape(B, KK, H, Wp)[:, :, :, :W]


def _reference(feat1, feat2, max_displacement):
    """Pure-JAX reference mirroring the PyTorch loop exactly."""
    B, C, H, W = feat1.shape
    d = max_displacement
    K = 2 * d + 1
    f2p = jnp.pad(feat2, ((0, 0), (0, 0), (d, d), (d, d)))
    outs = []
    for i in range(K):
        for j in range(K):
            shifted = f2p[:, :, i:i + H, j:j + W]
            outs.append(jnp.sum(feat1 * shifted, axis=1, keepdims=True) / C)
    return jnp.concatenate(outs, axis=1)


if __name__ == "__main__":
    key = jax.random.PRNGKey(0)
    k1, k2, k3, k4 = jax.random.split(key, 4)

    # Config 1: toy shapes (B=2, C=4, 16x16, max_disp=3 -> 49 output channels).
    f1 = jax.random.normal(k1, (2, 4, 16, 16), dtype=jnp.float32)
    f2 = jax.random.normal(k2, (2, 4, 16, 16), dtype=jnp.float32)
    out = jax.block_until_ready(correlation_layer(f1, f2, max_displacement=3))
    ref = jax.block_until_ready(_reference(f1, f2, 3))
    assert out.shape == (2, 49, 16, 16)
    np.testing.assert_allclose(np.asarray(out), np.asarray(ref),
                               rtol=1e-5, atol=1e-5)

    # Config 2: exercises the multi-chunk channel reduction (C=16 -> 2 chunks).
    g1 = jax.random.normal(k3, (1, 16, 8, 8), dtype=jnp.float32)
    g2 = jax.random.normal(k4, (1, 16, 8, 8), dtype=jnp.float32)
    out2 = jax.block_until_ready(correlation_layer(g1, g2, max_displacement=2))
    ref2 = jax.block_until_ready(_reference(g1, g2, 2))
    assert out2.shape == (1, 25, 8, 8)
    np.testing.assert_allclose(np.asarray(out2), np.asarray(ref2),
                               rtol=1e-5, atol=1e-5)

    print("KERNEL_OK")
</pallas_src>

<mosaic_0001>
module attributes {stable_mosaic.version = 11 : i64} {
  func.func @_corr_kernel(%arg0: i32, %arg1: i32, %arg2: memref<1x4x352xf32, #tpu.memory_space<vmem>>, %arg3: memref<1x4x490xf32, #tpu.memory_space<vmem>>, %arg4: memref<1x49x352xf32, #tpu.memory_space<vmem>>, %arg5: memref<49x352xf32, #tpu.memory_space<vmem>>) attributes {dimension_semantics = [#tpu.dimension_semantics<parallel>, #tpu.dimension_semantics<arbitrary>], iteration_bounds = array<i64: 2, 1>, scalar_prefetch = 0 : i64, scratch_operands = 1 : i64, tpu.core_type = #tpu.core_type<tc>, window_params = [{transform_indices = @transform_0, window_bounds = array<i64: 1, 4, 352>}, {transform_indices = @transform_1, window_bounds = array<i64: 1, 4, 490>}, {transform_indices = @transform_2, window_bounds = array<i64: 1, 49, 352>}]} {
    %c0_i32 = arith.constant 0 : i32
    %0 = arith.cmpi eq, %arg1, %c0_i32 : i32
    %1 = arith.extui %0 : i1 to i32
    %c0_i32_0 = arith.constant 0 : i32
    %2 = arith.cmpi ne, %1, %c0_i32_0 : i32
    scf.if %2 {
      %cst_318 = arith.constant 0.000000e+00 : f32
      %400 = vector.broadcast %cst_318 : f32 to vector<49x352xf32>
      %c0_319 = arith.constant 0 : index
      %c0_320 = arith.constant 0 : index
      %401 = vector.load %arg5[%c0_319, %c0_320] : memref<49x352xf32, #tpu.memory_space<vmem>>, vector<49x352xf32>
      tpu.vector_store %arg5[%c0_319, %c0_320], %400 {strides = array<i32>} : memref<49x352xf32, #tpu.memory_space<vmem>>, vector<49x352xf32>,
    } else {
    }
    %c0 = arith.constant 0 : index
    %c0_1 = arith.constant 0 : index
    %c0_2 = arith.constant 0 : index
    %3 = vector.load %arg2[%c0, %c0_1, %c0_2] : memref<1x4x352xf32, #tpu.memory_space<vmem>>, vector<1x4x352xf32>
    %4 = vector.shape_cast %3 : vector<1x4x352xf32> to vector<4x352xf32>
    %c0_3 = arith.constant 0 : index
    %c0_4 = arith.constant 0 : index
    %c0_5 = arith.constant 0 : index
    %5 = vector.load %arg3[%c0_3, %c0_4, %c0_5] : memref<1x4x490xf32, #tpu.memory_space<vmem>>, vector<1x4x352xf32>
    %6 = vector.shape_cast %5 : vector<1x4x352xf32> to vector<4x352xf32>
    %7 = arith.mulf %4, %6 : vector<4x352xf32>
    %cst = arith.constant dense<0.000000e+00> : vector<352xf32>
    %8 = vector.multi_reduction <add>, %7, %cst [0] : vector<4x352xf32> to vector<352xf32>
    %9 = vector.shape_cast %8 : vector<352xf32> to vector<1x352xf32>
    %c0_6 = arith.constant 0 : index
    %c0_7 = arith.constant 0 : index
    %10 = vector.load %arg5[%c0_6, %c0_7] : memref<49x352xf32, #tpu.memory_space<vmem>>, vector<1x352xf32>
    %11 = arith.addf %10, %9 : vector<1x352xf32>
    %c0_8 = arith.constant 0 : index
    %c0_9 = arith.constant 0 : index
    %12 = vector.load %arg5[%c0_8, %c0_9] : memref<49x352xf32, #tpu.memory_space<vmem>>, vector<1x352xf32>
    tpu.vector_store %arg5[%c0_8, %c0_9], %11 {strides = array<i32>} : memref<49x352xf32, #tpu.memory_space<vmem>>, vector<1x352xf32>,
    %c0_10 = arith.constant 0 : index
    %c0_11 = arith.constant 0 : index
    %c1 = arith.constant 1 : index
    %13 = vector.load %arg3[%c0_10, %c0_11, %c1] : memref<1x4x490xf32, #tpu.memory_space<vmem>>, vector<1x4x352xf32>
    %14 = vector.shape_cast %13 : vector<1x4x352xf32> to vector<4x352xf32>
    %15 = arith.mulf %4, %14 : vector<4x352xf32>
    %cst_12 = arith.constant dense<0.000000e+00> : vector<352xf32>
    %16 = vector.multi_reduction <add>, %15, %cst_12 [0] : vector<4x352xf32> to vector<352xf32>
    %17 = vector.shape_cast %16 : vector<352xf32> to vector<1x352xf32>
    %c1_13 = arith.constant 1 : index
    %c0_14 = arith.constant 0 : index
    %18 = vector.load %arg5[%c1_13, %c0_14] : memref<49x352xf32, #tpu.memory_space<vmem>>, vector<1x352xf32>
    %19 = arith.addf %18, %17 : vector<1x352xf32>
    %c1_15 = arith.constant 1 : index
    %c0_16 = arith.constant 0 : index
    %20 = vector.load %arg5[%c1_15, %c0_16] : memref<49x352xf32, #tpu.memory_space<vmem>>, vector<1x352xf32>
    tpu.vector_store %arg5[%c1_15, %c0_16], %19 {strides = array<i32>} : memref<49x352xf32, #tpu.memory_space<vmem>>, vector<1x352xf32>,
    %c0_17 = arith.constant 0 : index
    %c0_18 = arith.constant 0 : index
    %c2 = arith.constant 2 : index
    %21 = vector.load %arg3[%c0_17, %c0_18, %c2] : memref<1x4x490xf32, #tpu.memory_space<vmem>>, vector<1x4x352xf32>
    %22 = vector.shape_cast %21 : vector<1x4x352xf32> to vector<4x352xf32>
    %23 = arith.mulf %4, %22 : vector<4x352xf32>
    %cst_19 = arith.constant dense<0.000000e+00> : vector<352xf32>
    %24 = vector.multi_reduction <add>, %23, %cst_19 [0] : vector<4x352xf32> to vector<352xf32>
    %25 = vector.shape_cast %24 : vector<352xf32> to vector<1x352xf32>
    %c2_20 = arith.constant 2 : index
    %c0_21 = arith.constant 0 : index
    %26 = vector.load %arg5[%c2_20, %c0_21] : memref<49x352xf32, #tpu.memory_space<vmem>>, vector<1x352xf32>
    %27 = arith.addf %26, %25 : vector<1x352xf32>
    %c2_22 = arith.constant 2 : index
    %c0_23 = arith.constant 0 : index
    %28 = vector.load %arg5[%c2_22, %c0_23] : memref<49x352xf32, #tpu.memory_space<vmem>>, vector<1x352xf32>
    tpu.vector_store %arg5[%c2_22, %c0_23], %27 {strides = array<i32>} : memref<49x352xf32, #tpu.memory_space<vmem>>, vector<1x352xf32>,
    %c0_24 = arith.constant 0 : index
    %c0_25 = arith.constant 0 : index
    %c3 = arith.constant 3 : index
    %29 = vector.load %arg3[%c0_24, %c0_25, %c3] : memref<1x4x490xf32, #tpu.memory_space<vmem>>, vector<1x4x352xf32>
    %30 = vector.shape_cast %29 : vector<1x4x352xf32> to vector<4x352xf32>
    %31 = arith.mulf %4, %30 : vector<4x352xf32>
    %cst_26 = arith.constant dense<0.000000e+00> : vector<352xf32>
    %32 = vector.multi_reduction <add>, %31, %cst_26 [0] : vector<4x352xf32> to vector<352xf32>
    %33 = vector.shape_cast %32 : vector<352xf32> to vector<1x352xf32>
    %c3_27 = arith.constant 3 : index
    %c0_28 = arith.constant 0 : index
    %34 = vector.load %arg5[%c3_27, %c0_28] : memref<49x352xf32, #tpu.memory_space<vmem>>, vector<1x352xf32>
    %35 = arith.addf %34, %33 : vector<1x352xf32>
    %c3_29 = arith.constant 3 : index
    %c0_30 = arith.constant 0 : index
    %36 = vector.load %arg5[%c3_29, %c0_30] : memref<49x352xf32, #tpu.memory_space<vmem>>, vector<1x352xf32>
    tpu.vector_store %arg5[%c3_29, %c0_30], %35 {strides = array<i32>} : memref<49x352xf32, #tpu.memory_space<vmem>>, vector<1x352xf32>,
    %c0_31 = arith.constant 0 : index
    %c0_32 = arith.constant 0 : index
    %c4 = arith.constant 4 : index
    %37 = vector.load %arg3[%c0_31, %c0_32, %c4] : memref<1x4x490xf32, #tpu.memory_space<vmem>>, vector<1x4x352xf32>
    %38 = vector.shape_cast %37 : vector<1x4x352xf32> to vector<4x352xf32>
    %39 = arith.mulf %4, %38 : vector<4x352xf32>
    %cst_33 = arith.constant dense<0.000000e+00> : vector<352xf32>
    %40 = vector.multi_reduction <add>, %39, %cst_33 [0] : vector<4x352xf32> to vector<352xf32>
    %41 = vector.shape_cast %40 : vector<352xf32> to vector<1x352xf32>
    %c4_34 = arith.constant 4 : index
    %c0_35 = arith.constant 0 : index
    %42 = vector.load %arg5[%c4_34, %c0_35] : memref<49x352xf32, #tpu.memory_space<vmem>>, vector<1x352xf32>
    %43 = arith.addf %42, %41 : vector<1x352xf32>
    %c4_36 = arith.constant 4 : index
    %c0_37 = arith.constant 0 : index
    %44 = vector.load %arg5[%c4_36, %c0_37] : memref<49x352xf32, #tpu.memory_space<vmem>>, vector<1x352xf32>
    tpu.vector_store %arg5[%c4_36, %c0_37], %43 {strides = array<i32>} : memref<49x352xf32, #tpu.memory_space<vmem>>, vector<1x352xf32>,
    %c0_38 = arith.constant 0 : index
    %c0_39 = arith.constant 0 : index
    %c5 = arith.constant 5 : index
    %45 = vector.load %arg3[%c0_38, %c0_39, %c5] : memref<1x4x490xf32, #tpu.memory_space<vmem>>, vector<1x4x352xf32>
    %46 = vector.shape_cast %45 : vector<1x4x352xf32> to vector<4x352xf32>
    %47 = arith.mulf %4, %46 : vector<4x352xf32>
    %cst_40 = arith.constant dense<0.000000e+00> : vector<352xf32>
    %48 = vector.multi_reduction <add>, %47, %cst_40 [0] : vector<4x352xf32> to vector<352xf32>
    %49 = vector.shape_cast %48 : vector<352xf32> to vector<1x352xf32>
    %c5_41 = arith.constant 5 : index
    %c0_42 = arith.constant 0 : index
    %50 = vector.load %arg5[%c5_41, %c0_42] : memref<49x352xf32, #tpu.memory_space<vmem>>, vector<1x352xf32>
    %51 = arith.addf %50, %49 : vector<1x352xf32>
    %c5_43 = arith.constant 5 : index
    %c0_44 = arith.constant 0 : index
    %52 = vector.load %arg5[%c5_43, %c0_44] : memref<49x352xf32, #tpu.memory_space<vmem>>, vector<1x352xf32>
    tpu.vector_store %arg5[%c5_43, %c0_44], %51 {strides = array<i32>} : memref<49x352xf32, #tpu.memory_space<vmem>>, vector<1x352xf32>,
    %c0_45 = arith.constant 0 : index
    %c0_46 = arith.constant 0 : index
    %c6 = arith.constant 6 : index
    %53 = vector.load %arg3[%c0_45, %c0_46, %c6] : memref<1x4x490xf32, #tpu.memory_space<vmem>>, vector<1x4x352xf32>
    %54 = vector.shape_cast %53 : vector<1x4x352xf32> to vector<4x352xf32>
    %55 = arith.mulf %4, %54 : vector<4x352xf32>
    %cst_47 = arith.constant dense<0.000000e+00> : vector<352xf32>
    %56 = vector.multi_reduction <add>, %55, %cst_47 [0] : vector<4x352xf32> to vector<352xf32>
    %57 = vector.shape_cast %56 : vector<352xf32> to vector<1x352xf32>
    %c6_48 = arith.constant 6 : index
    %c0_49 = arith.constant 0 : index
    %58 = vector.load %arg5[%c6_48, %c0_49] : memref<49x352xf32, #tpu.memory_space<vmem>>, vector<1x352xf32>
    %59 = arith.addf %58, %57 : vector<1x352xf32>
    %c6_50 = arith.constant 6 : index
    %c0_51 = arith.constant 0 : index
    %60 = vector.load %arg5[%c6_50, %c0_51] : memref<49x352xf32, #tpu.memory_space<vmem>>, vector<1x352xf32>
    tpu.vector_store %arg5[%c6_50, %c0_51], %59 {strides = array<i32>} : memref<49x352xf32, #tpu.memory_space<vmem>>, vector<1x352xf32>,
    %c0_52 = arith.constant 0 : index
    %c0_53 = arith.constant 0 : index
    %c22 = arith.constant 22 : index
    %61 = vector.load %arg3[%c0_52, %c0_53, %c22] : memref<1x4x490xf32, #tpu.memory_space<vmem>>, vector<1x4x352xf32>
    %62 = vector.shape_cast %61 : vector<1x4x352xf32> to vector<4x352xf32>
    %63 = arith.mulf %4, %62 : vector<4x352xf32>
    %cst_54 = arith.constant dense<0.000000e+00> : vector<352xf32>
    %64 = vector.multi_reduction <add>, %63, %cst_54 [0] : vector<4x352xf32> to vector<352xf32>
    %65 = vector.shape_cast %64 : vector<352xf32> to vector<1x352xf32>
    %c7 = arith.constant 7 : index
    %c0_55 = arith.constant 0 : index
    %66 = vector.load %arg5[%c7, %c0_55] : memref<49x352xf32, #tpu.memory_space<vmem>>, vector<1x352xf32>
    %67 = arith.addf %66, %65 : vector<1x352xf32>
    %c7_56 = arith.constant 7 : index
    %c0_57 = arith.constant 0 : index
    %68 = vector.load %arg5[%c7_56, %c0_57] : memref<49x352xf32, #tpu.memory_space<vmem>>, vector<1x352xf32>
    tpu.vector_store %arg5[%c7_56, %c0_57], %67 {strides = array<i32>} : memref<49x352xf32, #tpu.memory_space<vmem>>, vector<1x352xf32>,
    %c0_58 = arith.constant 0 : index
    %c0_59 = arith.constant 0 : index
    %c23 = arith.constant 23 : index
    %69 = vector.load %arg3[%c0_58, %c0_59, %c23] : memref<1x4x490xf32, #tpu.memory_space<vmem>>, vector<1x4x352xf32>
    %70 = vector.shape_cast %69 : vector<1x4x352xf32> to vector<4x352xf32>
    %71 = arith.mulf %4, %70 : vector<4x352xf32>
    %cst_60 = arith.constant dense<0.000000e+00> : vector<352xf32>
    %72 = vector.multi_reduction <add>, %71, %cst_60 [0] : vector<4x352xf32> to vector<352xf32>
    %73 = vector.shape_cast %72 : vector<352xf32> to vector<1x352xf32>
    %c8 = arith.constant 8 : index
    %c0_61 = arith.constant 0 : index
    %74 = vector.load %arg5[%c8, %c0_61] : memref<49x352xf32, #tpu.memory_space<vmem>>, vector<1x352xf32>
    %75 = arith.addf %74, %73 : vector<1x352xf32>
    %c8_62 = arith.constant 8 : index
    %c0_63 = arith.constant 0 : index
    %76 = vector.load %arg5[%c8_62, %c0_63] : memref<49x352xf32, #tpu.memory_space<vmem>>, vector<1x352xf32>
    tpu.vector_store %arg5[%c8_62, %c0_63], %75 {strides = array<i32>} : memref<49x352xf32, #tpu.memory_space<vmem>>, vector<1x352xf32>,
    %c0_64 = arith.constant 0 : index
    %c0_65 = arith.constant 0 : index
    %c24 = arith.constant 24 : index
    %77 = vector.load %arg3[%c0_64, %c0_65, %c24] : memref<1x4x490xf32, #tpu.memory_space<vmem>>, vector<1x4x352xf32>
    %78 = vector.shape_cast %77 : vector<1x4x352xf32> to vector<4x352xf32>
    %79 = arith.mulf %4, %78 : vector<4x352xf32>
    %cst_66 = arith.constant dense<0.000000e+00> : vector<352xf32>
    %80 = vector.multi_reduction <add>, %79, %cst_66 [0] : vector<4x352xf32> to vector<352xf32>
    %81 = vector.shape_cast %80 : vector<352xf32> to vector<1x352xf32>
    %c9 = arith.constant 9 : index
    %c0_67 = arith.constant 0 : index
    %82 = vector.load %arg5[%c9, %c0_67] : memref<49x352xf32, #tpu.memory_space<vmem>>, vector<1x352xf32>
    %83 = arith.addf %82, %81 : vector<1x352xf32>
    %c9_68 = arith.constant 9 : index
    %c0_69 = arith.constant 0 : index
    %84 = vector.load %arg5[%c9_68, %c0_69] : memref<49x352xf32, #tpu.memory_space<vmem>>, vector<1x352xf32>
    tpu.vector_store %arg5[%c9_68, %c0_69], %83 {strides = array<i32>} : memref<49x352xf32, #tpu.memory_space<vmem>>, vector<1x352xf32>,
    %c0_70 = arith.constant 0 : index
    %c0_71 = arith.constant 0 : index
    %c25 = arith.constant 25 : index
    %85 = vector.load %arg3[%c0_70, %c0_71, %c25] : memref<1x4x490xf32, #tpu.memory_space<vmem>>, vector<1x4x352xf32>
    %86 = vector.shape_cast %85 : vector<1x4x352xf32> to vector<4x352xf32>
    %87 = arith.mulf %4, %86 : vector<4x352xf32>
    %cst_72 = arith.constant dense<0.000000e+00> : vector<352xf32>
    %88 = vector.multi_reduction <add>, %87, %cst_72 [0] : vector<4x352xf32> to vector<352xf32>
    %89 = vector.shape_cast %88 : vector<352xf32> to vector<1x352xf32>
    %c10 = arith.constant 10 : index
    %c0_73 = arith.constant 0 : index
    %90 = vector.load %arg5[%c10, %c0_73] : memref<49x352xf32, #tpu.memory_space<vmem>>, vector<1x352xf32>
    %91 = arith.addf %90, %89 : vector<1x352xf32>
    %c10_74 = arith.constant 10 : index
    %c0_75 = arith.constant 0 : index
    %92 = vector.load %arg5[%c10_74, %c0_75] : memref<49x352xf32, #tpu.memory_space<vmem>>, vector<1x352xf32>
    tpu.vector_store %arg5[%c10_74, %c0_75], %91 {strides = array<i32>} : memref<49x352xf32, #tpu.memory_space<vmem>>, vector<1x352xf32>,
    %c0_76 = arith.constant 0 : index
    %c0_77 = arith.constant 0 : index
    %c26 = arith.constant 26 : index
    %93 = vector.load %arg3[%c0_76, %c0_77, %c26] : memref<1x4x490xf32, #tpu.memory_space<vmem>>, vector<1x4x352xf32>
    %94 = vector.shape_cast %93 : vector<1x4x352xf32> to vector<4x352xf32>
    %95 = arith.mulf %4, %94 : vector<4x352xf32>
    %cst_78 = arith.constant dense<0.000000e+00> : vector<352xf32>
    %96 = vector.multi_reduction <add>, %95, %cst_78 [0] : vector<4x352xf32> to vector<352xf32>
    %97 = vector.shape_cast %96 : vector<352xf32> to vector<1x352xf32>
    %c11 = arith.constant 11 : index
    %c0_79 = arith.constant 0 : index
    %98 = vector.load %arg5[%c11, %c0_79] : memref<49x352xf32, #tpu.memory_space<vmem>>, vector<1x352xf32>
    %99 = arith.addf %98, %97 : vector<1x352xf32>
    %c11_80 = arith.constant 11 : index
    %c0_81 = arith.constant 0 : index
    %100 = vector.load %arg5[%c11_80, %c0_81] : memref<49x352xf32, #tpu.memory_space<vmem>>, vector<1x352xf32>
    tpu.vector_store %arg5[%c11_80, %c0_81], %99 {strides = array<i32>} : memref<49x352xf32, #tpu.memory_space<vmem>>, vector<1x352xf32>,
    %c0_82 = arith.constant 0 : index
    %c0_83 = arith.constant 0 : index
    %c27 = arith.constant 27 : index
    %101 = vector.load %arg3[%c0_82, %c0_83, %c27] : memref<1x4x490xf32, #tpu.memory_space<vmem>>, vector<1x4x352xf32>
    %102 = vector.shape_cast %101 : vector<1x4x352xf32> to vector<4x352xf32>
    %103 = arith.mulf %4, %102 : vector<4x352xf32>
    %cst_84 = arith.constant dense<0.000000e+00> : vector<352xf32>
    %104 = vector.multi_reduction <add>, %103, %cst_84 [0] : vector<4x352xf32> to vector<352xf32>
    %105 = vector.shape_cast %104 : vector<352xf32> to vector<1x352xf32>
    %c12 = arith.constant 12 : index
    %c0_85 = arith.constant 0 : index
    %106 = vector.load %arg5[%c12, %c0_85] : memref<49x352xf32, #tpu.memory_space<vmem>>, vector<1x352xf32>
    %107 = arith.addf %106, %105 : vector<1x352xf32>
    %c12_86 = arith.constant 12 : index
    %c0_87 = arith.constant 0 : index
    %108 = vector.load %arg5[%c12_86, %c0_87] : memref<49x352xf32, #tpu.memory_space<vmem>>, vector<1x352xf32>
    tpu.vector_store %arg5[%c12_86, %c0_87], %107 {strides = array<i32>} : memref<49x352xf32, #tpu.memory_space<vmem>>, vector<1x352xf32>,
    %c0_88 = arith.constant 0 : index
    %c0_89 = arith.constant 0 : index
    %c28 = arith.constant 28 : index
    %109 = vector.load %arg3[%c0_88, %c0_89, %c28] : memref<1x4x490xf32, #tpu.memory_space<vmem>>, vector<1x4x352xf32>
    %110 = vector.shape_cast %109 : vector<1x4x352xf32> to vector<4x352xf32>
    %111 = arith.mulf %4, %110 : vector<4x352xf32>
    %cst_90 = arith.constant dense<0.000000e+00> : vector<352xf32>
    %112 = vector.multi_reduction <add>, %111, %cst_90 [0] : vector<4x352xf32> to vector<352xf32>
    %113 = vector.shape_cast %112 : vector<352xf32> to vector<1x352xf32>
    %c13 = arith.constant 13 : index
    %c0_91 = arith.constant 0 : index
    %114 = vector.load %arg5[%c13, %c0_91] : memref<49x352xf32, #tpu.memory_space<vmem>>, vector<1x352xf32>
    %115 = arith.addf %114, %113 : vector<1x352xf32>
    %c13_92 = arith.constant 13 : index
    %c0_93 = arith.constant 0 : index
    %116 = vector.load %arg5[%c13_92, %c0_93] : memref<49x352xf32, #tpu.memory_space<vmem>>, vector<1x352xf32>
    tpu.vector_store %arg5[%c13_92, %c0_93], %115 {strides = array<i32>} : memref<49x352xf32, #tpu.memory_space<vmem>>, vector<1x352xf32>,
    %c0_94 = arith.constant 0 : index
    %c0_95 = arith.constant 0 : index
    %c44 = arith.constant 44 : index
    %117 = vector.load %arg3[%c0_94, %c0_95, %c44] : memref<1x4x490xf32, #tpu.memory_space<vmem>>, vector<1x4x352xf32>
    %118 = vector.shape_cast %117 : vector<1x4x352xf32> to vector<4x352xf32>
    %119 = arith.mulf %4, %118 : vector<4x352xf32>
    %cst_96 = arith.constant dense<0.000000e+00> : vector<352xf32>
    %120 = vector.multi_reduction <add>, %119, %cst_96 [0] : vector<4x352xf32> to vector<352xf32>
    %121 = vector.shape_cast %120 : vector<352xf32> to vector<1x352xf32>
    %c14 = arith.constant 14 : index
    %c0_97 = arith.constant 0 : index
    %122 = vector.load %arg5[%c14, %c0_97] : memref<49x352xf32, #tpu.memory_space<vmem>>, vector<1x352xf32>
    %123 = arith.addf %122, %121 : vector<1x352xf32>
    %c14_98 = arith.constant 14 : index
    %c0_99 = arith.constant 0 : index
    %124 = vector.load %arg5[%c14_98, %c0_99] : memref<49x352xf32, #tpu.memory_space<vmem>>, vector<1x352xf32>
    tpu.vector_store %arg5[%c14_98, %c0_99], %123 {strides = array<i32>} : memref<49x352xf32, #tpu.memory_space<vmem>>, vector<1x352xf32>,
    %c0_100 = arith.constant 0 : index
    %c0_101 = arith.constant 0 : index
    %c45 = arith.constant 45 : index
    %125 = vector.load %arg3[%c0_100, %c0_101, %c45] : memref<1x4x490xf32, #tpu.memory_space<vmem>>, vector<1x4x352xf32>
    %126 = vector.shape_cast %125 : vector<1x4x352xf32> to vector<4x352xf32>
    %127 = arith.mulf %4, %126 : vector<4x352xf32>
    %cst_102 = arith.constant dense<0.000000e+00> : vector<352xf32>
    %128 = vector.multi_reduction <add>, %127, %cst_102 [0] : vector<4x352xf32> to vector<352xf32>
    %129 = vector.shape_cast %128 : vector<352xf32> to vector<1x352xf32>
    %c15 = arith.constant 15 : index
    %c0_103 = arith.constant 0 : index
    %130 = vector.load %arg5[%c15, %c0_103] : memref<49x352xf32, #tpu.memory_space<vmem>>, vector<1x352xf32>
    %131 = arith.addf %130, %129 : vector<1x352xf32>
    %c15_104 = arith.constant 15 : index
    %c0_105 = arith.constant 0 : index
    %132 = vector.load %arg5[%c15_104, %c0_105] : memref<49x352xf32, #tpu.memory_space<vmem>>, vector<1x352xf32>
    tpu.vector_store %arg5[%c15_104, %c0_105], %131 {strides = array<i32>} : memref<49x352xf32, #tpu.memory_space<vmem>>, vector<1x352xf32>,
    %c0_106 = arith.constant 0 : index
    %c0_107 = arith.constant 0 : index
    %c46 = arith.constant 46 : index
    %133 = vector.load %arg3[%c0_106, %c0_107, %c46] : memref<1x4x490xf32, #tpu.memory_space<vmem>>, vector<1x4x352xf32>
    %134 = vector.shape_cast %133 : vector<1x4x352xf32> to vector<4x352xf32>
    %135 = arith.mulf %4, %134 : vector<4x352xf32>
    %cst_108 = arith.constant dense<0.000000e+00> : vector<352xf32>
    %136 = vector.multi_reduction <add>, %135, %cst_108 [0] : vector<4x352xf32> to vector<352xf32>
    %137 = vector.shape_cast %136 : vector<352xf32> to vector<1x352xf32>
    %c16 = arith.constant 16 : index
    %c0_109 = arith.constant 0 : index
    %138 = vector.load %arg5[%c16, %c0_109] : memref<49x352xf32, #tpu.memory_space<vmem>>, vector<1x352xf32>
    %139 = arith.addf %138, %137 : vector<1x352xf32>
    %c16_110 = arith.constant 16 : index
    %c0_111 = arith.constant 0 : index
    %140 = vector.load %arg5[%c16_110, %c0_111] : memref<49x352xf32, #tpu.memory_space<vmem>>, vector<1x352xf32>
    tpu.vector_store %arg5[%c16_110, %c0_111], %139 {strides = array<i32>} : memref<49x352xf32, #tpu.memory_space<vmem>>, vector<1x352xf32>,
    %c0_112 = arith.constant 0 : index
    %c0_113 = arith.constant 0 : index
    %c47 = arith.constant 47 : index
    %141 = vector.load %arg3[%c0_112, %c0_113, %c47] : memref<1x4x490xf32, #tpu.memory_space<vmem>>, vector<1x4x352xf32>
    %142 = vector.shape_cast %141 : vector<1x4x352xf32> to vector<4x352xf32>
    %143 = arith.mulf %4, %142 : vector<4x352xf32>
    %cst_114 = arith.constant dense<0.000000e+00> : vector<352xf32>
    %144 = vector.multi_reduction <add>, %143, %cst_114 [0] : vector<4x352xf32> to vector<352xf32>
    %145 = vector.shape_cast %144 : vector<352xf32> to vector<1x352xf32>
    %c17 = arith.constant 17 : index
    %c0_115 = arith.constant 0 : index
    %146 = vector.load %arg5[%c17, %c0_115] : memref<49x352xf32, #tpu.memory_space<vmem>>, vector<1x352xf32>
    %147 = arith.addf %146, %145 : vector<1x352xf32>
    %c17_116 = arith.constant 17 : index
    %c0_117 = arith.constant 0 : index
    %148 = vector.load %arg5[%c17_116, %c0_117] : memref<49x352xf32, #tpu.memory_space<vmem>>, vector<1x352xf32>
    tpu.vector_store %arg5[%c17_116, %c0_117], %147 {strides = array<i32>} : memref<49x352xf32, #tpu.memory_space<vmem>>, vector<1x352xf32>,
    %c0_118 = arith.constant 0 : index
    %c0_119 = arith.constant 0 : index
    %c48 = arith.constant 48 : index
    %149 = vector.load %arg3[%c0_118, %c0_119, %c48] : memref<1x4x490xf32, #tpu.memory_space<vmem>>, vector<1x4x352xf32>
    %150 = vector.shape_cast %149 : vector<1x4x352xf32> to vector<4x352xf32>
    %151 = arith.mulf %4, %150 : vector<4x352xf32>
    %cst_120 = arith.constant dense<0.000000e+00> : vector<352xf32>
    %152 = vector.multi_reduction <add>, %151, %cst_120 [0] : vector<4x352xf32> to vector<352xf32>
    %153 = vector.shape_cast %152 : vector<352xf32> to vector<1x352xf32>
    %c18 = arith.constant 18 : index
    %c0_121 = arith.constant 0 : index
    %154 = vector.load %arg5[%c18, %c0_121] : memref<49x352xf32, #tpu.memory_space<vmem>>, vector<1x352xf32>
    %155 = arith.addf %154, %153 : vector<1x352xf32>
    %c18_122 = arith.constant 18 : index
    %c0_123 = arith.constant 0 : index
    %156 = vector.load %arg5[%c18_122, %c0_123] : memref<49x352xf32, #tpu.memory_space<vmem>>, vector<1x352xf32>
    tpu.vector_store %arg5[%c18_122, %c0_123], %155 {strides = array<i32>} : memref<49x352xf32, #tpu.memory_space<vmem>>, vector<1x352xf32>,
    %c0_124 = arith.constant 0 : index
    %c0_125 = arith.constant 0 : index
    %c49 = arith.constant 49 : index
    %157 = vector.load %arg3[%c0_124, %c0_125, %c49] : memref<1x4x490xf32, #tpu.memory_space<vmem>>, vector<1x4x352xf32>
    %158 = vector.shape_cast %157 : vector<1x4x352xf32> to vector<4x352xf32>
    %159 = arith.mulf %4, %158 : vector<4x352xf32>
    %cst_126 = arith.constant dense<0.000000e+00> : vector<352xf32>
    %160 = vector.multi_reduction <add>, %159, %cst_126 [0] : vector<4x352xf32> to vector<352xf32>
    %161 = vector.shape_cast %160 : vector<352xf32> to vector<1x352xf32>
    %c19 = arith.constant 19 : index
    %c0_127 = arith.constant 0 : index
    %162 = vector.load %arg5[%c19, %c0_127] : memref<49x352xf32, #tpu.memory_space<vmem>>, vector<1x352xf32>
    %163 = arith.addf %162, %161 : vector<1x352xf32>
    %c19_128 = arith.constant 19 : index
    %c0_129 = arith.constant 0 : index
    %164 = vector.load %arg5[%c19_128, %c0_129] : memref<49x352xf32, #tpu.memory_space<vmem>>, vector<1x352xf32>
    tpu.vector_store %arg5[%c19_128, %c0_129], %163 {strides = array<i32>} : memref<49x352xf32, #tpu.memory_space<vmem>>, vector<1x352xf32>,
    %c0_130 = arith.constant 0 : index
    %c0_131 = arith.constant 0 : index
    %c50 = arith.constant 50 : index
    %165 = vector.load %arg3[%c0_130, %c0_131, %c50] : memref<1x4x490xf32, #tpu.memory_space<vmem>>, vector<1x4x352xf32>
    %166 = vector.shape_cast %165 : vector<1x4x352xf32> to vector<4x352xf32>
    %167 = arith.mulf %4, %166 : vector<4x352xf32>
    %cst_132 = arith.constant dense<0.000000e+00> : vector<352xf32>
    %168 = vector.multi_reduction <add>, %167, %cst_132 [0] : vector<4x352xf32> to vector<352xf32>
    %169 = vector.shape_cast %168 : vector<352xf32> to vector<1x352xf32>
    %c20 = arith.constant 20 : index
    %c0_133 = arith.constant 0 : index
    %170 = vector.load %arg5[%c20, %c0_133] : memref<49x352xf32, #tpu.memory_space<vmem>>, vector<1x352xf32>
    %171 = arith.addf %170, %169 : vector<1x352xf32>
    %c20_134 = arith.constant 20 : index
    %c0_135 = arith.constant 0 : index
    %172 = vector.load %arg5[%c20_134, %c0_135] : memref<49x352xf32, #tpu.memory_space<vmem>>, vector<1x352xf32>
    tpu.vector_store %arg5[%c20_134, %c0_135], %171 {strides = array<i32>} : memref<49x352xf32, #tpu.memory_space<vmem>>, vector<1x352xf32>,
    %c0_136 = arith.constant 0 : index
    %c0_137 = arith.constant 0 : index
    %c66 = arith.constant 66 : index
    %173 = vector.load %arg3[%c0_136, %c0_137, %c66] : memref<1x4x490xf32, #tpu.memory_space<vmem>>, vector<1x4x352xf32>
    %174 = vector.shape_cast %173 : vector<1x4x352xf32> to vector<4x352xf32>
    %175 = arith.mulf %4, %174 : vector<4x352xf32>
    %cst_138 = arith.constant dense<0.000000e+00> : vector<352xf32>
    %176 = vector.multi_reduction <add>, %175, %cst_138 [0] : vector<4x352xf32> to vector<352xf32>
    %177 = vector.shape_cast %176 : vector<352xf32> to vector<1x352xf32>
    %c21 = arith.constant 21 : index
    %c0_139 = arith.constant 0 : index
    %178 = vector.load %arg5[%c21, %c0_139] : memref<49x352xf32, #tpu.memory_space<vmem>>, vector<1x352xf32>
    %179 = arith.addf %178, %177 : vector<1x352xf32>
    %c21_140 = arith.constant 21 : index
    %c0_141 = arith.constant 0 : index
    %180 = vector.load %arg5[%c21_140, %c0_141] : memref<49x352xf32, #tpu.memory_space<vmem>>, vector<1x352xf32>
    tpu.vector_store %arg5[%c21_140, %c0_141], %179 {strides = array<i32>} : memref<49x352xf32, #tpu.memory_space<vmem>>, vector<1x352xf32>,
    %c0_142 = arith.constant 0 : index
    %c0_143 = arith.constant 0 : index
    %c67 = arith.constant 67 : index
    %181 = vector.load %arg3[%c0_142, %c0_143, %c67] : memref<1x4x490xf32, #tpu.memory_space<vmem>>, vector<1x4x352xf32>
    %182 = vector.shape_cast %181 : vector<1x4x352xf32> to vector<4x352xf32>
    %183 = arith.mulf %4, %182 : vector<4x352xf32>
    %cst_144 = arith.constant dense<0.000000e+00> : vector<352xf32>
    %184 = vector.multi_reduction <add>, %183, %cst_144 [0] : vector<4x352xf32> to vector<352xf32>
    %185 = vector.shape_cast %184 : vector<352xf32> to vector<1x352xf32>
    %c22_145 = arith.constant 22 : index
    %c0_146 = arith.constant 0 : index
    %186 = vector.load %arg5[%c22_145, %c0_146] : memref<49x352xf32, #tpu.memory_space<vmem>>, vector<1x352xf32>
    %187 = arith.addf %186, %185 : vector<1x352xf32>
    %c22_147 = arith.constant 22 : index
    %c0_148 = arith.constant 0 : index
    %188 = vector.load %arg5[%c22_147, %c0_148] : memref<49x352xf32, #tpu.memory_space<vmem>>, vector<1x352xf32>
    tpu.vector_store %arg5[%c22_147, %c0_148], %187 {strides = array<i32>} : memref<49x352xf32, #tpu.memory_space<vmem>>, vector<1x352xf32>,
    %c0_149 = arith.constant 0 : index
    %c0_150 = arith.constant 0 : index
    %c68 = arith.constant 68 : index
    %189 = vector.load %arg3[%c0_149, %c0_150, %c68] : memref<1x4x490xf32, #tpu.memory_space<vmem>>, vector<1x4x352xf32>
    %190 = vector.shape_cast %189 : vector<1x4x352xf32> to vector<4x352xf32>
    %191 = arith.mulf %4, %190 : vector<4x352xf32>
    %cst_151 = arith.constant dense<0.000000e+00> : vector<352xf32>
    %192 = vector.multi_reduction <add>, %191, %cst_151 [0] : vector<4x352xf32> to vector<352xf32>
    %193 = vector.shape_cast %192 : vector<352xf32> to vector<1x352xf32>
    %c23_152 = arith.constant 23 : index
    %c0_153 = arith.constant 0 : index
    %194 = vector.load %arg5[%c23_152, %c0_153] : memref<49x352xf32, #tpu.memory_space<vmem>>, vector<1x352xf32>
    %195 = arith.addf %194, %193 : vector<1x352xf32>
    %c23_154 = arith.constant 23 : index
    %c0_155 = arith.constant 0 : index
    %196 = vector.load %arg5[%c23_154, %c0_155] : memref<49x352xf32, #tpu.memory_space<vmem>>, vector<1x352xf32>
    tpu.vector_store %arg5[%c23_154, %c0_155], %195 {strides = array<i32>} : memref<49x352xf32, #tpu.memory_space<vmem>>, vector<1x352xf32>,
    %c0_156 = arith.constant 0 : index
    %c0_157 = arith.constant 0 : index
    %c69 = arith.constant 69 : index
    %197 = vector.load %arg3[%c0_156, %c0_157, %c69] : memref<1x4x490xf32, #tpu.memory_space<vmem>>, vector<1x4x352xf32>
    %198 = vector.shape_cast %197 : vector<1x4x352xf32> to vector<4x352xf32>
    %199 = arith.mulf %4, %198 : vector<4x352xf32>
    %cst_158 = arith.constant dense<0.000000e+00> : vector<352xf32>
    %200 = vector.multi_reduction <add>, %199, %cst_158 [0] : vector<4x352xf32> to vector<352xf32>
    %201 = vector.shape_cast %200 : vector<352xf32> to vector<1x352xf32>
    %c24_159 = arith.constant 24 : index
    %c0_160 = arith.constant 0 : index
    %202 = vector.load %arg5[%c24_159, %c0_160] : memref<49x352xf32, #tpu.memory_space<vmem>>, vector<1x352xf32>
    %203 = arith.addf %202, %201 : vector<1x352xf32>
    %c24_161 = arith.constant 24 : index
    %c0_162 = arith.constant 0 : index
    %204 = vector.load %arg5[%c24_161, %c0_162] : memref<49x352xf32, #tpu.memory_space<vmem>>, vector<1x352xf32>
    tpu.vector_store %arg5[%c24_161, %c0_162], %203 {strides = array<i32>} : memref<49x352xf32, #tpu.memory_space<vmem>>, vector<1x352xf32>,
    %c0_163 = arith.constant 0 : index
    %c0_164 = arith.constant 0 : index
    %c70 = arith.constant 70 : index
    %205 = vector.load %arg3[%c0_163, %c0_164, %c70] : memref<1x4x490xf32, #tpu.memory_space<vmem>>, vector<1x4x352xf32>
    %206 = vector.shape_cast %205 : vector<1x4x352xf32> to vector<4x352xf32>
    %207 = arith.mulf %4, %206 : vector<4x352xf32>
    %cst_165 = arith.constant dense<0.000000e+00> : vector<352xf32>
    %208 = vector.multi_reduction <add>, %207, %cst_165 [0] : vector<4x352xf32> to vector<352xf32>
    %209 = vector.shape_cast %208 : vector<352xf32> to vector<1x352xf32>
    %c25_166 = arith.constant 25 : index
    %c0_167 = arith.constant 0 : index
    %210 = vector.load %arg5[%c25_166, %c0_167] : memref<49x352xf32, #tpu.memory_space<vmem>>, vector<1x352xf32>
    %211 = arith.addf %210, %209 : vector<1x352xf32>
    %c25_168 = arith.constant 25 : index
    %c0_169 = arith.constant 0 : index
    %212 = vector.load %arg5[%c25_168, %c0_169] : memref<49x352xf32, #tpu.memory_space<vmem>>, vector<1x352xf32>
    tpu.vector_store %arg5[%c25_168, %c0_169], %211 {strides = array<i32>} : memref<49x352xf32, #tpu.memory_space<vmem>>, vector<1x352xf32>,
    %c0_170 = arith.constant 0 : index
    %c0_171 = arith.constant 0 : index
    %c71 = arith.constant 71 : index
    %213 = vector.load %arg3[%c0_170, %c0_171, %c71] : memref<1x4x490xf32, #tpu.memory_space<vmem>>, vector<1x4x352xf32>
    %214 = vector.shape_cast %213 : vector<1x4x352xf32> to vector<4x352xf32>
    %215 = arith.mulf %4, %214 : vector<4x352xf32>
    %cst_172 = arith.constant dense<0.000000e+00> : vector<352xf32>
    %216 = vector.multi_reduction <add>, %215, %cst_172 [0] : vector<4x352xf32> to vector<352xf32>
    %217 = vector.shape_cast %216 : vector<352xf32> to vector<1x352xf32>
    %c26_173 = arith.constant 26 : index
    %c0_174 = arith.constant 0 : index
    %218 = vector.load %arg5[%c26_173, %c0_174] : memref<49x352xf32, #tpu.memory_space<vmem>>, vector<1x352xf32>
    %219 = arith.addf %218, %217 : vector<1x352xf32>
    %c26_175 = arith.constant 26 : index
    %c0_176 = arith.constant 0 : index
    %220 = vector.load %arg5[%c26_175, %c0_176] : memref<49x352xf32, #tpu.memory_space<vmem>>, vector<1x352xf32>
    tpu.vector_store %arg5[%c26_175, %c0_176], %219 {strides = array<i32>} : memref<49x352xf32, #tpu.memory_space<vmem>>, vector<1x352xf32>,
    %c0_177 = arith.constant 0 : index
    %c0_178 = arith.constant 0 : index
    %c72 = arith.constant 72 : index
    %221 = vector.load %arg3[%c0_177, %c0_178, %c72] : memref<1x4x490xf32, #tpu.memory_space<vmem>>, vector<1x4x352xf32>
    %222 = vector.shape_cast %221 : vector<1x4x352xf32> to vector<4x352xf32>
    %223 = arith.mulf %4, %222 : vector<4x352xf32>
    %cst_179 = arith.constant dense<0.000000e+00> : vector<352xf32>
    %224 = vector.multi_reduction <add>, %223, %cst_179 [0] : vector<4x352xf32> to vector<352xf32>
    %225 = vector.shape_cast %224 : vector<352xf32> to vector<1x352xf32>
    %c27_180 = arith.constant 27 : index
    %c0_181 = arith.constant 0 : index
    %226 = vector.load %arg5[%c27_180, %c0_181] : memref<49x352xf32, #tpu.memory_space<vmem>>, vector<1x352xf32>
    %227 = arith.addf %226, %225 : vector<1x352xf32>
    %c27_182 = arith.constant 27 : index
    %c0_183 = arith.constant 0 : index
    %228 = vector.load %arg5[%c27_182, %c0_183] : memref<49x352xf32, #tpu.memory_space<vmem>>, vector<1x352xf32>
    tpu.vector_store %arg5[%c27_182, %c0_183], %227 {strides = array<i32>} : memref<49x352xf32, #tpu.memory_space<vmem>>, vector<1x352xf32>,
    %c0_184 = arith.constant 0 : index
    %c0_185 = arith.constant 0 : index
    %c88 = arith.constant 88 : index
    %229 = vector.load %arg3[%c0_184, %c0_185, %c88] : memref<1x4x490xf32, #tpu.memory_space<vmem>>, vector<1x4x352xf32>
    %230 = vector.shape_cast %229 : vector<1x4x352xf32> to vector<4x352xf32>
    %231 = arith.mulf %4, %230 : vector<4x352xf32>
    %cst_186 = arith.constant dense<0.000000e+00> : vector<352xf32>
    %232 = vector.multi_reduction <add>, %231, %cst_186 [0] : vector<4x352xf32> to vector<352xf32>
    %233 = vector.shape_cast %232 : vector<352xf32> to vector<1x352xf32>
    %c28_187 = arith.constant 28 : index
    %c0_188 = arith.constant 0 : index
    %234 = vector.load %arg5[%c28_187, %c0_188] : memref<49x352xf32, #tpu.memory_space<vmem>>, vector<1x352xf32>
    %235 = arith.addf %234, %233 : vector<1x352xf32>
    %c28_189 = arith.constant 28 : index
    %c0_190 = arith.constant 0 : index
    %236 = vector.load %arg5[%c28_189, %c0_190] : memref<49x352xf32, #tpu.memory_space<vmem>>, vector<1x352xf32>
    tpu.vector_store %arg5[%c28_189, %c0_190], %235 {strides = array<i32>} : memref<49x352xf32, #tpu.memory_space<vmem>>, vector<1x352xf32>,
    %c0_191 = arith.constant 0 : index
    %c0_192 = arith.constant 0 : index
    %c89 = arith.constant 89 : index
    %237 = vector.load %arg3[%c0_191, %c0_192, %c89] : memref<1x4x490xf32, #tpu.memory_space<vmem>>, vector<1x4x352xf32>
    %238 = vector.shape_cast %237 : vector<1x4x352xf32> to vector<4x352xf32>
    %239 = arith.mulf %4, %238 : vector<4x352xf32>
    %cst_193 = arith.constant dense<0.000000e+00> : vector<352xf32>
    %240 = vector.multi_reduction <add>, %239, %cst_193 [0] : vector<4x352xf32> to vector<352xf32>
    %241 = vector.shape_cast %240 : vector<352xf32> to vector<1x352xf32>
    %c29 = arith.constant 29 : index
    %c0_194 = arith.constant 0 : index
    %242 = vector.load %arg5[%c29, %c0_194] : memref<49x352xf32, #tpu.memory_space<vmem>>, vector<1x352xf32>
    %243 = arith.addf %242, %241 : vector<1x352xf32>
    %c29_195 = arith.constant 29 : index
    %c0_196 = arith.constant 0 : index
    %244 = vector.load %arg5[%c29_195, %c0_196] : memref<49x352xf32, #tpu.memory_space<vmem>>, vector<1x352xf32>
    tpu.vector_store %arg5[%c29_195, %c0_196], %243 {strides = array<i32>} : memref<49x352xf32, #tpu.memory_space<vmem>>, vector<1x352xf32>,
    %c0_197 = arith.constant 0 : index
    %c0_198 = arith.constant 0 : index
    %c90 = arith.constant 90 : index
    %245 = vector.load %arg3[%c0_197, %c0_198, %c90] : memref<1x4x490xf32, #tpu.memory_space<vmem>>, vector<1x4x352xf32>
    %246 = vector.shape_cast %245 : vector<1x4x352xf32> to vector<4x352xf32>
    %247 = arith.mulf %4, %246 : vector<4x352xf32>
    %cst_199 = arith.constant dense<0.000000e+00> : vector<352xf32>
    %248 = vector.multi_reduction <add>, %247, %cst_199 [0] : vector<4x352xf32> to vector<352xf32>
    %249 = vector.shape_cast %248 : vector<352xf32> to vector<1x352xf32>
    %c30 = arith.constant 30 : index
    %c0_200 = arith.constant 0 : index
    %250 = vector.load %arg5[%c30, %c0_200] : memref<49x352xf32, #tpu.memory_space<vmem>>, vector<1x352xf32>
    %251 = arith.addf %250, %249 : vector<1x352xf32>
    %c30_201 = arith.constant 30 : index
    %c0_202 = arith.constant 0 : index
    %252 = vector.load %arg5[%c30_201, %c0_202] : memref<49x352xf32, #tpu.memory_space<vmem>>, vector<1x352xf32>
    tpu.vector_store %arg5[%c30_201, %c0_202], %251 {strides = array<i32>} : memref<49x352xf32, #tpu.memory_space<vmem>>, vector<1x352xf32>,
    %c0_203 = arith.constant 0 : index
    %c0_204 = arith.constant 0 : index
    %c91 = arith.constant 91 : index
    %253 = vector.load %arg3[%c0_203, %c0_204, %c91] : memref<1x4x490xf32, #tpu.memory_space<vmem>>, vector<1x4x352xf32>
    %254 = vector.shape_cast %253 : vector<1x4x352xf32> to vector<4x352xf32>
    %255 = arith.mulf %4, %254 : vector<4x352xf32>
    %cst_205 = arith.constant dense<0.000000e+00> : vector<352xf32>
    %256 = vector.multi_reduction <add>, %255, %cst_205 [0] : vector<4x352xf32> to vector<352xf32>
    %257 = vector.shape_cast %256 : vector<352xf32> to vector<1x352xf32>
    %c31 = arith.constant 31 : index
    %c0_206 = arith.constant 0 : index
    %258 = vector.load %arg5[%c31, %c0_206] : memref<49x352xf32, #tpu.memory_space<vmem>>, vector<1x352xf32>
    %259 = arith.addf %258, %257 : vector<1x352xf32>
    %c31_207 = arith.constant 31 : index
    %c0_208 = arith.constant 0 : index
    %260 = vector.load %arg5[%c31_207, %c0_208] : memref<49x352xf32, #tpu.memory_space<vmem>>, vector<1x352xf32>
    tpu.vector_store %arg5[%c31_207, %c0_208], %259 {strides = array<i32>} : memref<49x352xf32, #tpu.memory_space<vmem>>, vector<1x352xf32>,
    %c0_209 = arith.constant 0 : index
    %c0_210 = arith.constant 0 : index
    %c92 = arith.constant 92 : index
    %261 = vector.load %arg3[%c0_209, %c0_210, %c92] : memref<1x4x490xf32, #tpu.memory_space<vmem>>, vector<1x4x352xf32>
    %262 = vector.shape_cast %261 : vector<1x4x352xf32> to vector<4x352xf32>
    %263 = arith.mulf %4, %262 : vector<4x352xf32>
    %cst_211 = arith.constant dense<0.000000e+00> : vector<352xf32>
    %264 = vector.multi_reduction <add>, %263, %cst_211 [0] : vector<4x352xf32> to vector<352xf32>
    %265 = vector.shape_cast %264 : vector<352xf32> to vector<1x352xf32>
    %c32 = arith.constant 32 : index
    %c0_212 = arith.constant 0 : index
    %266 = vector.load %arg5[%c32, %c0_212] : memref<49x352xf32, #tpu.memory_space<vmem>>, vector<1x352xf32>
    %267 = arith.addf %266, %265 : vector<1x352xf32>
    %c32_213 = arith.constant 32 : index
    %c0_214 = arith.constant 0 : index
    %268 = vector.load %arg5[%c32_213, %c0_214] : memref<49x352xf32, #tpu.memory_space<vmem>>, vector<1x352xf32>
    tpu.vector_store %arg5[%c32_213, %c0_214], %267 {strides = array<i32>} : memref<49x352xf32, #tpu.memory_space<vmem>>, vector<1x352xf32>,
    %c0_215 = arith.constant 0 : index
    %c0_216 = arith.constant 0 : index
    %c93 = arith.constant 93 : index
    %269 = vector.load %arg3[%c0_215, %c0_216, %c93] : memref<1x4x490xf32, #tpu.memory_space<vmem>>, vector<1x4x352xf32>
    %270 = vector.shape_cast %269 : vector<1x4x352xf32> to vector<4x352xf32>
    %271 = arith.mulf %4, %270 : vector<4x352xf32>
    %cst_217 = arith.constant dense<0.000000e+00> : vector<352xf32>
    %272 = vector.multi_reduction <add>, %271, %cst_217 [0] : vector<4x352xf32> to vector<352xf32>
    %273 = vector.shape_cast %272 : vector<352xf32> to vector<1x352xf32>
    %c33 = arith.constant 33 : index
    %c0_218 = arith.constant 0 : index
    %274 = vector.load %arg5[%c33, %c0_218] : memref<49x352xf32, #tpu.memory_space<vmem>>, vector<1x352xf32>
    %275 = arith.addf %274, %273 : vector<1x352xf32>
    %c33_219 = arith.constant 33 : index
    %c0_220 = arith.constant 0 : index
    %276 = vector.load %arg5[%c33_219, %c0_220] : memref<49x352xf32, #tpu.memory_space<vmem>>, vector<1x352xf32>
    tpu.vector_store %arg5[%c33_219, %c0_220], %275 {strides = array<i32>} : memref<49x352xf32, #tpu.memory_space<vmem>>, vector<1x352xf32>,
    %c0_221 = arith.constant 0 : index
    %c0_222 = arith.constant 0 : index
    %c94 = arith.constant 94 : index
    %277 = vector.load %arg3[%c0_221, %c0_222, %c94] : memref<1x4x490xf32, #tpu.memory_space<vmem>>, vector<1x4x352xf32>
    %278 = vector.shape_cast %277 : vector<1x4x352xf32> to vector<4x352xf32>
    %279 = arith.mulf %4, %278 : vector<4x352xf32>
    %cst_223 = arith.constant dense<0.000000e+00> : vector<352xf32>
    %280 = vector.multi_reduction <add>, %279, %cst_223 [0] : vector<4x352xf32> to vector<352xf32>
    %281 = vector.shape_cast %280 : vector<352xf32> to vector<1x352xf32>
    %c34 = arith.constant 34 : index
    %c0_224 = arith.constant 0 : index
    %282 = vector.load %arg5[%c34, %c0_224] : memref<49x352xf32, #tpu.memory_space<vmem>>, vector<1x352xf32>
    %283 = arith.addf %282, %281 : vector<1x352xf32>
    %c34_225 = arith.constant 34 : index
    %c0_226 = arith.constant 0 : index
    %284 = vector.load %arg5[%c34_225, %c0_226] : memref<49x352xf32, #tpu.memory_space<vmem>>, vector<1x352xf32>
    tpu.vector_store %arg5[%c34_225, %c0_226], %283 {strides = array<i32>} : memref<49x352xf32, #tpu.memory_space<vmem>>, vector<1x352xf32>,
    %c0_227 = arith.constant 0 : index
    %c0_228 = arith.constant 0 : index
    %c110 = arith.constant 110 : index
    %285 = vector.load %arg3[%c0_227, %c0_228, %c110] : memref<1x4x490xf32, #tpu.memory_space<vmem>>, vector<1x4x352xf32>
    %286 = vector.shape_cast %285 : vector<1x4x352xf32> to vector<4x352xf32>
    %287 = arith.mulf %4, %286 : vector<4x352xf32>
    %cst_229 = arith.constant dense<0.000000e+00> : vector<352xf32>
    %288 = vector.multi_reduction <add>, %287, %cst_229 [0] : vector<4x352xf32> to vector<352xf32>
    %289 = vector.shape_cast %288 : vector<352xf32> to vector<1x352xf32>
    %c35 = arith.constant 35 : index
    %c0_230 = arith.constant 0 : index
    %290 = vector.load %arg5[%c35, %c0_230] : memref<49x352xf32, #tpu.memory_space<vmem>>, vector<1x352xf32>
    %291 = arith.addf %290, %289 : vector<1x352xf32>
    %c35_231 = arith.constant 35 : index
    %c0_232 = arith.constant 0 : index
    %292 = vector.load %arg5[%c35_231, %c0_232] : memref<49x352xf32, #tpu.memory_space<vmem>>, vector<1x352xf32>
    tpu.vector_store %arg5[%c35_231, %c0_232], %291 {strides = array<i32>} : memref<49x352xf32, #tpu.memory_space<vmem>>, vector<1x352xf32>,
    %c0_233 = arith.constant 0 : index
    %c0_234 = arith.constant 0 : index
    %c111 = arith.constant 111 : index
    %293 = vector.load %arg3[%c0_233, %c0_234, %c111] : memref<1x4x490xf32, #tpu.memory_space<vmem>>, vector<1x4x352xf32>
    %294 = vector.shape_cast %293 : vector<1x4x352xf32> to vector<4x352xf32>
    %295 = arith.mulf %4, %294 : vector<4x352xf32>
    %cst_235 = arith.constant dense<0.000000e+00> : vector<352xf32>
    %296 = vector.multi_reduction <add>, %295, %cst_235 [0] : vector<4x352xf32> to vector<352xf32>
    %297 = vector.shape_cast %296 : vector<352xf32> to vector<1x352xf32>
    %c36 = arith.constant 36 : index
    %c0_236 = arith.constant 0 : index
    %298 = vector.load %arg5[%c36, %c0_236] : memref<49x352xf32, #tpu.memory_space<vmem>>, vector<1x352xf32>
    %299 = arith.addf %298, %297 : vector<1x352xf32>
    %c36_237 = arith.constant 36 : index
    %c0_238 = arith.constant 0 : index
    %300 = vector.load %arg5[%c36_237, %c0_238] : memref<49x352xf32, #tpu.memory_space<vmem>>, vector<1x352xf32>
    tpu.vector_store %arg5[%c36_237, %c0_238], %299 {strides = array<i32>} : memref<49x352xf32, #tpu.memory_space<vmem>>, vector<1x352xf32>,
    %c0_239 = arith.constant 0 : index
    %c0_240 = arith.constant 0 : index
    %c112 = arith.constant 112 : index
    %301 = vector.load %arg3[%c0_239, %c0_240, %c112] : memref<1x4x490xf32, #tpu.memory_space<vmem>>, vector<1x4x352xf32>
    %302 = vector.shape_cast %301 : vector<1x4x352xf32> to vector<4x352xf32>
    %303 = arith.mulf %4, %302 : vector<4x352xf32>
    %cst_241 = arith.constant dense<0.000000e+00> : vector<352xf32>
    %304 = vector.multi_reduction <add>, %303, %cst_241 [0] : vector<4x352xf32> to vector<352xf32>
    %305 = vector.shape_cast %304 : vector<352xf32> to vector<1x352xf32>
    %c37 = arith.constant 37 : index
    %c0_242 = arith.constant 0 : index
    %306 = vector.load %arg5[%c37, %c0_242] : memref<49x352xf32, #tpu.memory_space<vmem>>, vector<1x352xf32>
    %307 = arith.addf %306, %305 : vector<1x352xf32>
    %c37_243 = arith.constant 37 : index
    %c0_244 = arith.constant 0 : index
    %308 = vector.load %arg5[%c37_243, %c0_244] : memref<49x352xf32, #tpu.memory_space<vmem>>, vector<1x352xf32>
    tpu.vector_store %arg5[%c37_243, %c0_244], %307 {strides = array<i32>} : memref<49x352xf32, #tpu.memory_space<vmem>>, vector<1x352xf32>,
    %c0_245 = arith.constant 0 : index
    %c0_246 = arith.constant 0 : index
    %c113 = arith.constant 113 : index
    %309 = vector.load %arg3[%c0_245, %c0_246, %c113] : memref<1x4x490xf32, #tpu.memory_space<vmem>>, vector<1x4x352xf32>
    %310 = vector.shape_cast %309 : vector<1x4x352xf32> to vector<4x352xf32>
    %311 = arith.mulf %4, %310 : vector<4x352xf32>
    %cst_247 = arith.constant dense<0.000000e+00> : vector<352xf32>
    %312 = vector.multi_reduction <add>, %311, %cst_247 [0] : vector<4x352xf32> to vector<352xf32>
    %313 = vector.shape_cast %312 : vector<352xf32> to vector<1x352xf32>
    %c38 = arith.constant 38 : index
    %c0_248 = arith.constant 0 : index
    %314 = vector.load %arg5[%c38, %c0_248] : memref<49x352xf32, #tpu.memory_space<vmem>>, vector<1x352xf32>
    %315 = arith.addf %314, %313 : vector<1x352xf32>
    %c38_249 = arith.constant 38 : index
    %c0_250 = arith.constant 0 : index
    %316 = vector.load %arg5[%c38_249, %c0_250] : memref<49x352xf32, #tpu.memory_space<vmem>>, vector<1x352xf32>
    tpu.vector_store %arg5[%c38_249, %c0_250], %315 {strides = array<i32>} : memref<49x352xf32, #tpu.memory_space<vmem>>, vector<1x352xf32>,
    %c0_251 = arith.constant 0 : index
    %c0_252 = arith.constant 0 : index
    %c114 = arith.constant 114 : index
    %317 = vector.load %arg3[%c0_251, %c0_252, %c114] : memref<1x4x490xf32, #tpu.memory_space<vmem>>, vector<1x4x352xf32>
    %318 = vector.shape_cast %317 : vector<1x4x352xf32> to vector<4x352xf32>
    %319 = arith.mulf %4, %318 : vector<4x352xf32>
    %cst_253 = arith.constant dense<0.000000e+00> : vector<352xf32>
    %320 = vector.multi_reduction <add>, %319, %cst_253 [0] : vector<4x352xf32> to vector<352xf32>
    %321 = vector.shape_cast %320 : vector<352xf32> to vector<1x352xf32>
    %c39 = arith.constant 39 : index
    %c0_254 = arith.constant 0 : index
    %322 = vector.load %arg5[%c39, %c0_254] : memref<49x352xf32, #tpu.memory_space<vmem>>, vector<1x352xf32>
    %323 = arith.addf %322, %321 : vector<1x352xf32>
    %c39_255 = arith.constant 39 : index
    %c0_256 = arith.constant 0 : index
    %324 = vector.load %arg5[%c39_255, %c0_256] : memref<49x352xf32, #tpu.memory_space<vmem>>, vector<1x352xf32>
    tpu.vector_store %arg5[%c39_255, %c0_256], %323 {strides = array<i32>} : memref<49x352xf32, #tpu.memory_space<vmem>>, vector<1x352xf32>,
    %c0_257 = arith.constant 0 : index
    %c0_258 = arith.constant 0 : index
    %c115 = arith.constant 115 : index
    %325 = vector.load %arg3[%c0_257, %c0_258, %c115] : memref<1x4x490xf32, #tpu.memory_space<vmem>>, vector<1x4x352xf32>
    %326 = vector.shape_cast %325 : vector<1x4x352xf32> to vector<4x352xf32>
    %327 = arith.mulf %4, %326 : vector<4x352xf32>
    %cst_259 = arith.constant dense<0.000000e+00> : vector<352xf32>
    %328 = vector.multi_reduction <add>, %327, %cst_259 [0] : vector<4x352xf32> to vector<352xf32>
    %329 = vector.shape_cast %328 : vector<352xf32> to vector<1x352xf32>
    %c40 = arith.constant 40 : index
    %c0_260 = arith.constant 0 : index
    %330 = vector.load %arg5[%c40, %c0_260] : memref<49x352xf32, #tpu.memory_space<vmem>>, vector<1x352xf32>
    %331 = arith.addf %330, %329 : vector<1x352xf32>
    %c40_261 = arith.constant 40 : index
    %c0_262 = arith.constant 0 : index
    %332 = vector.load %arg5[%c40_261, %c0_262] : memref<49x352xf32, #tpu.memory_space<vmem>>, vector<1x352xf32>
    tpu.vector_store %arg5[%c40_261, %c0_262], %331 {strides = array<i32>} : memref<49x352xf32, #tpu.memory_space<vmem>>, vector<1x352xf32>,
    %c0_263 = arith.constant 0 : index
    %c0_264 = arith.constant 0 : index
    %c116 = arith.constant 116 : index
    %333 = vector.load %arg3[%c0_263, %c0_264, %c116] : memref<1x4x490xf32, #tpu.memory_space<vmem>>, vector<1x4x352xf32>
    %334 = vector.shape_cast %333 : vector<1x4x352xf32> to vector<4x352xf32>
    %335 = arith.mulf %4, %334 : vector<4x352xf32>
    %cst_265 = arith.constant dense<0.000000e+00> : vector<352xf32>
    %336 = vector.multi_reduction <add>, %335, %cst_265 [0] : vector<4x352xf32> to vector<352xf32>
    %337 = vector.shape_cast %336 : vector<352xf32> to vector<1x352xf32>
    %c41 = arith.constant 41 : index
    %c0_266 = arith.constant 0 : index
    %338 = vector.load %arg5[%c41, %c0_266] : memref<49x352xf32, #tpu.memory_space<vmem>>, vector<1x352xf32>
    %339 = arith.addf %338, %337 : vector<1x352xf32>
    %c41_267 = arith.constant 41 : index
    %c0_268 = arith.constant 0 : index
    %340 = vector.load %arg5[%c41_267, %c0_268] : memref<49x352xf32, #tpu.memory_space<vmem>>, vector<1x352xf32>
    tpu.vector_store %arg5[%c41_267, %c0_268], %339 {strides = array<i32>} : memref<49x352xf32, #tpu.memory_space<vmem>>, vector<1x352xf32>,
    %c0_269 = arith.constant 0 : index
    %c0_270 = arith.constant 0 : index
    %c132 = arith.constant 132 : index
    %341 = vector.load %arg3[%c0_269, %c0_270, %c132] : memref<1x4x490xf32, #tpu.memory_space<vmem>>, vector<1x4x352xf32>
    %342 = vector.shape_cast %341 : vector<1x4x352xf32> to vector<4x352xf32>
    %343 = arith.mulf %4, %342 : vector<4x352xf32>
    %cst_271 = arith.constant dense<0.000000e+00> : vector<352xf32>
    %344 = vector.multi_reduction <add>, %343, %cst_271 [0] : vector<4x352xf32> to vector<352xf32>
    %345 = vector.shape_cast %344 : vector<352xf32> to vector<1x352xf32>
    %c42 = arith.constant 42 : index
    %c0_272 = arith.constant 0 : index
    %346 = vector.load %arg5[%c42, %c0_272] : memref<49x352xf32, #tpu.memory_space<vmem>>, vector<1x352xf32>
    %347 = arith.addf %346, %345 : vector<1x352xf32>
    %c42_273 = arith.constant 42 : index
    %c0_274 = arith.constant 0 : index
    %348 = vector.load %arg5[%c42_273, %c0_274] : memref<49x352xf32, #tpu.memory_space<vmem>>, vector<1x352xf32>
    tpu.vector_store %arg5[%c42_273, %c0_274], %347 {strides = array<i32>} : memref<49x352xf32, #tpu.memory_space<vmem>>, vector<1x352xf32>,
    %c0_275 = arith.constant 0 : index
    %c0_276 = arith.constant 0 : index
    %c133 = arith.constant 133 : index
    %349 = vector.load %arg3[%c0_275, %c0_276, %c133] : memref<1x4x490xf32, #tpu.memory_space<vmem>>, vector<1x4x352xf32>
    %350 = vector.shape_cast %349 : vector<1x4x352xf32> to vector<4x352xf32>
    %351 = arith.mulf %4, %350 : vector<4x352xf32>
    %cst_277 = arith.constant dense<0.000000e+00> : vector<352xf32>
    %352 = vector.multi_reduction <add>, %351, %cst_277 [0] : vector<4x352xf32> to vector<352xf32>
    %353 = vector.shape_cast %352 : vector<352xf32> to vector<1x352xf32>
    %c43 = arith.constant 43 : index
    %c0_278 = arith.constant 0 : index
    %354 = vector.load %arg5[%c43, %c0_278] : memref<49x352xf32, #tpu.memory_space<vmem>>, vector<1x352xf32>
    %355 = arith.addf %354, %353 : vector<1x352xf32>
    %c43_279 = arith.constant 43 : index
    %c0_280 = arith.constant 0 : index
    %356 = vector.load %arg5[%c43_279, %c0_280] : memref<49x352xf32, #tpu.memory_space<vmem>>, vector<1x352xf32>
    tpu.vector_store %arg5[%c43_279, %c0_280], %355 {strides = array<i32>} : memref<49x352xf32, #tpu.memory_space<vmem>>, vector<1x352xf32>,
    %c0_281 = arith.constant 0 : index
    %c0_282 = arith.constant 0 : index
    %c134 = arith.constant 134 : index
    %357 = vector.load %arg3[%c0_281, %c0_282, %c134] : memref<1x4x490xf32, #tpu.memory_space<vmem>>, vector<1x4x352xf32>
    %358 = vector.shape_cast %357 : vector<1x4x352xf32> to vector<4x352xf32>
    %359 = arith.mulf %4, %358 : vector<4x352xf32>
    %cst_283 = arith.constant dense<0.000000e+00> : vector<352xf32>
    %360 = vector.multi_reduction <add>, %359, %cst_283 [0] : vector<4x352xf32> to vector<352xf32>
    %361 = vector.shape_cast %360 : vector<352xf32> to vector<1x352xf32>
    %c44_284 = arith.constant 44 : index
    %c0_285 = arith.constant 0 : index
    %362 = vector.load %arg5[%c44_284, %c0_285] : memref<49x352xf32, #tpu.memory_space<vmem>>, vector<1x352xf32>
    %363 = arith.addf %362, %361 : vector<1x352xf32>
    %c44_286 = arith.constant 44 : index
    %c0_287 = arith.constant 0 : index
    %364 = vector.load %arg5[%c44_286, %c0_287] : memref<49x352xf32, #tpu.memory_space<vmem>>, vector<1x352xf32>
    tpu.vector_store %arg5[%c44_286, %c0_287], %363 {strides = array<i32>} : memref<49x352xf32, #tpu.memory_space<vmem>>, vector<1x352xf32>,
    %c0_288 = arith.constant 0 : index
    %c0_289 = arith.constant 0 : index
    %c135 = arith.constant 135 : index
    %365 = vector.load %arg3[%c0_288, %c0_289, %c135] : memref<1x4x490xf32, #tpu.memory_space<vmem>>, vector<1x4x352xf32>
    %366 = vector.shape_cast %365 : vector<1x4x352xf32> to vector<4x352xf32>
    %367 = arith.mulf %4, %366 : vector<4x352xf32>
    %cst_290 = arith.constant dense<0.000000e+00> : vector<352xf32>
    %368 = vector.multi_reduction <add>, %367, %cst_290 [0] : vector<4x352xf32> to vector<352xf32>
    %369 = vector.shape_cast %368 : vector<352xf32> to vector<1x352xf32>
    %c45_291 = arith.constant 45 : index
    %c0_292 = arith.constant 0 : index
    %370 = vector.load %arg5[%c45_291, %c0_292] : memref<49x352xf32, #tpu.memory_space<vmem>>, vector<1x352xf32>
    %371 = arith.addf %370, %369 : vector<1x352xf32>
    %c45_293 = arith.constant 45 : index
    %c0_294 = arith.constant 0 : index
    %372 = vector.load %arg5[%c45_293, %c0_294] : memref<49x352xf32, #tpu.memory_space<vmem>>, vector<1x352xf32>
    tpu.vector_store %arg5[%c45_293, %c0_294], %371 {strides = array<i32>} : memref<49x352xf32, #tpu.memory_space<vmem>>, vector<1x352xf32>,
    %c0_295 = arith.constant 0 : index
    %c0_296 = arith.constant 0 : index
    %c136 = arith.constant 136 : index
    %373 = vector.load %arg3[%c0_295, %c0_296, %c136] : memref<1x4x490xf32, #tpu.memory_space<vmem>>, vector<1x4x352xf32>
    %374 = vector.shape_cast %373 : vector<1x4x352xf32> to vector<4x352xf32>
    %375 = arith.mulf %4, %374 : vector<4x352xf32>
    %cst_297 = arith.constant dense<0.000000e+00> : vector<352xf32>
    %376 = vector.multi_reduction <add>, %375, %cst_297 [0] : vector<4x352xf32> to vector<352xf32>
    %377 = vector.shape_cast %376 : vector<352xf32> to vector<1x352xf32>
    %c46_298 = arith.constant 46 : index
    %c0_299 = arith.constant 0 : index
    %378 = vector.load %arg5[%c46_298, %c0_299] : memref<49x352xf32, #tpu.memory_space<vmem>>, vector<1x352xf32>
    %379 = arith.addf %378, %377 : vector<1x352xf32>
    %c46_300 = arith.constant 46 : index
    %c0_301 = arith.constant 0 : index
    %380 = vector.load %arg5[%c46_300, %c0_301] : memref<49x352xf32, #tpu.memory_space<vmem>>, vector<1x352xf32>
    tpu.vector_store %arg5[%c46_300, %c0_301], %379 {strides = array<i32>} : memref<49x352xf32, #tpu.memory_space<vmem>>, vector<1x352xf32>,
    %c0_302 = arith.constant 0 : index
    %c0_303 = arith.constant 0 : index
    %c137 = arith.constant 137 : index
    %381 = vector.load %arg3[%c0_302, %c0_303, %c137] : memref<1x4x490xf32, #tpu.memory_space<vmem>>, vector<1x4x352xf32>
    %382 = vector.shape_cast %381 : vector<1x4x352xf32> to vector<4x352xf32>
    %383 = arith.mulf %4, %382 : vector<4x352xf32>
    %cst_304 = arith.constant dense<0.000000e+00> : vector<352xf32>
    %384 = vector.multi_reduction <add>, %383, %cst_304 [0] : vector<4x352xf32> to vector<352xf32>
    %385 = vector.shape_cast %384 : vector<352xf32> to vector<1x352xf32>
    %c47_305 = arith.constant 47 : index
    %c0_306 = arith.constant 0 : index
    %386 = vector.load %arg5[%c47_305, %c0_306] : memref<49x352xf32, #tpu.memory_space<vmem>>, vector<1x352xf32>
    %387 = arith.addf %386, %385 : vector<1x352xf32>
    %c47_307 = arith.constant 47 : index
    %c0_308 = arith.constant 0 : index
    %388 = vector.load %arg5[%c47_307, %c0_308] : memref<49x352xf32, #tpu.memory_space<vmem>>, vector<1x352xf32>
    tpu.vector_store %arg5[%c47_307, %c0_308], %387 {strides = array<i32>} : memref<49x352xf32, #tpu.memory_space<vmem>>, vector<1x352xf32>,
    %c0_309 = arith.constant 0 : index
    %c0_310 = arith.constant 0 : index
    %c138 = arith.constant 138 : index
    %389 = vector.load %arg3[%c0_309, %c0_310, %c138] : memref<1x4x490xf32, #tpu.memory_space<vmem>>, vector<1x4x352xf32>
    %390 = vector.shape_cast %389 : vector<1x4x352xf32> to vector<4x352xf32>
    %391 = arith.mulf %4, %390 : vector<4x352xf32>
    %cst_311 = arith.constant dense<0.000000e+00> : vector<352xf32>
    %392 = vector.multi_reduction <add>, %391, %cst_311 [0] : vector<4x352xf32> to vector<352xf32>
    %393 = vector.shape_cast %392 : vector<352xf32> to vector<1x352xf32>
    %c48_312 = arith.constant 48 : index
    %c0_313 = arith.constant 0 : index
    %394 = vector.load %arg5[%c48_312, %c0_313] : memref<49x352xf32, #tpu.memory_space<vmem>>, vector<1x352xf32>
    %395 = arith.addf %394, %393 : vector<1x352xf32>
    %c48_314 = arith.constant 48 : index
    %c0_315 = arith.constant 0 : index
    %396 = vector.load %arg5[%c48_314, %c0_315] : memref<49x352xf32, #tpu.memory_space<vmem>>, vector<1x352xf32>
    tpu.vector_store %arg5[%c48_314, %c0_315], %395 {strides = array<i32>} : memref<49x352xf32, #tpu.memory_space<vmem>>, vector<1x352xf32>,
    %c0_i32_316 = arith.constant 0 : i32
    %397 = arith.cmpi eq, %arg1, %c0_i32_316 : i32
    %398 = arith.extui %397 : i1 to i32
    %c0_i32_317 = arith.constant 0 : i32
    %399 = arith.cmpi ne, %398, %c0_i32_317 : i32
    scf.if %399 {
      %c0_318 = arith.constant 0 : index
      %c0_319 = arith.constant 0 : index
      %400 = vector.load %arg5[%c0_318, %c0_319] : memref<49x352xf32, #tpu.memory_space<vmem>>, vector<49x352xf32>
      %cst_320 = arith.constant 2.500000e-01 : f32
      %401 = vector.broadcast %cst_320 : f32 to vector<49x352xf32>
      %402 = arith.mulf %400, %401 : vector<49x352xf32>
      %c0_321 = arith.constant 0 : index
      %c0_322 = arith.constant 0 : index
      %c0_323 = arith.constant 0 : index
      %403 = vector.load %arg4[%c0_321, %c0_322, %c0_323] : memref<1x49x352xf32, #tpu.memory_space<vmem>>, vector<1x49x352xf32>
      %404 = vector.shape_cast %403 : vector<1x49x352xf32> to vector<49x352xf32>
      %405 = vector.shape_cast %402 : vector<49x352xf32> to vector<1x49x352xf32>
      tpu.vector_store %arg4[%c0_321, %c0_322, %c0_323], %405 {strides = array<i32>} : memref<1x49x352xf32, #tpu.memory_space<vmem>>, vector<1x49x352xf32>,
    } else {
    }
    return
  }
  func.func @transform_0(%arg0: i32, %arg1: i32) -> (i32, i32, i32) {
    %c0_i32 = arith.constant 0 : i32
    %c0_i32_0 = arith.constant 0 : i32
    return %arg0, %arg1, %c0_i32 : i32, i32, i32
  }
  func.func @transform_1(%arg0: i32, %arg1: i32) -> (i32, i32, i32) {
    %c0_i32 = arith.constant 0 : i32
    %c0_i32_0 = arith.constant 0 : i32
    return %arg0, %arg1, %c0_i32 : i32, i32, i32
  }
  func.func @transform_2(%arg0: i32, %arg1: i32) -> (i32, i32, i32) {
    %c0_i32 = arith.constant 0 : i32
    %c0_i32_0 = arith.constant 0 : i32
    %c0_i32_1 = arith.constant 0 : i32
    return %arg0, %c0_i32, %c0_i32_0 : i32, i32, i32
  }
}

</mosaic_0001>

<bundles_post_ra>
// kernel: tpu_custom_call.1
= control target key start
LH: loop header
LB: loop body
LE: loop exit
PB: predicated region body
PF: predicated region fallthrough
CT: control target
= control target key end

     0   :  { %7 = vsyncpa [#allocation4], 0  ;;  %s5422_s0 = inlined_call_operand.hbm [shape: f32[2,4,352], index: 0, kind: input, shape index: {}]   ;;  %s5423_s1 = inlined_call_operand.hbm [shape: f32[2,4,490], index: 1, kind: input, shape index: {}]   ;;  %s5424_s2 = inlined_call_operand.vmem [shape: f32[2,49,352], index: 2, kind: output, shape index: {}]  }
   0x1   :  { %9 = vsyncpa [#allocation4 + $0x1], 0 }
   0x2   :  { %10 = vsyncpa [#allocation6], 0 }
   0x3   :  { %12 = vsyncpa [#allocation6 + $0x1], 0  ;;  %s4326_s9 = smov 0   ;;  %s4328_s10 = smov 0  }
   0x4   :  { %s4330_s11 = smov 0   ;;  %s4332_s12 = smov 0  }
   0x5   :  { %s4334_s13 = smov 0   ;;  %s4336_s14 = smov 0  }
   0x6 LB: > { %s4015_s15 = sadd.s32 4294967295, %s4260_s14   ;;  %s30_s16 = sadd.s32 1, %s4256_s13  ;;  %s4260_s14 = sphi %s4336_s14, %s18_s14   ;;  %s4256_s13 = sphi %s4334_s13, %s5439_s13   ;;  %s4252_s12 = sphi %s4332_s12, %s5438_s12   ;;  %s4248_s11 = sphi %s4330_s11, %s5437_s11   ;;  %s4244_s10 = sphi %s4328_s10, %s5436_s10   ;;  %s4240_s9 = sphi %s4326_s9, %s5435_s9  }
   0x7   : > { %p32_p0 = scmp.ge.s32.totalorder %s30_s16, 2  ;;  %s39_s17 = sadd.s32 1, %s4248_s11 }
   0x8   : > { %p46_p1 = scmp.ne.s32.totalorder %s4248_s11, %s4244_s10  ;;  %p47_p2 = scmp.eq.s32.totalorder %s4260_s14, 0 }
   0x9   : > { %s5441_s16 = smov (%p32_p0, %s30_s16), 0  ;;  %p52_p4 = scmp.ne.s32.totalorder %s4244_s10, %s4240_s9 }
   0xa   : > { %p48_p3 = por %p47_p2, %p46_p1  ;;  %s34_s18 = ssub.s32 %s4256_s13, %s5441_s16 }
   0xb   : > { %p53_p5 = scmp.eq.s32.totalorder %s4015_s15, 0  ;;  %p37_p6 = scmp.eq.s32.totalorder %s34_s18, 0 }
   0xc   : > { %p4044_p8 = scmp.lt.s32.totalorder %s4260_s14, 2  ;;  %s4374_s21 = sand.u32 1, %s4248_s11  }
   0xd   : > { %p4365_p7 = por %p53_p5, %p52_p4  ;;  %s4030_s22 = smul.u32 192, %s4256_s13 }
   0xe   : > { %s4371_s20 = scalar_select %p37_p6, %s4248_s11, %s39_s17  }
   0xf   : > { %s5426_s19 = scalar_select %p4365_p7, 1, 0 }
  0x10   : > { %s4029_s23 = smul.u32 12, %s4374_s21  ;;  %s4381_s26 = scalar_lea.hbm %s5422_s0, %s4030_s22 }
  0x11   : > { %p4383_p9 = pnand %p4044_p8, %p48_p3  ;;  %s131_s30 = scalar_lea.sflag [#allocation4], %s4374_s21 }
  0x12   : > { %s134_s28 = scalar_lea.vmem [#allocation3], %s4029_s23  ;;  %s4146_s3 = scalar_lea.hbm %s4381_s26, 192 }
  0x13   : > { %s144_s29 = sshll.u32 %s134_s28, 4  ;;  %p4147_p12 = scmp.ne.s32.totalorder %s4381_s26, %s4146_s3  ;;  %s4388_s29 = int_to_ptr.vmem [resolvable:$true] %s144_s29 }
  0x14   : > { %p4148_p13 = pneg %p4383_p9  ;;  %s4151_s6 = scalar_lea.hbm %s5422_s0, 384 }
  0x15   : > { %p4152_p2 = scmp.lt.u32.totalorder %s4381_s26, %s5422_s0  ;;  %p4153_p3 = scmp.lt.u32.totalorder %s4151_s6, %s4146_s3 }
  0x16   : > { %p4149_p0 = pnand %p4148_p13, %p4147_p12  ;;  %p4155_p5 = scmp.lt.u32.totalorder %s4146_s3, %s4381_s26 }
  0x17   : > { %p4154_p4 = por %p4153_p3, %p4152_p2 }
  0x18   : > { %p4150_p1 = pneg %p4149_p0 }
  0x19   : > { %p4156_p6 = por %p4155_p5, %p4154_p4 }
  0x1b   : > { %p4157_p8 = pnand %p4156_p6, %p4150_p1 }
  0x1d   : > { %4160 = shalt.err (!%p4157_p8)
}
  0x1e   : > { %s4161_s9 = scalar_lea.vmem %s4388_s29, 192  ;;  %s4262_s15 = smov [#allocation3]  }
  0x1f   : > { %p4162_p12 = scmp.ne.s32.totalorder %s4388_s29, %s4161_s9  ;;  %s4166_s17 = sshll.u32 %s4262_s15, 4  ;;  %s4167_s17 = int_to_ptr.vmem [resolvable:$false] %s4166_s17 }
  0x20   : > { %s4168_s18 = scalar_lea.vmem %s4167_s17, 384  ;;  %p4169_p11 = scmp.lt.s32.totalorder %s4388_s29, %s4167_s17 }
  0x21   : > { %p4164_p0 = pnand %p4162_p12, %p4148_p13  ;;  %p4170_p2 = scmp.lt.s32.totalorder %s4168_s18, %s4161_s9 }
  0x23   : > { %p4165_p10 = pneg %p4164_p0  ;;  %p4171_p3 = por %p4170_p2, %p4169_p11 }
  0x25   : > { %p4172_p4 = pnand %p4171_p3, %p4165_p10 }
  0x27   : > { %4175 = shalt.err (!%p4172_p4)
}
  0x28   : > { %4040 = dma.hbm_to_vmem [thread:$0]  (!%p4383_p9), %s4381_s26, 192, %s4388_s29, %s131_s30  }
  0x29   : > { %p5428_p1 = scmp.lt.s32.totalorder %s4260_s14, 3  ;;  %p5429_p5 = scmp.ge.s32.totalorder %s4260_s14, 1 }
  0x2a   : > { %s4020_s23 = sshll.u32 %s4374_s21, 4  ;;  %s4028_s24 = sshll.u32 %s4256_s13, 8 }
  0x2b   : > { %p4421_p6 = pnand %p5429_p5, %p5428_p1  ;;  %s4430_s3 = scalar_lea.hbm %s5423_s1, %s4028_s24 }
  0x2c   : > { %s155_s4 = scalar_lea.vmem [#allocation5], %s4020_s23  ;;  %s152_s26 = scalar_lea.sflag [#allocation6], %s4374_s21 }
  0x2d   : > { %s5430_s22 = scalar_select %p4421_p6, 1, 0 }
  0x2e   : > { %s165_s5 = sshll.u32 %s155_s4, 4  ;;  %s4176_s29 = scalar_lea.hbm %s4430_s3, 256  ;;  %s166_s5 = int_to_ptr.vmem [resolvable:$true] %s165_s5 }
  0x2f   : > { %p4177_p10 = scmp.ne.s32.totalorder %s4430_s3, %s4176_s29  ;;  %s4181_s7 = scalar_lea.hbm %s5423_s1, 512 }
  0x30   : > { %p4182_p12 = scmp.lt.u32.totalorder %s4430_s3, %s5423_s1  ;;  %p4183_p0 = scmp.lt.u32.totalorder %s4181_s7, %s4176_s29 }
  0x31   : > { %p4179_p11 = pnand %p4177_p10, %p4148_p13  ;;  %p4185_p3 = scmp.lt.u32.totalorder %s4176_s29, %s4430_s3 }
  0x32   : > { %p4184_p2 = por %p4183_p0, %p4182_p12 }
  0x33   : > { %p4180_p8 = pneg %p4179_p11 }
  0x34   : > { %p4186_p4 = por %p4185_p3, %p4184_p2 }
  0x36   : > { %p4187_p1 = pnand %p4186_p4, %p4180_p8 }
  0x38   : > { %4190 = shalt.err (!%p4187_p1)
}
  0x39   : > { %s4191_s21 = scalar_lea.vmem %s166_s5, 256  ;;  %s4263_s15 = smov [#allocation5]  }
  0x3a   : > { %p4192_p5 = scmp.ne.s32.totalorder %s166_s5, %s4191_s21  ;;  %s4196_s17 = sshll.u32 %s4263_s15, 4  ;;  %s4197_s17 = int_to_ptr.vmem [resolvable:$false] %s4196_s17 }
  0x3b   : > { %s4198_s18 = scalar_lea.vmem %s4197_s17, 512  ;;  %p4199_p7 = scmp.lt.s32.totalorder %s166_s5, %s4197_s17 }
  0x3c   : > { %p4194_p10 = pnand %p4192_p5, %p4148_p13  ;;  %p4200_p6 = scmp.lt.s32.totalorder %s4198_s18, %s4191_s21 }
  0x3e   : > { %p4195_p11 = pneg %p4194_p10  ;;  %p4201_p0 = por %p4200_p6, %p4199_p7 }
  0x40   : > { %p4202_p12 = pnand %p4201_p0, %p4195_p11 }
  0x42   : > { %4205 = shalt.err (!%p4202_p12)
}
  0x43   : > { %4043 = dma.hbm_to_vmem [thread:$0]  (!%p4383_p9), %s4430_s3, 256, %s166_s5, %s152_s26  }
  0x44   : > { %p5431_p8 = scmp.ne.s32.totalorder %s5430_s22, 0 }
  0x45   : > { %s176_s23 = sand.u32 (!%p5431_p8), 1, %s4244_s10   ;;  %p5432_p13 = scmp.ne.s32.totalorder (!%p5431_p8), %s5426_s19, 0 }
  0x46   : > { %174 = sbr.rel (%p5431_p8) target bundleno = 660 (0x294), region = 28  ;;  %s177_s25 = scalar_lea.sflag (!%p5431_p8), [#allocation4], %s176_s23 }
  0x47   : > { %s4031_s24 = smul.u32 (!%p5431_p8), 12, %s176_s23 }
  0x49   : > { %s4455_s28 = scalar_lea.vmem (!%p5431_p8), [#allocation3], %s4031_s24 }
  0x4d   : > { %4231 = dma.done.wait (%p5432_p13), %s177_s25, 192  }
  0x4e   : > { %4233 = vsyncadd (%p5432_p13), %s177_s25, 4294967104  ;;  %s4024_s4 = sshll.u32 %s176_s23, 4  ;;  %s186_s27 = scalar_lea.sflag [#allocation6], %s176_s23 }
  0x4f   : > { %s4461_s29 = scalar_lea.vmem [#allocation5], %s4024_s4 }
  0x50   : > { %4235 = dma.done.wait (%p5432_p13), %s186_s27, 256  }
  0x51   : > { %4237 = vsyncadd (%p5432_p13), %s186_s27, 4294967040  ;;  %vm226_vm0 = vcmask 785408   ;;  %v4264_v0 = vmov 0.0   ;;  %v4494_v1 = vld [vmem:[%s4461_s29] sm:$0xff]  ;;  %s4265_s19 = smov 126   ;;  %s4266_s22 = smov 127   ;;  %v287_v22 = vlaneseq }
  0x52   : > { %224 = vst [vmem:[#allocation2] sm:$0xff] %v4264_v0  ;;  %225 = vst [vmem:[#allocation2 + $0x8] sm:$0xff] %v4264_v0  ;;  %391 = vrot.lane.b32.xlu1 %v4494_v1, %s4265_s19  ;;  %318 = vrot.lane.b32.xlu0 %v4494_v1, %s4266_s22  ;;  %v388_v2 = vld [vmem:[%s4461_s29 + $0x8] sm:$0xf]  ;;  %v4505_v6 = vld [vmem:[%s4455_s28 + $0x8] sm:$0xf] }
  0x53   : > { %227 = vst.msk [vmem:[#allocation2 + $0x10] sm:$0xff] %vm226_vm0, %v4264_v0  ;;  %228 = vst [vmem:[#allocation2 + $0x18] sm:$0xff] %v4264_v0  ;;  %v315_v3 = vld [vmem:[%s4461_s29 + $0x8] sm:$0xf]  ;;  %vm256_vm1 = vcmask 1043456   ;;  %vm271_vm2 = vcmask 781312  }
  0x54   : > { %229 = vst [vmem:[#allocation2 + $0x20] sm:$0xff] %v4264_v0  ;;  %230 = vst.msk [vmem:[#allocation2 + $0x28] sm:$0xff] %vm226_vm0, %v4264_v0  ;;  %v4501_v4 = vld [vmem:[%s4455_s28] sm:$0xff]  ;;  %s4267_s3 = smov 125   ;;  %s4268_s5 = smov 124   ;;  %v288_v31 = vshrl.u32 %v287_v22, 7 }
  0x55   : > { %231 = vst [vmem:[#allocation2 + $0x30] sm:$0xff] %v4264_v0  ;;  %232 = vst [vmem:[#allocation2 + $0x38] sm:$0xff] %v4264_v0  ;;  %v461_v5 = vld [vmem:[%s4461_s29 + $0x8] sm:$0xf]  ;;  %v251_v8 = vmul.f32 %v4494_v1, %v4501_v4  ;;  %v4269_v20 = vmov 1966171168  }
  0x56   : > { %233 = vst.msk [vmem:[#allocation2 + $0x40] sm:$0xff] %vm226_vm0, %v4264_v0  ;;  %234 = vst [vmem:[#allocation2 + $0x48] sm:$0xff] %v4264_v0  ;;  %393 = vrot.lane.b32.xlu1 %v388_v2, %s4265_s19  ;;  %320 = vrot.lane.b32.xlu0 %v315_v3, %s4266_s22  ;;  %v250_v7 = vld [vmem:[%s4461_s29 + $0x8] sm:$0xf]  ;;  %v285_v21 = vunpack.c.l.s4 %v4269_v20  ;;  %s4270_s26 = smov 123   ;;  %s4271_s30 = smov 122  }
  0x57   : > { %235 = vst [vmem:[#allocation2 + $0x50] sm:$0xff] %v4264_v0  ;;  %236 = vst.msk [vmem:[#allocation2 + $0x58] sm:$0xff] %vm226_vm0, %v4264_v0  ;;  %v252_v9 = vmul.f32 %v250_v7, %v4505_v6  ;;  %v254_v10 = vcombine.high %v251_v8, %v251_v8  ;;  %v257_v11 = vsel %vm256_vm1, %v251_v8, 0.0  ;;  %v534_v14 = vld [vmem:[%s4461_s29 + $0x8] sm:$0xf]  ;;  %s4272_s6 = smov 106  }
  0x58   : > { %237 = vst [vmem:[#allocation2 + $0x60] sm:$0xff] %v4264_v0  ;;  %238 = vst [vmem:[#allocation2 + $0x68] sm:$0xff] %v4264_v0  ;;  %v258_v12 = vrot.slane %v257_v11, 4  ;;  %v607_v25 = vld [vmem:[%s4461_s29 + $0x8] sm:$0xf]  ;;  %v286_v30 = vunpack.c.0.s8 %v285_v21  ;;  %s4273_s7 = smov 105  }
  0x59   : > { %239 = vst.msk [vmem:[#allocation2 + $0x70] sm:$0xff] %vm226_vm0, %v4264_v0  ;;  %240 = vst [vmem:[#allocation2 + $0x78] sm:$0xff] %v4264_v0  ;;  %v272_v13 = vsel %vm271_vm2, %v252_v9, 0.0  ;;  %v264_v15 = vsel %vm256_vm1, %v254_v10, 0.0  ;;  %v680_v34 = vld [vmem:[%s4461_s29 + $0x8] sm:$0xf] }
  0x5a   : > { %241 = vst [vmem:[#allocation2 + $0x80] sm:$0xff] %v4264_v0  ;;  %242 = vst.msk [vmem:[#allocation2 + $0x88] sm:$0xff] %vm226_vm0, %v4264_v0  ;;  %466 = vrot.lane.b32.xlu1 %v461_v5, %s4267_s3  ;;  %464 = vrot.lane.b32.xlu0 %v4494_v1, %s4267_s3  ;;  %v273_v16 = vrot.slane %v272_v13, 4  ;;  %v259_v17 = vadd.f32 %v258_v12, %v257_v11  ;;  %v265_v18 = vrot.slane %v264_v15, 4  ;;  %v753_v41 = vld [vmem:[%s4461_s29 + $0x8] sm:$0xf] }
  0x5b   : > { %243 = vst [vmem:[#allocation2 + $0x90] sm:$0x1] %v4264_v0  ;;  %244 = vst [vmem:[#allocation2 + $0x98] sm:$0x1] %v4264_v0  ;;  %v4527_v39 = vsub.s32 %v286_v30, %v288_v31  ;;  %v826_v45 = vld [vmem:[%s4461_s29 + $0x8] sm:$0xf] }
  0x5c   : > { %v274_v19 = vadd.f32 %v273_v16, %v272_v13  ;;  %v260_v23 = vrot.slane %v259_v17, 2  ;;  %v266_v24 = vadd.f32 %v265_v18, %v264_v15  ;;  %v279_v47 = vld [vmem:[#allocation2] ss:$8 sm:$0x7]  ;;  %vm4537_vm3 = vcmp.lt.s32.totalorder %v287_v22, 352  ;;  %s4274_s8 = smov 104  }
  0x5d   : > { %v899_v49 = vld [vmem:[%s4461_s29 + $0x8] sm:$0xf]  ;;  %s4275_s9 = smov 103   ;;  %s4276_s21 = smov 102   ;;  %vm398_vm4 = vcmask 1031168   ;;  %vm325_vm5 = vcmask 1039360  }
  0x5e   : > { %539 = vrot.lane.b32.xlu1 %v534_v14, %s4268_s5  ;;  %537 = vrot.lane.b32.xlu0 %v4494_v1, %s4268_s5  ;;  %v275_v26 = vrot.slane %v274_v19, 2  ;;  %v261_v27 = vadd.f32 %v260_v23, %v259_v17  ;;  %v267_v28 = vrot.slane %v266_v24, 2  ;;  %v972_v52 = vld [vmem:[%s4461_s29 + $0x8] sm:$0xf]  ;;  %s4277_s15 = smov 101   ;;  %s4278_s17 = smov 100  }
  0x5f   : > { %v1045_v53 = vld [vmem:[%s4461_s29 + $0x8] sm:$0xf]  ;;  %s4279_s18 = smov 84   ;;  %s4280_s23 = smov 83   ;;  %vm471_vm6 = vcmask 1022976   ;;  %vm544_vm7 = vcmask 1014784  }
  0x60   : > { %v276_v29 = vadd.f32 %v275_v26, %v274_v19  ;;  %v262_v32 = vrot.slane %v261_v27, 1  ;;  %v268_v33 = vadd.f32 %v267_v28, %v266_v24  ;;  %v1118_v54 = vld [vmem:[%s4461_s29 + $0x8] sm:$0xf]  ;;  %s4281_s24 = smov 82   ;;  %s4282_s25 = smov 81   ;;  %vm617_vm8 = vcmask 1006592  }
  0x61   : > { %v1191_v55 = vld [vmem:[%s4461_s29 + $0x8] sm:$0xf]  ;;  %s4283_s4 = smov 80   ;;  %s4284_s27 = smov 79   ;;  %vm690_vm9 = vcmask 998400   ;;  %vm763_vm10 = vcmask 867328  }
  0x62   : > { %612 = vrot.lane.b32.xlu1 %v607_v25, %s4270_s26  ;;  %610 = vrot.lane.b32.xlu0 %v4494_v1, %s4270_s26  ;;  %v277_v35 = vrot.slane %v276_v29, 1  ;;  %v263_v36 = vadd.f32 %v262_v32, %v261_v27  ;;  %v269_v37 = vrot.slane %v268_v33, 1  ;;  %v4553_v56 = vld [vmem:[%s4461_s29 + $0x8] sm:$0xff]  ;;  %s4285_s19 = smov 78   ;;  %s4286_s22 = smov 62   ;;  %vm836_vm11 = vcmask 859136  }
  0x63   : > { %s4287_s3 = smov 61   ;;  %vm909_vm12 = vcmask 850944   ;;  %vm982_vm13 = vcmask 842752   ;;  %vm1055_vm14 = vcmask 834560   ;;  %p215_p7 = scmp.lt.s32.totalorder %s4252_s12, 1  ;;  %vm1128_vm15 = vcmask 826368  }
  0x64   : > { %v278_v38 = vadd.f32 %v277_v35, %v276_v29  ;;  %v270_v40 = vadd.f32 %v269_v37, %v268_v33 }
  0x65   : > { %s5443_s12 = smov (!%p215_p7, %s4252_s12), 1 }
  0x66   : > { %685 = vrot.lane.b32.xlu1 %v680_v34, %s4271_s30  ;;  %683 = vrot.lane.b32.xlu0 %v4494_v1, %s4271_s30  ;;  %v283_v42 = vcombine.low %v263_v36, %v270_v40  ;;  %v297_v43 = vrot.slane %v278_v38, %v4527_v39 }
  0x68   : > { %v290_v44 = vrot.slane %v283_v42, %v4527_v39 }
  0x6a   : > { %758 = vrot.lane.b32.xlu1 %v753_v41, %s4272_s6  ;;  %756 = vrot.lane.b32.xlu0 %v4494_v1, %s4272_s6  ;;  %v298_v46 = vcombine.low %v290_v44, %v297_v43  ;;  %s4288_s6 = smov 60  }
  0x6c   : > { %v305_v48 = vrot.slane %v298_v46, %v4527_v39 }
  0x6e   : > { %831 = vrot.lane.b32.xlu1 %v826_v45, %s4273_s7  ;;  %829 = vrot.lane.b32.xlu0 %v4494_v1, %s4273_s7  ;;  %v307_v50 = vadd.f32 %v305_v48, %v279_v47  ;;  %s4289_s7 = smov 59  }
  0x70   : > { %312 = vst.msk [vmem:[#allocation2] ss:$8 sm:$0x7] %vm4537_vm3, %v307_v50 }
  0x72   : > { %904 = vrot.lane.b32.xlu1 %v899_v49, %s4274_s8  ;;  %902 = vrot.lane.b32.xlu0 %v4494_v1, %s4274_s8  ;;  %s4290_s8 = smov 58  }
  0x76   : > { %977 = vrot.lane.b32.xlu1 %v972_v52, %s4275_s9  ;;  %975 = vrot.lane.b32.xlu0 %v4494_v1, %s4275_s9  ;;  %s4291_s9 = smov 57  }
  0x7a   : > { %1050 = vrot.lane.b32.xlu1 %v1045_v53, %s4276_s21  ;;  %1048 = vrot.lane.b32.xlu0 %v4494_v1, %s4276_s21  ;;  %s4292_s21 = smov 56  }
  0x7e   : > { %1123 = vrot.lane.b32.xlu1 %v1118_v54, %s4277_s15  ;;  %1121 = vrot.lane.b32.xlu0 %v4494_v1, %s4277_s15  ;;  %s4293_s15 = smov 40  }
  0x82   : > { %1196 = vrot.lane.b32.xlu1 %v1191_v55, %s4278_s17  ;;  %1194 = vrot.lane.b32.xlu0 %v4494_v1, %s4278_s17  ;;  %s4294_s17 = smov 39  }
  0x86   : > { %1269 = vrot.lane.b32.xlu1 %v4553_v56, %s4279_s18  ;;  %1267 = vrot.lane.b32.xlu0 %v4494_v1, %s4279_s18  ;;  %s4295_s18 = smov 38  }
  0x8a   : > { %1343 = vrot.lane.b32.xlu1 %v4553_v56, %s4280_s23  ;;  %1341 = vrot.lane.b32.xlu0 %v4494_v1, %s4280_s23  ;;  %s4296_s23 = smov 37  }
  0x8e   : > { %1417 = vrot.lane.b32.xlu1 %v4553_v56, %s4281_s24  ;;  %1415 = vrot.lane.b32.xlu0 %v4494_v1, %s4281_s24  ;;  %s4297_s24 = smov 36  }
  0x92   : > { %1491 = vrot.lane.b32.xlu1 %v4553_v56, %s4282_s25  ;;  %1489 = vrot.lane.b32.xlu0 %v4494_v1, %s4282_s25  ;;  %s4298_s25 = smov 35  }
  0x96   : > { %1565 = vrot.lane.b32.xlu1 %v4553_v56, %s4283_s4  ;;  %1563 = vrot.lane.b32.xlu0 %v4494_v1, %s4283_s4  ;;  %s4299_s4 = smov 34  }
  0x9a   : > { %1639 = vrot.lane.b32.xlu1 %v4553_v56, %s4284_s27  ;;  %1637 = vrot.lane.b32.xlu0 %v4494_v1, %s4284_s27  ;;  %s4300_s27 = smov 18  }
  0x9e   : > { %1713 = vrot.lane.b32.xlu1 %v4553_v56, %s4285_s19  ;;  %1711 = vrot.lane.b32.xlu0 %v4494_v1, %s4285_s19  ;;  %s4301_s19 = smov 17  }
  0xa2   : > { %1787 = vrot.lane.b32.xlu1 %v4553_v56, %s4286_s22  ;;  %1785 = vrot.lane.b32.xlu0 %v4494_v1, %s4286_s22  ;;  %s4302_s22 = smov 16  }
  0xa6   : > { %1861 = vrot.lane.b32.xlu1 %v4553_v56, %s4287_s3  ;;  %1859 = vrot.lane.b32.xlu0 %v4494_v1, %s4287_s3  ;;  %s4303_s3 = smov 15  }
  0xaa   : > { %1935 = vrot.lane.b32.xlu1 %v4553_v56, %s4288_s6  ;;  %1933 = vrot.lane.b32.xlu0 %v4494_v1, %s4288_s6  ;;  %s4304_s6 = smov 14  }
  0xae   : > { %2009 = vrot.lane.b32.xlu1 %v4553_v56, %s4289_s7  ;;  %2007 = vrot.lane.b32.xlu0 %v4494_v1, %s4289_s7  ;;  %s4305_s7 = smov 13  }
  0xb2   : > { %2083 = vrot.lane.b32.xlu1 %v4553_v56, %s4290_s8  ;;  %2081 = vrot.lane.b32.xlu0 %v4494_v1, %s4290_s8  ;;  %s4306_s8 = smov 12  }
  0xb6   : > { %2157 = vrot.lane.b32.xlu1 %v4553_v56, %s4291_s9  ;;  %2155 = vrot.lane.b32.xlu0 %v4494_v1, %s4291_s9  ;;  %s4032_s9 = smul.u32 168, %s5443_s12 }
  0xba   : > { %2231 = vrot.lane.b32.xlu1 %v4553_v56, %s4292_s21  ;;  %2229 = vrot.lane.b32.xlu0 %v4494_v1, %s4292_s21 }
  0xbe   : > { %2305 = vrot.lane.b32.xlu1 %v4553_v56, %s4293_s15  ;;  %2303 = vrot.lane.b32.xlu0 %v4494_v1, %s4293_s15  ;;  %s4823_s15 = scalar_lea.vmem %s5424_s2, %s4032_s9 }
  0xc2   : > { %2379 = vrot.lane.b32.xlu1 %v4553_v56, %s4294_s17  ;;  %2377 = vrot.lane.b32.xlu0 %v4494_v1, %s4294_s17 }
  0xc4   : > { %v392_v57 = vpop.permute.xlu1 %391  ;;  %v319_v58 = vpop.permute.xlu0 %318 }
  0xc5   : > { %v395_v59 = vrot.slane %v392_v57, 4  ;;  %v322_v60 = vrot.slane %v319_v58, 4 }
  0xc6   : > { %2453 = vrot.lane.b32.xlu1 %v4553_v56, %s4295_s18  ;;  %2451 = vrot.lane.b32.xlu0 %v4494_v1, %s4295_s18 }
  0xc8   : > { %v394_v61 = vpop.permute.xlu1 %393  ;;  %v321_v62 = vpop.permute.xlu0 %320 }
  0xc9   : > { %v396_v63 = vrot.slane %v394_v61, 4  ;;  %v403_v2 = vmul.f32 %v394_v61, %v4505_v6  ;;  %v323_v3 = vrot.slane %v321_v62, 4  ;;  %v330_v5 = vmul.f32 %v321_v62, %v4505_v6 }
  0xca   : > { %2527 = vrot.lane.b32.xlu1 %v4553_v56, %s4296_s23  ;;  %2525 = vrot.lane.b32.xlu0 %v4494_v1, %s4296_s23 }
  0xcb   : > { %v397_v7 = vsel %vm256_vm1, %v395_v59, %v396_v63  ;;  %v421_v8 = vsel %vm271_vm2, %v403_v2, 0.0  ;;  %v324_v9 = vsel %vm256_vm1, %v322_v60, %v323_v3  ;;  %v348_v10 = vsel %vm271_vm2, %v330_v5, 0.0 }
  0xcc   : > { %v399_v11 = vsel %vm398_vm4, %v392_v57, %v397_v7  ;;  %v422_v12 = vrot.slane %v421_v8, 4  ;;  %v326_v13 = vsel %vm325_vm5, %v319_v58, %v324_v9  ;;  %v349_v14 = vrot.slane %v348_v10, 4  ;;  %v467_v15 = vpop.permute.xlu1 %466  ;;  %v465_v16 = vpop.permute.xlu0 %464 }
  0xcd   : > { %v402_v17 = vmul.f32 %v399_v11, %v4501_v4  ;;  %v329_v18 = vmul.f32 %v326_v13, %v4501_v4  ;;  %v469_v19 = vrot.slane %v467_v15, 4  ;;  %v476_v20 = vmul.f32 %v467_v15, %v4505_v6 }
  0xce   : > { %v423_v21 = vadd.f32 %v422_v12, %v421_v8  ;;  %v350_v22 = vadd.f32 %v349_v14, %v348_v10  ;;  %v468_v23 = vrot.slane %v465_v16, 4  ;;  %2601 = vrot.lane.b32.xlu1 %v4553_v56, %s4297_s24  ;;  %2599 = vrot.lane.b32.xlu0 %v4494_v1, %s4297_s24  ;;  %vm1201_vm4 = vcmask 818176  }
  0xcf   : > { %v405_v24 = vcombine.high %v402_v17, %v402_v17  ;;  %v407_v25 = vsel %vm256_vm1, %v402_v17, 0.0  ;;  %v332_v26 = vcombine.high %v329_v18, %v329_v18  ;;  %v334_v27 = vsel %vm256_vm1, %v329_v18, 0.0 }
  0xd0   : > { %v408_v28 = vrot.slane %v407_v25, 4  ;;  %v424_v29 = vrot.slane %v423_v21, 2  ;;  %v335_v30 = vrot.slane %v334_v27, 4  ;;  %v351_v31 = vrot.slane %v350_v22, 2  ;;  %v540_v49 = vpop.permute.xlu1 %539  ;;  %v538_v12 = vpop.permute.xlu0 %537 }
  0xd1   : > { %v414_v32 = vsel %vm256_vm1, %v405_v24, 0.0  ;;  %v341_v33 = vsel %vm256_vm1, %v332_v26, 0.0  ;;  %v494_v34 = vsel %vm271_vm2, %v476_v20, 0.0  ;;  %v470_v35 = vsel %vm256_vm1, %v468_v23, %v469_v19 }
  0xd2   : > { %v409_v36 = vadd.f32 %v408_v28, %v407_v25  ;;  %v415_v37 = vrot.slane %v414_v32, 4  ;;  %v425_v38 = vadd.f32 %v424_v29, %v423_v21  ;;  %v336_v40 = vadd.f32 %v335_v30, %v334_v27  ;;  %2675 = vrot.lane.b32.xlu1 %v4553_v56, %s4298_s25  ;;  %2673 = vrot.lane.b32.xlu0 %v4494_v1, %s4298_s25 }
  0xd3   : > { %v342_v41 = vrot.slane %v341_v33, 4  ;;  %v352_v42 = vadd.f32 %v351_v31, %v350_v22  ;;  %v495_v43 = vrot.slane %v494_v34, 4  ;;  %v472_v44 = vsel %vm471_vm6, %v465_v16, %v470_v35  ;;  %v4626_v22 = vld [vmem:[%s4461_s29] sm:$0xff] }
  0xd4   : > { %v410_v45 = vrot.slane %v409_v36, 2  ;;  %v416_v46 = vadd.f32 %v415_v37, %v414_v32  ;;  %v426_v47 = vrot.slane %v425_v38, 1  ;;  %v337_v48 = vrot.slane %v336_v40, 2  ;;  %v4620_v17 = vpop.permute.xlu1 %612 }
  0xd5   : > { %v343_v50 = vadd.f32 %v342_v41, %v341_v33  ;;  %v353_v52 = vrot.slane %v352_v42, 1  ;;  %v496_v53 = vadd.f32 %v495_v43, %v494_v34  ;;  %v475_v54 = vmul.f32 %v472_v44, %v4501_v4 }
  0xd6   : > { %v411_v55 = vadd.f32 %v410_v45, %v409_v36  ;;  %v417_v57 = vrot.slane %v416_v46, 2  ;;  %v427_v58 = vadd.f32 %v426_v47, %v425_v38  ;;  %v338_v59 = vadd.f32 %v337_v48, %v336_v40  ;;  %2749 = vrot.lane.b32.xlu1 %v4553_v56, %s4299_s4  ;;  %2747 = vrot.lane.b32.xlu0 %v4494_v1, %s4299_s4  ;;  %v611_v38 = vpop.permute.xlu0 %610  ;;  %v429_v48 = vld [vmem:[#allocation2 + $0x2] ss:$8 sm:$0x7] }
  0xd7   : > { %v344_v60 = vrot.slane %v343_v50, 2  ;;  %v4614_v61 = vadd.f32 %v353_v52, %v352_v42  ;;  %v497_v62 = vrot.slane %v496_v53, 2  ;;  %v478_v63 = vcombine.high %v475_v54, %v475_v54 }
  0xd8   : > { %v412_v2 = vrot.slane %v411_v55, 1  ;;  %v418_v3 = vadd.f32 %v417_v57, %v416_v46  ;;  %v447_v5 = vrot.slane %v427_v58, %v4527_v39  ;;  %v339_v7 = vrot.slane %v338_v59, 1 }
  0xd9   : > { %v345_v8 = vadd.f32 %v344_v60, %v343_v50  ;;  %v374_v9 = vrot.slane %v4614_v61, %v4527_v39  ;;  %v498_v10 = vadd.f32 %v497_v62, %v496_v53  ;;  %v480_v11 = vsel %vm256_vm1, %v475_v54, 0.0  ;;  %v356_v61 = vld [vmem:[#allocation2 + $0x1] ss:$8 sm:$0x7] }
  0xda   : > { %v413_v13 = vadd.f32 %v412_v2, %v411_v55  ;;  %v419_v14 = vrot.slane %v418_v3, 1  ;;  %v340_v15 = vadd.f32 %v339_v7, %v338_v59  ;;  %v481_v16 = vrot.slane %v480_v11, 4  ;;  %2823 = vrot.lane.b32.xlu1 %v4553_v56, %s4300_s27  ;;  %2821 = vrot.lane.b32.xlu0 %v4494_v1, %s4300_s27  ;;  %v4648_v59 = vld [vmem:[%s4461_s29 + $0x8] sm:$0xff] }
  0xdb   : > { %v346_v18 = vrot.slane %v345_v8, 1  ;;  %v499_v19 = vrot.slane %v498_v10, 1  ;;  %v487_v20 = vsel %vm256_vm1, %v478_v63, 0.0  ;;  %v542_v21 = vrot.slane %v540_v49, 4 }
  0xdc   : > { %v420_v23 = vadd.f32 %v419_v14, %v418_v3  ;;  %v482_v24 = vadd.f32 %v481_v16, %v480_v11  ;;  %v488_v25 = vrot.slane %v487_v20, 4  ;;  %v549_v26 = vmul.f32 %v540_v49, %v4505_v6 }
  0xdd   : > { %v347_v27 = vadd.f32 %v346_v18, %v345_v8  ;;  %v4629_v28 = vadd.f32 %v499_v19, %v498_v10  ;;  %v541_v29 = vrot.slane %v538_v12, 4  ;;  %v615_v30 = vrot.slane %v4620_v17, 4 }
  0xde   : > { %v433_v1 = vcombine.low %v413_v13, %v420_v23  ;;  %v483_v31 = vrot.slane %v482_v24, 2  ;;  %v489_v32 = vadd.f32 %v488_v25, %v487_v20  ;;  %v567_v33 = vsel %vm271_vm2, %v549_v26, 0.0  ;;  %2897 = vrot.lane.b32.xlu1 %v4553_v56, %s4301_s19  ;;  %2895 = vrot.lane.b32.xlu0 %v4626_v22, %s4301_s19 }
  0xdf   : > { %v360_v34 = vcombine.low %v340_v15, %v347_v27  ;;  %v520_v35 = vrot.slane %v4629_v28, %v4527_v39  ;;  %v568_v36 = vrot.slane %v567_v33, 4  ;;  %v543_v37 = vsel %vm256_vm1, %v541_v29, %v542_v21 }
  0xe0   : > { %v440_v40 = vrot.slane %v433_v1, %v4527_v39  ;;  %v484_v41 = vadd.f32 %v483_v31, %v482_v24  ;;  %v490_v42 = vrot.slane %v489_v32, 2  ;;  %v545_v43 = vsel %vm544_vm7, %v538_v12, %v543_v37  ;;  %v686_v12 = vpop.permute.xlu1 %685  ;;  %v684_v1 = vpop.permute.xlu0 %683 }
  0xe1   : > { %v367_v44 = vrot.slane %v360_v34, %v4527_v39  ;;  %v569_v45 = vadd.f32 %v568_v36, %v567_v33  ;;  %v548_v46 = vmul.f32 %v545_v43, %v4501_v4  ;;  %v622_v47 = vmul.f32 %v4620_v17, %v4505_v6 }
  0xe2   : > { %v448_v49 = vcombine.low %v440_v40, %v447_v5  ;;  %v485_v50 = vrot.slane %v484_v41, 1  ;;  %v491_v52 = vadd.f32 %v490_v42, %v489_v32  ;;  %v614_v53 = vrot.slane %v611_v38, 4  ;;  %2971 = vrot.lane.b32.xlu1 %v4553_v56, %s4302_s22  ;;  %2969 = vrot.lane.b32.xlu0 %v4626_v22, %s4302_s22 }
  0xe3   : > { %v375_v54 = vcombine.low %v367_v44, %v374_v9  ;;  %v570_v55 = vrot.slane %v569_v45, 2  ;;  %v551_v57 = vcombine.high %v548_v46, %v548_v46  ;;  %v553_v58 = vsel %vm256_vm1, %v548_v46, 0.0 }
  0xe4   : > { %v455_v60 = vrot.slane %v448_v49, %v4527_v39  ;;  %v486_v62 = vadd.f32 %v485_v50, %v484_v41  ;;  %v492_v63 = vrot.slane %v491_v52, 1  ;;  %v554_v2 = vrot.slane %v553_v58, 4  ;;  %v502_v41 = vld [vmem:[#allocation2 + $0x3] ss:$8 sm:$0x7] }
  0xe5   : > { %v382_v3 = vrot.slane %v375_v54, %v4527_v39  ;;  %v571_v5 = vadd.f32 %v570_v55, %v569_v45  ;;  %v560_v56 = vsel %vm256_vm1, %v551_v57, 0.0  ;;  %v640_v7 = vsel %vm271_vm2, %v622_v47, 0.0 }
  0xe6   : > { %v457_v8 = vadd.f32 %v455_v60, %v429_v48  ;;  %v493_v9 = vadd.f32 %v492_v63, %v491_v52  ;;  %v555_v10 = vadd.f32 %v554_v2, %v553_v58  ;;  %v561_v11 = vrot.slane %v560_v56, 4  ;;  %3045 = vrot.lane.b32.xlu1 %v4648_v59, %s4303_s3  ;;  %3043 = vrot.lane.b32.xlu0 %v4626_v22, %s4303_s3 }
  0xe7   : > { %v384_v13 = vadd.f32 %v382_v3, %v356_v61  ;;  %v572_v14 = vrot.slane %v571_v5, 1  ;;  %v641_v15 = vrot.slane %v640_v7, 4  ;;  %v616_v16 = vsel %vm256_vm1, %v614_v53, %v615_v30  ;;  %v759_v53 = vpop.permute.xlu1 %758 }
  0xe8   : > { %458 = vst.msk [vmem:[#allocation2 + $0x2] ss:$8 sm:$0x7] %vm4537_vm3, %v457_v8  ;;  %v506_v17 = vcombine.low %v486_v62, %v493_v9  ;;  %v556_v18 = vrot.slane %v555_v10, 2  ;;  %v562_v19 = vadd.f32 %v561_v11, %v560_v56  ;;  %v618_v20 = vsel %vm617_vm8, %v611_v38, %v616_v16  ;;  %v757_v11 = vpop.permute.xlu0 %756 }
  0xe9   : > { %385 = vst.msk [vmem:[#allocation2 + $0x1] ss:$8 sm:$0x7] %vm4537_vm3, %v384_v13  ;;  %v4662_v21 = vadd.f32 %v572_v14, %v571_v5  ;;  %v642_v23 = vadd.f32 %v641_v15, %v640_v7  ;;  %v621_v24 = vmul.f32 %v618_v20, %v4501_v4  ;;  %v688_v25 = vrot.slane %v686_v12, 4  ;;  %v4694_v13 = vld [vmem:[%s4461_s29 + $0x4] sm:$0xff] }
  0xea   : > { %v513_v26 = vrot.slane %v506_v17, %v4527_v39  ;;  %v557_v27 = vadd.f32 %v556_v18, %v555_v10  ;;  %v563_v29 = vrot.slane %v562_v19, 2  ;;  %v695_v30 = vmul.f32 %v686_v12, %v4505_v6  ;;  %3119 = vrot.lane.b32.xlu1 %v4648_v59, %s4304_s6  ;;  %3117 = vrot.lane.b32.xlu0 %v4626_v22, %s4304_s6  ;;  %v3336_v12 = vld [vmem:[%s4461_s29 + $0xc] sm:$0xf] }
  0xeb   : > { %v593_v31 = vrot.slane %v4662_v21, %v4527_v39  ;;  %v643_v32 = vrot.slane %v642_v23, 2  ;;  %v624_v33 = vcombine.high %v621_v24, %v621_v24  ;;  %v626_v34 = vsel %vm256_vm1, %v621_v24, 0.0  ;;  %v4700_v20 = vpop.permute.xlu1 %831  ;;  %v575_v21 = vld [vmem:[#allocation2 + $0x4] ss:$8 sm:$0x7] }
  0xec   : > { %v521_v36 = vcombine.low %v513_v26, %v520_v35  ;;  %v558_v37 = vrot.slane %v557_v27, 1  ;;  %v564_v38 = vadd.f32 %v563_v29, %v562_v19  ;;  %v627_v40 = vrot.slane %v626_v34, 4 }
  0xed   : > { %v644_v42 = vadd.f32 %v643_v32, %v642_v23  ;;  %v633_v43 = vsel %vm256_vm1, %v624_v33, 0.0  ;;  %v713_v44 = vsel %vm271_vm2, %v695_v30, 0.0  ;;  %v687_v45 = vrot.slane %v684_v1, 4  ;;  %v3408_v32 = vld [vmem:[%s4461_s29 + $0xc] sm:$0xf] }
  0xee   : > { %v528_v46 = vrot.slane %v521_v36, %v4527_v39  ;;  %v559_v47 = vadd.f32 %v558_v37, %v557_v27  ;;  %v565_v48 = vrot.slane %v564_v38, 1  ;;  %v628_v49 = vadd.f32 %v627_v40, %v626_v34  ;;  %3193 = vrot.lane.b32.xlu1 %v4648_v59, %s4305_s7  ;;  %3191 = vrot.lane.b32.xlu0 %v4626_v22, %s4305_s7 }
  0xef   : > { %v645_v28 = vrot.slane %v644_v42, 1  ;;  %v634_v35 = vrot.slane %v633_v43, 4  ;;  %v714_v50 = vrot.slane %v713_v44, 4  ;;  %v689_v52 = vsel %vm256_vm1, %v687_v45, %v688_v25 }
  0xf0   : > { %v530_v54 = vadd.f32 %v528_v46, %v502_v41  ;;  %v566_v55 = vadd.f32 %v565_v48, %v564_v38  ;;  %v629_v57 = vrot.slane %v628_v49, 2  ;;  %v691_v58 = vsel %vm690_vm9, %v684_v1, %v689_v52 }
  0xf1   : > { %v4682_v60 = vadd.f32 %v645_v28, %v644_v42  ;;  %v635_v61 = vadd.f32 %v634_v35, %v633_v43  ;;  %v715_v62 = vadd.f32 %v714_v50, %v713_v44  ;;  %v694_v63 = vmul.f32 %v691_v58, %v4501_v4  ;;  %v830_v42 = vpop.permute.xlu0 %829  ;;  %v3480_v35 = vld [vmem:[%s4461_s29 + $0xc] sm:$0xf] }
  0xf2   : > { %531 = vst.msk [vmem:[#allocation2 + $0x3] ss:$8 sm:$0x7] %vm4537_vm3, %v530_v54  ;;  %v579_v2 = vcombine.low %v559_v47, %v566_v55  ;;  %v630_v3 = vadd.f32 %v629_v57, %v628_v49  ;;  %v761_v5 = vrot.slane %v759_v53, 4  ;;  %v768_v56 = vmul.f32 %v759_v53, %v4505_v6  ;;  %3267 = vrot.lane.b32.xlu1 %v4648_v59, %s4306_s8  ;;  %v4723_v55 = vpop.permute.xlu1 %904 }
  0xf3   : > { %3265 = vrot.lane.b32.xlu0 %v4626_v22, %s4306_s8  ;;  %v666_v7 = vrot.slane %v4682_v60, %v4527_v39  ;;  %v636_v8 = vrot.slane %v635_v61, 2  ;;  %v716_v9 = vrot.slane %v715_v62, 2  ;;  %v697_v10 = vcombine.high %v694_v63, %v694_v63 }
  0xf4   : > { %v586_v14 = vrot.slane %v579_v2, %v4527_v39  ;;  %v631_v15 = vrot.slane %v630_v3, 1  ;;  %v699_v16 = vsel %vm256_vm1, %v694_v63, 0.0  ;;  %v786_v17 = vsel %vm271_vm2, %v768_v56, 0.0 }
  0xf5   : > { %v637_v59 = vadd.f32 %v636_v8, %v635_v61  ;;  %v717_v22 = vadd.f32 %v716_v9, %v715_v62  ;;  %v700_v18 = vrot.slane %v699_v16, 4  ;;  %v706_v19 = vsel %vm256_vm1, %v697_v10, 0.0 }
  0xf6   : > { %v594_v23 = vcombine.low %v586_v14, %v593_v31  ;;  %v632_v24 = vadd.f32 %v631_v15, %v630_v3  ;;  %v707_v25 = vrot.slane %v706_v19, 4  ;;  %v787_v26 = vrot.slane %v786_v17, 4  ;;  %3341 = vrot.lane.b32.xlu1 %v3336_v12, %s4268_s5  ;;  %v648_v12 = vld [vmem:[#allocation2 + $0x5] ss:$8 sm:$0x7] }
  0xf7   : > { %3339 = vrot.lane.b32.xlu0 %v4694_v13, %s4268_s5  ;;  %v638_v27 = vrot.slane %v637_v59, 1  ;;  %v718_v29 = vrot.slane %v717_v22, 1  ;;  %v701_v30 = vadd.f32 %v700_v18, %v699_v16  ;;  %v760_v1 = vrot.slane %v757_v11, 4  ;;  %s4307_s5 = smov 121  }
  0xf8   : > { %v601_v33 = vrot.slane %v594_v23, %v4527_v39  ;;  %v708_v34 = vadd.f32 %v707_v25, %v706_v19  ;;  %v788_v36 = vadd.f32 %v787_v26, %v786_v17  ;;  %v834_v37 = vrot.slane %v4700_v20, 4  ;;  %v903_v23 = vpop.permute.xlu0 %902 }
  0xf9   : > { %v639_v31 = vadd.f32 %v638_v27, %v637_v59  ;;  %v4708_v38 = vadd.f32 %v718_v29, %v717_v22  ;;  %v702_v40 = vrot.slane %v701_v30, 2  ;;  %v762_v41 = vsel %vm256_vm1, %v760_v1, %v761_v5 }
  0xfa   : > { %v603_v43 = vadd.f32 %v601_v33, %v575_v21  ;;  %v709_v44 = vrot.slane %v708_v34, 2  ;;  %v789_v45 = vrot.slane %v788_v36, 2  ;;  %v764_v46 = vsel %vm763_vm10, %v757_v11, %v762_v41  ;;  %3413 = vrot.lane.b32.xlu1 %v3408_v32, %s4270_s26  ;;  %v3552_v11 = vld [vmem:[%s4461_s29 + $0xc] sm:$0xf] }
  0xfb   : > { %3411 = vrot.lane.b32.xlu0 %v4694_v13, %s4270_s26  ;;  %v652_v47 = vcombine.low %v632_v24, %v639_v31  ;;  %v739_v48 = vrot.slane %v4708_v38, %v4527_v39  ;;  %v703_v49 = vadd.f32 %v702_v40, %v701_v30  ;;  %v767_v28 = vmul.f32 %v764_v46, %v4501_v4  ;;  %v4743_v24 = vpop.permute.xlu1 %977  ;;  %v3625_v30 = vld [vmem:[%s4461_s29 + $0xc] sm:$0xf]  ;;  %s4308_s26 = smov 120  }
  0xfc   : > { %604 = vst.msk [vmem:[#allocation2 + $0x4] ss:$8 sm:$0x7] %vm4537_vm3, %v603_v43  ;;  %v710_v50 = vadd.f32 %v709_v44, %v708_v34  ;;  %v790_v52 = vadd.f32 %v789_v45, %v788_v36  ;;  %v841_v53 = vmul.f32 %v4700_v20, %v4505_v6  ;;  %v833_v54 = vrot.slane %v830_v42, 4 }
  0xfd   : > { %v659_v57 = vrot.slane %v652_v47, %v4527_v39  ;;  %v704_v58 = vrot.slane %v703_v49, 1  ;;  %v770_v61 = vcombine.high %v767_v28, %v767_v28  ;;  %v772_v62 = vsel %vm256_vm1, %v767_v28, 0.0  ;;  %v721_v40 = vld [vmem:[#allocation2 + $0x6] ss:$8 sm:$0x7] }
  0xfe   : > { %v711_v63 = vrot.slane %v710_v50, 1  ;;  %v791_v2 = vrot.slane %v790_v52, 1  ;;  %v773_v3 = vrot.slane %v772_v62, 4  ;;  %v859_v5 = vsel %vm271_vm2, %v841_v53, 0.0  ;;  %3485 = vrot.lane.b32.xlu1 %v3480_v35, %s4271_s30  ;;  %v3698_v28 = vld [vmem:[%s4461_s29 + $0xc] sm:$0xf] }
  0xff   : > { %3483 = vrot.lane.b32.xlu0 %v4694_v13, %s4271_s30  ;;  %v667_v56 = vcombine.low %v659_v57, %v666_v7  ;;  %v705_v8 = vadd.f32 %v704_v58, %v703_v49  ;;  %v779_v9 = vsel %vm256_vm1, %v770_v61, 0.0  ;;  %v860_v10 = vrot.slane %v859_v5, 4  ;;  %v976_v58 = vpop.permute.xlu0 %975  ;;  %s4309_s30 = smov 119  }
 0x100   : > { %v712_v14 = vadd.f32 %v711_v63, %v710_v50  ;;  %v4736_v15 = vadd.f32 %v791_v2, %v790_v52  ;;  %v774_v16 = vadd.f32 %v773_v3, %v772_v62  ;;  %v780_v17 = vrot.slane %v779_v9, 4 }
 0x101   : > { %v674_v59 = vrot.slane %v667_v56, %v4527_v39  ;;  %v861_v22 = vadd.f32 %v860_v10, %v859_v5  ;;  %v835_v18 = vsel %vm256_vm1, %v833_v54, %v834_v37  ;;  %v907_v60 = vrot.slane %v4723_v55, 4 }
 0x102   : > { %v725_v7 = vcombine.low %v705_v8, %v712_v14  ;;  %v812_v19 = vrot.slane %v4736_v15, %v4527_v39  ;;  %v775_v20 = vrot.slane %v774_v16, 2  ;;  %v781_v21 = vadd.f32 %v780_v17, %v779_v9  ;;  %3557 = vrot.lane.b32.xlu1 %v3552_v11, %s4307_s5  ;;  %v3771_v9 = vld [vmem:[%s4461_s29 + $0xc] sm:$0xf]  ;;  %s4310_s29 = smov 118  }
 0x103   : > { %3555 = vrot.lane.b32.xlu0 %v4694_v13, %s4307_s5  ;;  %v676_v25 = vadd.f32 %v674_v59, %v648_v12  ;;  %v862_v26 = vrot.slane %v861_v22, 2  ;;  %v837_v27 = vsel %vm836_vm11, %v830_v42, %v835_v18  ;;  %v914_v29 = vmul.f32 %v4723_v55, %v4505_v6 }
 0x104   : > { %v732_v1 = vrot.slane %v725_v7, %v4527_v39  ;;  %v776_v32 = vadd.f32 %v775_v20, %v774_v16  ;;  %v782_v33 = vrot.slane %v781_v21, 2  ;;  %v840_v34 = vmul.f32 %v837_v27, %v4501_v4 }
 0x105   : > { %677 = vst.msk [vmem:[#allocation2 + $0x5] ss:$8 sm:$0x7] %vm4537_vm3, %v676_v25  ;;  %v863_v36 = vadd.f32 %v862_v26, %v861_v22  ;;  %v932_v37 = vsel %vm271_vm2, %v914_v29, 0.0  ;;  %v906_v31 = vrot.slane %v903_v23, 4  ;;  %v980_v38 = vrot.slane %v4743_v24, 4 }
 0x106   : > { %v740_v41 = vcombine.low %v732_v1, %v739_v48  ;;  %v777_v42 = vrot.slane %v776_v32, 1  ;;  %v783_v43 = vadd.f32 %v782_v33, %v781_v21  ;;  %v843_v44 = vcombine.high %v840_v34, %v840_v34  ;;  %3630 = vrot.lane.b32.xlu1 %v3625_v30, %s4308_s26  ;;  %v794_v29 = vld [vmem:[#allocation2 + $0x7] ss:$8 sm:$0x7]  ;;  %v1051_v33 = vpop.permute.xlu1 %1050 }
 0x107   : > { %3628 = vrot.lane.b32.xlu0 %v4694_v13, %s4308_s26  ;;  %v864_v45 = vrot.slane %v863_v36, 1  ;;  %v845_v46 = vsel %vm256_vm1, %v840_v34, 0.0  ;;  %v933_v47 = vrot.slane %v932_v37, 4  ;;  %v908_v49 = vsel %vm256_vm1, %v906_v31, %v907_v60 }
 0x108   : > { %v747_v35 = vrot.slane %v740_v41, %v4527_v39  ;;  %v778_v50 = vadd.f32 %v777_v42, %v776_v32  ;;  %v784_v52 = vrot.slane %v783_v43, 1  ;;  %v846_v48 = vrot.slane %v845_v46, 4 }
 0x109   : > { %v4761_v53 = vadd.f32 %v864_v45, %v863_v36  ;;  %v852_v54 = vsel %vm256_vm1, %v843_v44, 0.0  ;;  %v934_v55 = vadd.f32 %v933_v47, %v932_v37  ;;  %v910_v57 = vsel %vm909_vm12, %v903_v23, %v908_v49 }
 0x10a   : > { %v749_v61 = vadd.f32 %v747_v35, %v721_v40  ;;  %v785_v62 = vadd.f32 %v784_v52, %v783_v43  ;;  %v847_v63 = vadd.f32 %v846_v48, %v845_v46  ;;  %v853_v2 = vrot.slane %v852_v54, 4  ;;  %3703 = vrot.lane.b32.xlu1 %v3698_v28, %s4309_s30  ;;  %v4791_v40 = vld [vmem:[%s4455_s28] sm:$0xff]  ;;  %v1049_v46 = vpop.permute.xlu0 %1048 }
 0x10b   : > { %3701 = vrot.lane.b32.xlu0 %v4694_v13, %s4309_s30  ;;  %v885_v3 = vrot.slane %v4761_v53, %v4527_v39  ;;  %v935_v5 = vrot.slane %v934_v55, 2  ;;  %v913_v56 = vmul.f32 %v910_v57, %v4501_v4  ;;  %v987_v8 = vmul.f32 %v4743_v24, %v4505_v6 }
 0x10c   : > { %750 = vst.msk [vmem:[#allocation2 + $0x6] ss:$8 sm:$0x7] %vm4537_vm3, %v749_v61  ;;  %v798_v10 = vcombine.low %v778_v50, %v785_v62  ;;  %v848_v11 = vrot.slane %v847_v63, 2  ;;  %v854_v12 = vadd.f32 %v853_v2, %v852_v54  ;;  %v979_v14 = vrot.slane %v976_v58, 4 }
 0x10d   : > { %v936_v16 = vadd.f32 %v935_v5, %v934_v55  ;;  %v916_v17 = vcombine.high %v913_v56, %v913_v56  ;;  %v918_v59 = vsel %vm256_vm1, %v913_v56, 0.0  ;;  %v1005_v22 = vsel %vm271_vm2, %v987_v8, 0.0  ;;  %v4803_v54 = vld [vmem:[%s4455_s28 + $0x8] sm:$0xf]  ;;  %v1124_v8 = vpop.permute.xlu1 %1123 }
 0x10e   : > { %v805_v18 = vrot.slane %v798_v10, %v4527_v39  ;;  %v849_v4 = vadd.f32 %v848_v11, %v847_v63  ;;  %v855_v60 = vrot.slane %v854_v12, 2  ;;  %v919_v6 = vrot.slane %v918_v59, 4  ;;  %3776 = vrot.lane.b32.xlu1 %v3771_v9, %s4310_s29 }
 0x10f   : > { %3774 = vrot.lane.b32.xlu0 %v4694_v13, %s4310_s29  ;;  %v937_v7 = vrot.slane %v936_v16, 1  ;;  %v925_v20 = vsel %vm256_vm1, %v916_v17, 0.0  ;;  %v1006_v21 = vrot.slane %v1005_v22, 4  ;;  %v981_v23 = vsel %vm256_vm1, %v979_v14, %v980_v38 }
 0x110   : > { %v813_v24 = vcombine.low %v805_v18, %v812_v19  ;;  %v850_v25 = vrot.slane %v849_v4, 1  ;;  %v856_v26 = vadd.f32 %v855_v60, %v854_v12  ;;  %v920_v27 = vadd.f32 %v919_v6, %v918_v59  ;;  %v867_v18 = vld [vmem:[#allocation2 + $0x18] ss:$8 sm:$0x7] }
 0x111   : > { %v4784_v30 = vadd.f32 %v937_v7, %v936_v16  ;;  %v926_v13 = vrot.slane %v925_v20, 4  ;;  %v1007_v1 = vadd.f32 %v1006_v21, %v1005_v22  ;;  %v983_v32 = vsel %vm982_vm13, %v976_v58, %v981_v23  ;;  %v1122_v22 = vpop.permute.xlu0 %1121 }
 0x112   : > { %v820_v34 = vrot.slane %v813_v24, %v4527_v39  ;;  %v851_v15 = vadd.f32 %v850_v25, %v849_v4  ;;  %v857_v19 = vrot.slane %v856_v26, 1  ;;  %v921_v36 = vrot.slane %v920_v27, 2 }
 0x113   : > { %v958_v37 = vrot.slane %v4784_v30, %v4527_v39  ;;  %v927_v31 = vadd.f32 %v926_v13, %v925_v20  ;;  %v1008_v38 = vrot.slane %v1007_v1, 2  ;;  %v986_v41 = vmul.f32 %v4791_v40, %v983_v32 }
 0x114   : > { %v822_v42 = vadd.f32 %v820_v34, %v794_v29  ;;  %v858_v43 = vadd.f32 %v857_v19, %v856_v26  ;;  %v922_v44 = vadd.f32 %v921_v36, %v920_v27  ;;  %v1053_v45 = vrot.slane %v1051_v33, 4 }
 0x115   : > { %v928_v47 = vrot.slane %v927_v31, 2  ;;  %v1009_v49 = vadd.f32 %v1008_v38, %v1007_v1  ;;  %v989_v28 = vcombine.high %v986_v41, %v986_v41  ;;  %v991_v35 = vsel %vm256_vm1, %v986_v41, 0.0 }
 0x116   : > { %823 = vst.msk [vmem:[#allocation2 + $0x7] ss:$8 sm:$0x7] %vm4537_vm3, %v822_v42  ;;  %v871_v50 = vcombine.low %v851_v15, %v858_v43  ;;  %v923_v52 = vrot.slane %v922_v44, 1  ;;  %v992_v48 = vrot.slane %v991_v35, 4  ;;  %v1060_v55 = vmul.f32 %v4803_v54, %v1051_v33 }
 0x117   : > { %v929_v57 = vadd.f32 %v928_v47, %v927_v31  ;;  %v1010_v58 = vrot.slane %v1009_v49, 1  ;;  %v998_v61 = vsel %vm256_vm1, %v989_v28, 0.0  ;;  %v1052_v62 = vrot.slane %v1049_v46, 4  ;;  %v940_v28 = vld [vmem:[#allocation2 + $0x19] ss:$8 sm:$0x7] }
 0x118   : > { %v878_v63 = vrot.slane %v871_v50, %v4527_v39  ;;  %v924_v2 = vadd.f32 %v923_v52, %v922_v44  ;;  %v993_v5 = vadd.f32 %v992_v48, %v991_v35  ;;  %v999_v56 = vrot.slane %v998_v61, 4 }
 0x119   : > { %v930_v9 = vrot.slane %v929_v57, 1  ;;  %v4809_v10 = vadd.f32 %v1010_v58, %v1009_v49  ;;  %v1078_v11 = vsel %vm271_vm2, %v1060_v55, 0.0  ;;  %v1054_v12 = vsel %vm256_vm1, %v1052_v62, %v1053_v45  ;;  %v1197_v49 = vpop.permute.xlu1 %1196 }
 0x11a   : > { %v886_v14 = vcombine.low %v878_v63, %v885_v3  ;;  %v994_v16 = vrot.slane %v993_v5, 2  ;;  %v1000_v17 = vadd.f32 %v999_v56, %v998_v61  ;;  %v1079_v59 = vrot.slane %v1078_v11, 4 }
 0x11b   : > { %v931_v4 = vadd.f32 %v930_v9, %v929_v57  ;;  %v1031_v60 = vrot.slane %v4809_v10, %v4527_v39  ;;  %v1056_v6 = vsel %vm1055_vm14, %v1049_v46, %v1054_v12  ;;  %v1126_v7 = vrot.slane %v1124_v8, 4 }
 0x11c   : > { %v893_v20 = vrot.slane %v886_v14, %v4527_v39  ;;  %v995_v21 = vadd.f32 %v994_v16, %v993_v5  ;;  %v1001_v23 = vrot.slane %v1000_v17, 2  ;;  %v1080_v24 = vadd.f32 %v1079_v59, %v1078_v11 }
 0x11d   : > { %v3846_v53 = vld [vmem:[#allocation2] sm:$0xff]  ;;  %v3847_v3 = vld [vmem:[#allocation2 + $0x8] sm:$0xff]  ;;  %v3848_v25 = vld [vmem:[#allocation2 + $0x10] sm:$0xff]  ;;  %v944_v26 = vcombine.low %v924_v2, %v931_v4  ;;  %v1059_v27 = vmul.f32 %v4791_v40, %v1056_v6  ;;  %v1133_v29 = vmul.f32 %v4803_v54, %v1124_v8  ;;  %v1125_v13 = vrot.slane %v1122_v22, 4  ;;  %v1270_v4 = vpop.permute.xlu1 %1269 }
 0x11e   : > { %v3867_v1 = vmul.f32 0.25, %v3846_v53  ;;  %v3868_v32 = vmul.f32 0.25, %v3847_v3  ;;  %v3869_v33 = vmul.f32 0.25, %v3848_v25  ;;  %v895_v34 = vadd.f32 %v893_v20, %v867_v18  ;;  %v1195_v18 = vpop.permute.xlu0 %1194 }
 0x11f   : > { %v951_v15 = vrot.slane %v944_v26, %v4527_v39  ;;  %v996_v19 = vrot.slane %v995_v21, 1  ;;  %v1002_v36 = vadd.f32 %v1001_v23, %v1000_v17  ;;  %v1081_v31 = vrot.slane %v1080_v24, 2  ;;  %v1013_v23 = vld [vmem:[#allocation2 + $0x1a] ss:$8 sm:$0x7] }
 0x120   : > { %3888 = vst [vmem:[%s4823_s15] sm:$0xff] %v3867_v1  ;;  %3889 = vst [vmem:[%s4823_s15 + $0x8] sm:$0xff] %v3868_v32  ;;  %v1062_v38 = vcombine.high %v1059_v27, %v1059_v27  ;;  %v1064_v41 = vsel %vm256_vm1, %v1059_v27, 0.0  ;;  %v1151_v42 = vsel %vm271_vm2, %v1133_v29, 0.0  ;;  %v1127_v43 = vsel %vm256_vm1, %v1125_v13, %v1126_v7 }
 0x121   : > { %3891 = vst.msk [vmem:[%s4823_s15 + $0x10] sm:$0xff] %vm226_vm0, %v3869_v33  ;;  %v959_v44 = vcombine.low %v951_v15, %v958_v37  ;;  %v997_v45 = vadd.f32 %v996_v19, %v995_v21  ;;  %v1003_v46 = vrot.slane %v1002_v36, 1  ;;  %v1082_v47 = vadd.f32 %v1081_v31, %v1080_v24 }
 0x122   : > { %896 = vst.msk [vmem:[#allocation2 + $0x18] ss:$8 sm:$0x7] %vm4537_vm3, %v895_v34  ;;  %v1065_v35 = vrot.slane %v1064_v41, 4  ;;  %v1071_v50 = vsel %vm256_vm1, %v1062_v38, 0.0  ;;  %v1152_v52 = vrot.slane %v1151_v42, 4  ;;  %v1129_v48 = vsel %vm1128_vm15, %v1122_v22, %v1127_v43  ;;  %v4860_v43 = vpop.permute.xlu1 %1343 }
 0x123   : > { %v966_v55 = vrot.slane %v959_v44, %v4527_v39  ;;  %v1004_v57 = vadd.f32 %v1003_v46, %v1002_v36  ;;  %v1083_v58 = vrot.slane %v1082_v47, 1  ;;  %v1072_v61 = vrot.slane %v1071_v50, 4 }
 0x124   : > { %v1066_v62 = vadd.f32 %v1065_v35, %v1064_v41  ;;  %v1153_v30 = vadd.f32 %v1152_v52, %v1151_v42  ;;  %v1132_v37 = vmul.f32 %v4791_v40, %v1129_v48  ;;  %v1199_v63 = vrot.slane %v1197_v49, 4  ;;  %v1268_v42 = vpop.permute.xlu0 %1267 }
 0x125   : > { %v968_v2 = vadd.f32 %v966_v55, %v940_v28  ;;  %v1017_v5 = vcombine.low %v997_v45, %v1004_v57  ;;  %v4844_v56 = vadd.f32 %v1083_v58, %v1082_v47  ;;  %v1073_v8 = vadd.f32 %v1072_v61, %v1071_v50 }
 0x126   : > { %vm1274_vm5 = vcmask 687104   ;;  %v1067_v9 = vrot.slane %v1066_v62, 2  ;;  %v1154_v11 = vrot.slane %v1153_v30, 2  ;;  %v1135_v12 = vcombine.high %v1132_v37, %v1132_v37 }
 0x127   : > { %v1137_v14 = vsel %vm256_vm1, %v1132_v37, 0.0  ;;  %969 = vst.msk [vmem:[#allocation2 + $0x19] ss:$8 sm:$0x7] %vm4537_vm3, %v968_v2  ;;  %v1024_v16 = vrot.slane %v1017_v5, %v4527_v39  ;;  %v1104_v17 = vrot.slane %v4844_v56, %v4527_v39  ;;  %v1074_v59 = vrot.slane %v1073_v8, 2 }
 0x128   : > { %v1138_v22 = vrot.slane %v1137_v14, 4  ;;  %v1068_v6 = vadd.f32 %v1067_v9, %v1066_v62  ;;  %v1155_v7 = vadd.f32 %v1154_v11, %v1153_v30  ;;  %v1144_v20 = vsel %vm256_vm1, %v1135_v12, 0.0  ;;  %v1086_v12 = vld [vmem:[#allocation2 + $0x1b] ss:$8 sm:$0x7] }
 0x129   : > { %v1206_v21 = vmul.f32 %v4803_v54, %v1197_v49  ;;  %v1032_v24 = vcombine.low %v1024_v16, %v1031_v60  ;;  %v1075_v53 = vadd.f32 %v1074_v59, %v1073_v8  ;;  %v1145_v25 = vrot.slane %v1144_v20, 4 }
 0x12a   : > { %v1139_v3 = vadd.f32 %v1138_v22, %v1137_v14  ;;  %v1069_v26 = vrot.slane %v1068_v6, 1  ;;  %v1156_v27 = vrot.slane %v1155_v7, 1  ;;  %v1198_v13 = vrot.slane %v1195_v18, 4 }
 0x12b   : > { %v1224_v29 = vsel %vm271_vm2, %v1206_v21, 0.0  ;;  %v1039_v1 = vrot.slane %v1032_v24, %v4527_v39  ;;  %v1076_v32 = vrot.slane %v1075_v53, 1  ;;  %v1146_v34 = vadd.f32 %v1145_v25, %v1144_v20 }
 0x12c   : > { %v1140_v33 = vrot.slane %v1139_v3, 2  ;;  %vm1348_vm6 = vcmask 678912   ;;  %v1070_v15 = vadd.f32 %v1069_v26, %v1068_v6  ;;  %v1157_v19 = vadd.f32 %v1156_v27, %v1155_v7  ;;  %v1342_v26 = vpop.permute.xlu0 %1341 }
 0x12d   : > { %v1225_v36 = vrot.slane %v1224_v29, 4  ;;  %v1200_v10 = vsel %vm256_vm1, %v1198_v13, %v1199_v63  ;;  %v1041_v60 = vadd.f32 %v1039_v1, %v1013_v23  ;;  %v1077_v31 = vadd.f32 %v1076_v32, %v1075_v53 }
 0x12e   : > { %v1141_v38 = vadd.f32 %v1140_v33, %v1139_v3  ;;  %v1147_v41 = vrot.slane %v1146_v34, 2  ;;  %v1177_v44 = vrot.slane %v1157_v19, %v4527_v39  ;;  %v1202_v46 = vsel %vm1201_vm4, %v1195_v18, %v1200_v10  ;;  %v1159_v19 = vld [vmem:[#allocation2 + $0x1c] ss:$8 sm:$0x7] }
 0x12f   : > { %v1226_v45 = vadd.f32 %v1225_v36, %v1224_v29  ;;  %v1272_v47 = vrot.slane %v1270_v4, 4  ;;  %1042 = vst.msk [vmem:[#allocation2 + $0x1a] ss:$8 sm:$0x7] %vm4537_vm3, %v1041_v60  ;;  %v1090_v49 = vcombine.low %v1070_v15, %v1077_v31  ;;  %v1205_v50 = vmul.f32 %v4791_v40, %v1202_v46 }
 0x130   : > { %v1142_v28 = vrot.slane %v1141_v38, 1  ;;  %v1148_v35 = vadd.f32 %v1147_v41, %v1146_v34  ;;  %v1271_v55 = vrot.slane %v1268_v42, 4  ;;  %v1346_v57 = vrot.slane %v4860_v43, 4 }
 0x131   : > { %v1227_v52 = vrot.slane %v1226_v45, 2  ;;  %v1276_v48 = vsel %vm1274_vm5, %v1270_v4, %v1272_v47  ;;  %v1097_v58 = vrot.slane %v1090_v49, %v4527_v39  ;;  %v1208_v30 = vcombine.high %v1205_v50, %v1205_v50  ;;  %v1418_v49 = vpop.permute.xlu1 %1417 }
 0x132   : > { %v1143_v61 = vadd.f32 %v1142_v28, %v1141_v38  ;;  %v1149_v62 = vrot.slane %v1148_v35, 1  ;;  %v1210_v63 = vsel %vm256_vm1, %v1205_v50, 0.0  ;;  %v1280_v2 = vmul.f32 %v4803_v54, %v1276_v48  ;;  %v1416_v48 = vpop.permute.xlu0 %1415 }
 0x133   : > { %v1228_v37 = vadd.f32 %v1227_v52, %v1226_v45  ;;  %v1273_v5 = vsel %vm256_vm1, %v1271_v55, %v1272_v47  ;;  %v1105_v56 = vcombine.low %v1097_v58, %v1104_v17  ;;  %v1211_v9 = vrot.slane %v1210_v63, 4 }
 0x134   : > { %v1150_v8 = vadd.f32 %v1149_v62, %v1148_v35  ;;  %v1217_v11 = vsel %vm256_vm1, %v1208_v30, 0.0  ;;  %v1298_v59 = vsel %vm271_vm2, %v1280_v2, 0.0  ;;  %v1275_v22 = vsel %vm1274_vm5, %v1268_v42, %v1273_v5 }
 0x135   : > { %v1229_v14 = vrot.slane %v1228_v37, 1  ;;  %v1218_v16 = vrot.slane %v1217_v11, 4  ;;  %v1112_v18 = vrot.slane %v1105_v56, %v4527_v39  ;;  %v1212_v6 = vadd.f32 %v1211_v9, %v1210_v63 }
 0x136   : > { %v1163_v4 = vcombine.low %v1143_v61, %v1150_v8  ;;  %v1299_v7 = vrot.slane %v1298_v59, 4  ;;  %v1279_v17 = vmul.f32 %v4791_v40, %v1275_v22  ;;  %v1350_v23 = vsel %vm1348_vm6, %v4860_v43, %v1346_v57 }
 0x137   : > { %v4877_v20 = vadd.f32 %v1229_v14, %v1228_v37  ;;  %v1219_v21 = vadd.f32 %v1218_v16, %v1217_v11  ;;  %v1114_v24 = vadd.f32 %v1112_v18, %v1086_v12  ;;  %v1213_v3 = vrot.slane %v1212_v6, 2 }
 0x138   : > { %v1170_v53 = vrot.slane %v1163_v4, %v4527_v39  ;;  %v1300_v25 = vadd.f32 %v1299_v7, %v1298_v59  ;;  %v1282_v13 = vcombine.high %v1279_v17, %v1279_v17  ;;  %v1284_v1 = vsel %vm256_vm1, %v1279_v17, 0.0  ;;  %v1492_v4 = vpop.permute.xlu1 %1491 }
 0x139   : > { %v1250_v27 = vrot.slane %v4877_v20, %v4527_v39  ;;  %v1220_v29 = vrot.slane %v1219_v21, 2  ;;  %vm1422_vm10 = vcmask 670720   ;;  %1115 = vst.msk [vmem:[#allocation2 + $0x1b] ss:$8 sm:$0x7] %vm4537_vm3, %v1114_v24  ;;  %v1214_v33 = vadd.f32 %v1213_v3, %v1212_v6 }
 0x13a   : > { %v1178_v32 = vcombine.low %v1170_v53, %v1177_v44  ;;  %v1301_v34 = vrot.slane %v1300_v25, 2  ;;  %v1285_v15 = vrot.slane %v1284_v1, 4  ;;  %v1291_v10 = vsel %vm256_vm1, %v1282_v13, 0.0  ;;  %v1232_v3 = vld [vmem:[#allocation2 + $0x1d] ss:$8 sm:$0x7] }
 0x13b   : > { %v1221_v36 = vadd.f32 %v1220_v29, %v1219_v21  ;;  %v1354_v60 = vmul.f32 %v4803_v54, %v1350_v23  ;;  %v1345_v31 = vrot.slane %v1342_v26, 4  ;;  %v1215_v41 = vrot.slane %v1214_v33, 1 }
 0x13c   : > { %v1185_v38 = vrot.slane %v1178_v32, %v4527_v39  ;;  %v1302_v42 = vadd.f32 %v1301_v34, %v1300_v25  ;;  %v1286_v43 = vadd.f32 %v1285_v15, %v1284_v1  ;;  %v1292_v46 = vrot.slane %v1291_v10, 4 }
 0x13d   : > { %v1222_v45 = vrot.slane %v1221_v36, 1  ;;  %v1372_v47 = vsel %vm271_vm2, %v1354_v60, 0.0  ;;  %v1347_v44 = vsel %vm256_vm1, %v1345_v31, %v1346_v57  ;;  %vm1496_vm11 = vcmask 662528  }
 0x13e   : > { %v1187_v28 = vadd.f32 %v1185_v38, %v1159_v19  ;;  %v1216_v35 = vadd.f32 %v1215_v41, %v1214_v33  ;;  %v1303_v50 = vrot.slane %v1302_v42, 1  ;;  %v1287_v52 = vrot.slane %v1286_v43, 2 }
 0x13f   : > { %v1223_v55 = vadd.f32 %v1222_v45, %v1221_v36  ;;  %v1293_v58 = vadd.f32 %v1292_v46, %v1291_v10  ;;  %v1373_v61 = vrot.slane %v1372_v47, 4  ;;  %v1349_v62 = vsel %vm1348_vm6, %v1342_v26, %v1347_v44 }
 0x140   : > { %1188 = vst.msk [vmem:[#allocation2 + $0x1c] ss:$8 sm:$0x7] %vm4537_vm3, %v1187_v28  ;;  %v1304_v30 = vadd.f32 %v1303_v50, %v1302_v42  ;;  %v1288_v37 = vadd.f32 %v1287_v52, %v1286_v43  ;;  %v1353_v63 = vmul.f32 %v4791_v40, %v1349_v62  ;;  %v1420_v57 = vrot.slane %v1418_v49, 4  ;;  %v1490_v28 = vpop.permute.xlu0 %1489 }
 0x141   : > { %v1236_v2 = vcombine.low %v1216_v35, %v1223_v55  ;;  %v1294_v5 = vrot.slane %v1293_v58, 2  ;;  %v1374_v56 = vadd.f32 %v1373_v61, %v1372_v47  ;;  %v1419_v8 = vrot.slane %v1416_v48, 4  ;;  %v1306_v55 = vld [vmem:[#allocation2 + $0x1e] ss:$8 sm:$0x7] }
 0x142   : > { %v1324_v9 = vrot.slane %v1304_v30, %v4527_v39  ;;  %v1289_v11 = vrot.slane %v1288_v37, 1  ;;  %v1356_v12 = vcombine.high %v1353_v63, %v1353_v63  ;;  %v1358_v14 = vsel %vm256_vm1, %v1353_v63, 0.0 }
 0x143   : > { %v1243_v16 = vrot.slane %v1236_v2, %v4527_v39  ;;  %v1295_v59 = vadd.f32 %v1294_v5, %v1293_v58  ;;  %v1375_v22 = vrot.slane %v1374_v56, 2  ;;  %v1359_v18 = vrot.slane %v1358_v14, 4 }
 0x144   : > { %v1290_v6 = vadd.f32 %v1289_v11, %v1288_v37  ;;  %v1365_v7 = vsel %vm256_vm1, %v1356_v12, 0.0  ;;  %v1424_v20 = vsel %vm1422_vm10, %v1418_v49, %v1420_v57  ;;  %v1421_v21 = vsel %vm256_vm1, %v1419_v8, %v1420_v57  ;;  %v1566_v12 = vpop.permute.xlu1 %1565 }
 0x145   : > { %v1251_v17 = vcombine.low %v1243_v16, %v1250_v27  ;;  %v1296_v23 = vrot.slane %v1295_v59, 1  ;;  %v1376_v24 = vadd.f32 %v1375_v22, %v1374_v56  ;;  %v1360_v53 = vadd.f32 %v1359_v18, %v1358_v14 }
 0x146   : > { %v1366_v25 = vrot.slane %v1365_v7, 4  ;;  %v1428_v26 = vmul.f32 %v4803_v54, %v1424_v20  ;;  %v1423_v29 = vsel %vm1422_vm10, %v1416_v48, %v1421_v21  ;;  %v1494_v13 = vrot.slane %v1492_v4, 4 }
 0x147   : > { %v1258_v1 = vrot.slane %v1251_v17, %v4527_v39  ;;  %v1297_v32 = vadd.f32 %v1296_v23, %v1295_v59  ;;  %v1377_v33 = vrot.slane %v1376_v24, 1  ;;  %v1361_v34 = vrot.slane %v1360_v53, 2 }
 0x148   : > { %v1367_v15 = vadd.f32 %v1366_v25, %v1365_v7  ;;  %v1446_v19 = vsel %vm271_vm2, %v1428_v26, 0.0  ;;  %v1427_v27 = vmul.f32 %v4791_v40, %v1423_v29  ;;  %v1498_v36 = vsel %vm1496_vm11, %v1492_v4, %v1494_v13 }
 0x149   : > { %v1260_v10 = vadd.f32 %v1258_v1, %v1232_v3  ;;  %v1310_v60 = vcombine.low %v1290_v6, %v1297_v32  ;;  %v1378_v31 = vadd.f32 %v1377_v33, %v1376_v24  ;;  %v1362_v38 = vadd.f32 %v1361_v34, %v1360_v53  ;;  %v1564_v6 = vpop.permute.xlu0 %1563 }
 0x14a   : > { %v1368_v41 = vrot.slane %v1367_v15, 2  ;;  %v1447_v42 = vrot.slane %v1446_v19, 4  ;;  %v1430_v43 = vcombine.high %v1427_v27, %v1427_v27  ;;  %v1432_v45 = vsel %vm256_vm1, %v1427_v27, 0.0 }
 0x14b   : > { %1261 = vst.msk [vmem:[#allocation2 + $0x1d] ss:$8 sm:$0x7] %vm4537_vm3, %v1260_v10  ;;  %v1317_v46 = vrot.slane %v1310_v60, %v4527_v39  ;;  %v1398_v47 = vrot.slane %v1378_v31, %v4527_v39  ;;  %v1363_v44 = vrot.slane %v1362_v38, 1  ;;  %v1433_v49 = vrot.slane %v1432_v45, 4 }
 0x14c   : > { %v1369_v35 = vadd.f32 %v1368_v41, %v1367_v15  ;;  %v1448_v50 = vadd.f32 %v1447_v42, %v1446_v19  ;;  %v1439_v52 = vsel %vm256_vm1, %v1430_v43, 0.0  ;;  %v1502_v48 = vmul.f32 %v4803_v54, %v1498_v36  ;;  %v1380_v10 = vld [vmem:[#allocation2 + $0x1f] ss:$8 sm:$0x7] }
 0x14d   : > { %v1325_v58 = vcombine.low %v1317_v46, %v1324_v9  ;;  %v1364_v61 = vadd.f32 %v1363_v44, %v1362_v38  ;;  %v1434_v62 = vadd.f32 %v1433_v49, %v1432_v45  ;;  %v1440_v30 = vrot.slane %v1439_v52, 4 }
 0x14e   : > { %v1370_v37 = vrot.slane %v1369_v35, 1  ;;  %v1449_v63 = vrot.slane %v1448_v50, 2  ;;  %v1520_v57 = vsel %vm271_vm2, %v1502_v48, 0.0  ;;  %v1493_v2 = vrot.slane %v1490_v28, 4 }
 0x14f   : > { %v1332_v5 = vrot.slane %v1325_v58, %v4527_v39  ;;  %v1435_v56 = vrot.slane %v1434_v62, 2  ;;  %v1441_v8 = vadd.f32 %v1440_v30, %v1439_v52  ;;  %v1521_v11 = vrot.slane %v1520_v57, 4 }
 0x150   : > { %v1371_v14 = vadd.f32 %v1370_v37, %v1369_v35  ;;  %v1450_v16 = vadd.f32 %v1449_v63, %v1448_v50  ;;  %v1495_v59 = vsel %vm256_vm1, %v1493_v2, %v1494_v13  ;;  %vm1570_vm12 = vcmask 654336   ;;  %v1640_v35 = vpop.permute.xlu1 %1639  ;;  %v1638_v50 = vpop.permute.xlu0 %1637 }
 0x151   : > { %v1334_v9 = vadd.f32 %v1332_v5, %v1306_v55  ;;  %v1436_v22 = vadd.f32 %v1435_v56, %v1434_v62  ;;  %v1442_v18 = vrot.slane %v1441_v8, 2  ;;  %v1522_v4 = vadd.f32 %v1521_v11, %v1520_v57  ;;  %v1454_v11 = vld [vmem:[#allocation2 + $0x30] ss:$8 sm:$0x7] }
 0x152   : > { %v1384_v7 = vcombine.low %v1364_v61, %v1371_v14  ;;  %v1451_v20 = vrot.slane %v1450_v16, 1  ;;  %v1497_v21 = vsel %vm1496_vm11, %v1490_v28, %v1495_v59  ;;  %v1568_v17 = vrot.slane %v1566_v12, 4 }
 0x153   : > { %1335 = vst.msk [vmem:[#allocation2 + $0x1e] ss:$8 sm:$0x7] %vm4537_vm3, %v1334_v9  ;;  %v1437_v23 = vrot.slane %v1436_v22, 1  ;;  %v1443_v24 = vadd.f32 %v1442_v18, %v1441_v8  ;;  %v1523_v53 = vrot.slane %v1522_v4, 2  ;;  %v1501_v3 = vmul.f32 %v4791_v40, %v1497_v21 }
 0x154   : > { %v1391_v25 = vrot.slane %v1384_v7, %v4527_v39  ;;  %v1452_v26 = vadd.f32 %v1451_v20, %v1450_v16  ;;  %v1572_v29 = vsel %vm1570_vm12, %v1566_v12, %v1568_v17  ;;  %v1567_v13 = vrot.slane %v1564_v6, 4 }
 0x155   : > { %v1438_v1 = vadd.f32 %v1437_v23, %v1436_v22  ;;  %v1444_v32 = vrot.slane %v1443_v24, 1  ;;  %v1524_v33 = vadd.f32 %v1523_v53, %v1522_v4  ;;  %v1504_v34 = vcombine.high %v1501_v3, %v1501_v3 }
 0x156   : > { %v1399_v15 = vcombine.low %v1391_v25, %v1398_v47  ;;  %v1472_v19 = vrot.slane %v1452_v26, %v4527_v39  ;;  %v1506_v27 = vsel %vm256_vm1, %v1501_v3, 0.0  ;;  %v1576_v36 = vmul.f32 %v4803_v54, %v1572_v29 }
 0x157   : > { %v1445_v60 = vadd.f32 %v1444_v32, %v1443_v24  ;;  %v1525_v31 = vrot.slane %v1524_v33, 1  ;;  %v1507_v38 = vrot.slane %v1506_v27, 4  ;;  %v1513_v41 = vsel %vm256_vm1, %v1504_v34, 0.0 }
 0x158   : > { %v1406_v42 = vrot.slane %v1399_v15, %v4527_v39  ;;  %v1514_v43 = vrot.slane %v1513_v41, 4  ;;  %v1594_v45 = vsel %vm271_vm2, %v1576_v36, 0.0  ;;  %v1569_v46 = vsel %vm256_vm1, %v1567_v13, %v1568_v17 }
 0x159   : > { %v1458_v47 = vcombine.low %v1438_v1, %v1445_v60  ;;  %v4932_v44 = vadd.f32 %v1525_v31, %v1524_v33  ;;  %v1508_v49 = vadd.f32 %v1507_v38, %v1506_v27  ;;  %v1595_v28 = vrot.slane %v1594_v45, 4  ;;  %v1714_v27 = vpop.permute.xlu1 %1713 }
 0x15a   : > { %v1408_v52 = vadd.f32 %v1406_v42, %v1380_v10  ;;  %v1515_v48 = vadd.f32 %v1514_v43, %v1513_v41  ;;  %v1571_v55 = vsel %vm1570_vm12, %v1564_v6, %v1569_v46  ;;  %vm1644_vm13 = vcmask 646144  }
 0x15b   : > { %v1465_v58 = vrot.slane %v1458_v47, %v4527_v39  ;;  %v1546_v61 = vrot.slane %v4932_v44, %v4527_v39  ;;  %v1509_v62 = vrot.slane %v1508_v49, 2  ;;  %v1596_v30 = vadd.f32 %v1595_v28, %v1594_v45  ;;  %v1712_v45 = vpop.permute.xlu0 %1711 }
 0x15c   : > { %1409 = vst.msk [vmem:[#allocation2 + $0x1f] ss:$8 sm:$0x7] %vm4537_vm3, %v1408_v52  ;;  %v1516_v37 = vrot.slane %v1515_v48, 2  ;;  %v1575_v63 = vmul.f32 %v4791_v40, %v1571_v55  ;;  %v1642_v57 = vrot.slane %v1640_v35, 4  ;;  %v1641_v2 = vrot.slane %v1638_v50, 4 }
 0x15d   : > { %v1473_v5 = vcombine.low %v1465_v58, %v1472_v19  ;;  %v1510_v56 = vadd.f32 %v1509_v62, %v1508_v49  ;;  %v1597_v8 = vrot.slane %v1596_v30, 2  ;;  %vm1718_vm14 = vcmask 637952  }
 0x15e   : > { %v1517_v12 = vadd.f32 %v1516_v37, %v1515_v48  ;;  %v1578_v14 = vcombine.high %v1575_v63, %v1575_v63  ;;  %v1580_v16 = vsel %vm256_vm1, %v1575_v63, 0.0  ;;  %v1646_v59 = vsel %vm1644_vm13, %v1640_v35, %v1642_v57 }
 0x15f   : > { %v1480_v9 = vrot.slane %v1473_v5, %v4527_v39  ;;  %v1511_v22 = vrot.slane %v1510_v56, 1  ;;  %v1598_v18 = vadd.f32 %v1597_v8, %v1596_v30  ;;  %v1581_v4 = vrot.slane %v1580_v16, 4  ;;  %v1528_v30 = vld [vmem:[#allocation2 + $0x31] ss:$8 sm:$0x7] }
 0x160   : > { %v1518_v6 = vrot.slane %v1517_v12, 1  ;;  %v1587_v7 = vsel %vm256_vm1, %v1578_v14, 0.0  ;;  %v1650_v20 = vmul.f32 %v4803_v54, %v1646_v59  ;;  %v1643_v21 = vsel %vm256_vm1, %v1641_v2, %v1642_v57 }
 0x161   : > { %v1482_v17 = vadd.f32 %v1480_v9, %v1454_v11  ;;  %v1512_v23 = vadd.f32 %v1511_v22, %v1510_v56  ;;  %v1599_v24 = vrot.slane %v1598_v18, 1  ;;  %v1582_v53 = vadd.f32 %v1581_v4, %v1580_v16 }
 0x162   : > { %v1519_v3 = vadd.f32 %v1518_v6, %v1517_v12  ;;  %v1588_v25 = vrot.slane %v1587_v7, 4  ;;  %v1668_v26 = vsel %vm271_vm2, %v1650_v20, 0.0  ;;  %v1645_v29 = vsel %vm1644_vm13, %v1638_v50, %v1643_v21  ;;  %v1788_v21 = vpop.permute.xlu1 %1787 }
 0x163   : > { %v3849_v13 = vld [vmem:[#allocation2 + $0x18] sm:$0xff]  ;;  %v3850_v1 = vld [vmem:[#allocation2 + $0x20] sm:$0xff]  ;;  %v3851_v32 = vld [vmem:[#allocation2 + $0x28] sm:$0xff]  ;;  %1483 = vst.msk [vmem:[#allocation2 + $0x30] ss:$8 sm:$0x7] %vm4537_vm3, %v1482_v17  ;;  %v4951_v33 = vadd.f32 %v1599_v24, %v1598_v18  ;;  %v1649_v19 = vmul.f32 %v4791_v40, %v1645_v29  ;;  %v1786_v29 = vpop.permute.xlu0 %1785 }
 0x164   : > { %v1583_v34 = vrot.slane %v1582_v53, 2  ;;  %v1669_v15 = vrot.slane %v1668_v26, 4  ;;  %v3870_v36 = vmul.f32 0.25, %v3849_v13  ;;  %v3871_v10 = vmul.f32 0.25, %v3850_v1 }
 0x165   : > { %v3872_v60 = vmul.f32 0.25, %v3851_v32  ;;  %v1532_v31 = vcombine.low %v1512_v23, %v1519_v3  ;;  %v1620_v38 = vrot.slane %v4951_v33, %v4527_v39  ;;  %v1589_v42 = vadd.f32 %v1588_v25, %v1587_v7 }
 0x166   : > { %v1584_v41 = vadd.f32 %v1583_v34, %v1582_v53  ;;  %v1670_v43 = vadd.f32 %v1669_v15, %v1668_v26  ;;  %3892 = vst [vmem:[%s4823_s15 + $0x18] sm:$0xff] %v3870_v36  ;;  %3893 = vst [vmem:[%s4823_s15 + $0x20] sm:$0xff] %v3871_v10  ;;  %v1652_v47 = vcombine.high %v1649_v19, %v1649_v19  ;;  %v1654_v44 = vsel %vm256_vm1, %v1649_v19, 0.0 }
 0x167   : > { %3894 = vst.msk [vmem:[%s4823_s15 + $0x28] sm:$0xff] %vm226_vm0, %v3872_v60  ;;  %v1539_v46 = vrot.slane %v1532_v31, %v4527_v39  ;;  %v1716_v49 = vrot.slane %v1714_v27, 4  ;;  %v1590_v35 = vrot.slane %v1589_v42, 2  ;;  %v1655_v52 = vrot.slane %v1654_v44, 4 }
 0x168   : > { %v1585_v28 = vrot.slane %v1584_v41, 1  ;;  %v1671_v50 = vrot.slane %v1670_v43, 2  ;;  %v1661_v55 = vsel %vm256_vm1, %v1652_v47, 0.0  ;;  %v1715_v62 = vrot.slane %v1712_v45, 4 }
 0x169   : > { %v1547_v48 = vcombine.low %v1539_v46, %v1546_v61  ;;  %v1720_v58 = vsel %vm1718_vm14, %v1714_v27, %v1716_v49  ;;  %v1591_v63 = vadd.f32 %v1590_v35, %v1589_v42  ;;  %v1656_v2 = vadd.f32 %v1655_v52, %v1654_v44  ;;  %v1602_v47 = vld [vmem:[#allocation2 + $0x32] ss:$8 sm:$0x7] }
 0x16a   : > { %v1586_v37 = vadd.f32 %v1585_v28, %v1584_v41  ;;  %v1672_v57 = vadd.f32 %v1671_v50, %v1670_v43  ;;  %v1662_v56 = vrot.slane %v1661_v55, 4  ;;  %v1724_v8 = vmul.f32 %v4803_v54, %v1720_v58 }
 0x16b   : > { %v1554_v5 = vrot.slane %v1547_v48, %v4527_v39  ;;  %v1717_v11 = vsel %vm256_vm1, %v1715_v62, %v1716_v49  ;;  %v1592_v12 = vrot.slane %v1591_v63, 1  ;;  %v1657_v61 = vrot.slane %v1656_v2, 2 }
 0x16c   : > { %v1673_v14 = vrot.slane %v1672_v57, 1  ;;  %v1719_v16 = vsel %vm1718_vm14, %v1712_v45, %v1717_v11  ;;  %v1663_v9 = vadd.f32 %v1662_v56, %v1661_v55  ;;  %v1742_v22 = vsel %vm271_vm2, %v1724_v8, 0.0  ;;  %v1862_v55 = vpop.permute.xlu1 %1861  ;;  %v1860_v11 = vpop.permute.xlu0 %1859 }
 0x16d   : > { %v1556_v59 = vadd.f32 %v1554_v5, %v1528_v30  ;;  %v1723_v18 = vmul.f32 %v4791_v40, %v1719_v16  ;;  %v1593_v4 = vadd.f32 %v1592_v12, %v1591_v63  ;;  %v1658_v7 = vadd.f32 %v1657_v61, %v1656_v2 }
 0x16e   : > { %v1674_v6 = vadd.f32 %v1673_v14, %v1672_v57  ;;  %v1743_v20 = vrot.slane %v1742_v22, 4  ;;  %v1664_v17 = vrot.slane %v1663_v9, 2  ;;  %vm1792_vm15 = vcmask 506880  }
 0x16f   : > { %1557 = vst.msk [vmem:[#allocation2 + $0x31] ss:$8 sm:$0x7] %vm4537_vm3, %v1556_v59  ;;  %v1726_v23 = vcombine.high %v1723_v18, %v1723_v18  ;;  %v1728_v24 = vsel %vm256_vm1, %v1723_v18, 0.0  ;;  %v1606_v53 = vcombine.low %v1586_v37, %v1593_v4  ;;  %v1659_v25 = vrot.slane %v1658_v7, 1 }
 0x170   : > { %v1694_v3 = vrot.slane %v1674_v6, %v4527_v39  ;;  %v1744_v26 = vadd.f32 %v1743_v20, %v1742_v22  ;;  %v1665_v13 = vadd.f32 %v1664_v17, %v1663_v9  ;;  %v1729_v1 = vrot.slane %v1728_v24, 4  ;;  %v1676_v4 = vld [vmem:[#allocation2 + $0x33] ss:$8 sm:$0x7] }
 0x171   : > { %v1735_v32 = vsel %vm256_vm1, %v1726_v23, 0.0  ;;  %v1790_v34 = vrot.slane %v1788_v21, 4  ;;  %v1613_v15 = vrot.slane %v1606_v53, %v4527_v39  ;;  %v1660_v19 = vadd.f32 %v1659_v25, %v1658_v7  ;;  %v1936_v25 = vpop.permute.xlu1 %1935 }
 0x172   : > { %v1745_v27 = vrot.slane %v1744_v26, 2  ;;  %v1736_v36 = vrot.slane %v1735_v32, 4  ;;  %v1666_v10 = vrot.slane %v1665_v13, 1  ;;  %v1730_v60 = vadd.f32 %v1729_v1, %v1728_v24 }
 0x173   : > { %v1794_v31 = vsel %vm1792_vm15, %v1788_v21, %v1790_v34  ;;  %v1789_v41 = vrot.slane %v1786_v29, 4  ;;  %v1621_v42 = vcombine.low %v1613_v15, %v1620_v38  ;;  %vm1866_vm4 = vcmask 498688   ;;  %v1934_v15 = vpop.permute.xlu0 %1933 }
 0x174   : > { %v1746_v43 = vadd.f32 %v1745_v27, %v1744_v26  ;;  %v1737_v45 = vadd.f32 %v1736_v36, %v1735_v32  ;;  %v1798_v46 = vmul.f32 %v4803_v54, %v1794_v31  ;;  %v1667_v44 = vadd.f32 %v1666_v10, %v1665_v13 }
 0x175   : > { %v1731_v49 = vrot.slane %v1730_v60, 2  ;;  %v1791_v28 = vsel %vm256_vm1, %v1789_v41, %v1790_v34  ;;  %v1628_v35 = vrot.slane %v1621_v42, %v4527_v39  ;;  %v1864_v8 = vrot.slane %v1862_v55, 4 }
 0x176   : > { %v1747_v50 = vrot.slane %v1746_v43, 1  ;;  %v1738_v52 = vrot.slane %v1737_v45, 2  ;;  %v1816_v48 = vsel %vm271_vm2, %v1798_v46, 0.0  ;;  %v1680_v58 = vcombine.low %v1660_v19, %v1667_v44  ;;  %v1750_v44 = vld [vmem:[#allocation2 + $0x34] ss:$8 sm:$0x7] }
 0x177   : > { %v1732_v33 = vadd.f32 %v1731_v49, %v1730_v60  ;;  %v1817_v38 = vrot.slane %v1816_v48, 4  ;;  %v1793_v62 = vsel %vm1792_vm15, %v1786_v29, %v1791_v28  ;;  %v1630_v30 = vadd.f32 %v1628_v35, %v1602_v47 }
 0x178   : > { %v1748_v37 = vadd.f32 %v1747_v50, %v1746_v43  ;;  %v1739_v63 = vadd.f32 %v1738_v52, %v1737_v45  ;;  %v1797_v57 = vmul.f32 %v4791_v40, %v1793_v62  ;;  %v1687_v2 = vrot.slane %v1680_v58, %v4527_v39 }
 0x179   : > { %v1733_v5 = vrot.slane %v1732_v33, 1  ;;  %v1818_v56 = vadd.f32 %v1817_v38, %v1816_v48  ;;  %1631 = vst.msk [vmem:[#allocation2 + $0x32] ss:$8 sm:$0x7] %vm4537_vm3, %v1630_v30  ;;  %v1868_v20 = vsel %vm1866_vm4, %v1862_v55, %v1864_v8  ;;  %v1863_v21 = vrot.slane %v1860_v11, 4  ;;  %v2010_v30 = vpop.permute.xlu1 %2009 }
 0x17a   : > { %v1768_v12 = vrot.slane %v1748_v37, %v4527_v39  ;;  %v1740_v14 = vrot.slane %v1739_v63, 1  ;;  %v1800_v61 = vcombine.high %v1797_v57, %v1797_v57  ;;  %v1802_v16 = vsel %vm256_vm1, %v1797_v57, 0.0 }
 0x17b   : > { %v1695_v59 = vcombine.low %v1687_v2, %v1694_v3  ;;  %v1734_v9 = vadd.f32 %v1733_v5, %v1732_v33  ;;  %v1819_v22 = vrot.slane %v1818_v56, 2  ;;  %v1803_v18 = vrot.slane %v1802_v16, 4 }
 0x17c   : > { %v1741_v6 = vadd.f32 %v1740_v14, %v1739_v63  ;;  %v1809_v7 = vsel %vm256_vm1, %v1800_v61, 0.0  ;;  %v1872_v29 = vmul.f32 %v4803_v54, %v1868_v20  ;;  %v1865_v3 = vsel %vm256_vm1, %v1863_v21, %v1864_v8 }
 0x17d   : > { %v1702_v17 = vrot.slane %v1695_v59, %v4527_v39  ;;  %v1820_v23 = vadd.f32 %v1819_v22, %v1818_v56  ;;  %v1804_v24 = vadd.f32 %v1803_v18, %v1802_v16  ;;  %v1810_v53 = vrot.slane %v1809_v7, 4 }
 0x17e   : > { %v1754_v26 = vcombine.low %v1734_v9, %v1741_v6  ;;  %vm1940_vm5 = vcmask 490496   ;;  %v1890_v27 = vsel %vm271_vm2, %v1872_v29, 0.0  ;;  %v1867_v36 = vsel %vm1866_vm4, %v1860_v11, %v1865_v3  ;;  %v5021_v29 = vld [vmem:[%s4455_s28 + $0x8] sm:$0xf] }
 0x17f   : > { %v1704_v13 = vadd.f32 %v1702_v17, %v1676_v4  ;;  %v1821_v1 = vrot.slane %v1820_v23, 1  ;;  %v1805_v32 = vrot.slane %v1804_v24, 2  ;;  %v1811_v34 = vadd.f32 %v1810_v53, %v1809_v7  ;;  %v5014_v4 = vld [vmem:[%s4455_s28] sm:$0xff] }
 0x180   : > { %v1761_v19 = vrot.slane %v1754_v26, %v4527_v39  ;;  %v1938_v10 = vrot.slane %v1936_v25, 4  ;;  %v1891_v42 = vrot.slane %v1890_v27, 4  ;;  %v1871_v45 = vmul.f32 %v4791_v40, %v1867_v36 }
 0x181   : > { %1705 = vst.msk [vmem:[#allocation2 + $0x33] ss:$8 sm:$0x7] %vm4537_vm3, %v1704_v13  ;;  %v1822_v60 = vadd.f32 %v1821_v1, %v1820_v23  ;;  %v1806_v31 = vadd.f32 %v1805_v32, %v1804_v24  ;;  %v1812_v41 = vrot.slane %v1811_v34, 2  ;;  %v1937_v47 = vrot.slane %v1934_v15, 4 }
 0x182   : > { %v1769_v43 = vcombine.low %v1761_v19, %v1768_v12  ;;  %v1942_v46 = vsel %vm1940_vm5, %v1936_v25, %v1938_v10  ;;  %v1892_v50 = vadd.f32 %v1891_v42, %v1890_v27  ;;  %v1874_v48 = vcombine.high %v1871_v45, %v1871_v45  ;;  %v2008_v12 = vpop.permute.xlu0 %2007 }
 0x183   : > { %v1842_v49 = vrot.slane %v1822_v60, %v4527_v39  ;;  %v1807_v28 = vrot.slane %v1806_v31, 1  ;;  %v1813_v35 = vadd.f32 %v1812_v41, %v1811_v34  ;;  %v1876_v55 = vsel %vm256_vm1, %v1871_v45, 0.0 }
 0x184   : > { %v1776_v52 = vrot.slane %v1769_v43, %v4527_v39  ;;  %v1946_v58 = vmul.f32 %v4803_v54, %v1942_v46  ;;  %v1893_v62 = vrot.slane %v1892_v50, 2  ;;  %v1877_v40 = vrot.slane %v1876_v55, 4 }
 0x185   : > { %v1808_v33 = vadd.f32 %v1807_v28, %v1806_v31  ;;  %v1814_v38 = vrot.slane %v1813_v35, 1  ;;  %v1883_v63 = vsel %vm256_vm1, %v1874_v48, 0.0  ;;  %v1939_v2 = vsel %vm256_vm1, %v1937_v47, %v1938_v10 }
 0x186   : > { %v1778_v37 = vadd.f32 %v1776_v52, %v1750_v44  ;;  %v1964_v57 = vsel %vm271_vm2, %v1946_v58, 0.0  ;;  %v1894_v56 = vadd.f32 %v1893_v62, %v1892_v50  ;;  %v1878_v8 = vadd.f32 %v1877_v40, %v1876_v55  ;;  %v2084_v44 = vpop.permute.xlu1 %2083 }
 0x187   : > { %v1815_v5 = vadd.f32 %v1814_v38, %v1813_v35  ;;  %v1884_v11 = vrot.slane %v1883_v63, 4  ;;  %v1965_v54 = vrot.slane %v1964_v57, 4  ;;  %v1941_v14 = vsel %vm1940_vm5, %v1934_v15, %v1939_v2  ;;  %v1824_v15 = vld [vmem:[#allocation2 + $0x35] ss:$8 sm:$0x7] }
 0x188   : > { %1779 = vst.msk [vmem:[#allocation2 + $0x34] ss:$8 sm:$0x7] %vm4537_vm3, %v1778_v37  ;;  %vm2014_vm6 = vcmask 482304   ;;  %v2012_v61 = vrot.slane %v2010_v30, 4  ;;  %v1895_v59 = vrot.slane %v1894_v56, 1  ;;  %v1945_v6 = vmul.f32 %v5014_v4, %v1941_v14 }
 0x189   : > { %v1828_v16 = vcombine.low %v1808_v33, %v1815_v5  ;;  %v1879_v9 = vrot.slane %v1878_v8, 2  ;;  %v1885_v22 = vadd.f32 %v1884_v11, %v1883_v63  ;;  %v1966_v18 = vadd.f32 %v1965_v54, %v1964_v57 }
 0x18a   : > { %v2016_v7 = vsel %vm2014_vm6, %v2010_v30, %v2012_v61  ;;  %v2011_v20 = vrot.slane %v2008_v12, 4  ;;  %v1896_v17 = vadd.f32 %v1895_v59, %v1894_v56  ;;  %v1948_v25 = vcombine.high %v1945_v6, %v1945_v6 }
 0x18b   : > { %v1835_v21 = vrot.slane %v1828_v16, %v4527_v39  ;;  %v1880_v23 = vadd.f32 %v1879_v9, %v1878_v8  ;;  %v1886_v24 = vrot.slane %v1885_v22, 2  ;;  %v1967_v53 = vrot.slane %v1966_v18, 2  ;;  %v2082_v8 = vpop.permute.xlu0 %2081 }
 0x18c   : > { %v1950_v26 = vsel %vm256_vm1, %v1945_v6, 0.0  ;;  %v2020_v3 = vmul.f32 %v5021_v29, %v2016_v7  ;;  %v1916_v1 = vrot.slane %v1896_v17, %v4527_v39  ;;  %v1957_v36 = vsel %vm256_vm1, %v1948_v25, 0.0 }
 0x18d   : > { %v1843_v13 = vcombine.low %v1835_v21, %v1842_v49  ;;  %v1881_v32 = vrot.slane %v1880_v23, 1  ;;  %v1887_v34 = vadd.f32 %v1886_v24, %v1885_v22  ;;  %v1968_v19 = vadd.f32 %v1967_v53, %v1966_v18  ;;  %v1898_v22 = vld [vmem:[#allocation2 + $0x36] ss:$8 sm:$0x7] }
 0x18e   : > { %v1951_v27 = vrot.slane %v1950_v26, 4  ;;  %v2038_v10 = vsel %vm271_vm2, %v2020_v3, 0.0  ;;  %v1958_v42 = vrot.slane %v1957_v36, 4  ;;  %v2013_v47 = vsel %vm256_vm1, %v2011_v20, %v2012_v61 }
 0x18f   : > { %v1850_v60 = vrot.slane %v1843_v13, %v4527_v39  ;;  %v1882_v31 = vadd.f32 %v1881_v32, %v1880_v23  ;;  %v1888_v41 = vrot.slane %v1887_v34, 1  ;;  %v1969_v43 = vrot.slane %v1968_v19, 1  ;;  %v2158_v13 = vpop.permute.xlu1 %2157 }
 0x190   : > { %v1952_v45 = vadd.f32 %v1951_v27, %v1950_v26  ;;  %v2039_v46 = vrot.slane %v2038_v10, 4  ;;  %v1959_v35 = vadd.f32 %v1958_v42, %v1957_v36  ;;  %v2015_v50 = vsel %vm2014_vm6, %v2008_v12, %v2013_v47 }
 0x191   : > { %v1852_v49 = vadd.f32 %v1850_v60, %v1824_v15  ;;  %v1889_v28 = vadd.f32 %v1888_v41, %v1887_v34  ;;  %v1970_v52 = vadd.f32 %v1969_v43, %v1968_v19  ;;  %v2019_v58 = vmul.f32 %v5014_v4, %v2015_v50  ;;  %v1972_v50 = vld [vmem:[#allocation2 + $0x37] ss:$8 sm:$0x7] }
 0x192   : > { %v1953_v48 = vrot.slane %v1952_v45, 2  ;;  %v2040_v55 = vadd.f32 %v2039_v46, %v2038_v10  ;;  %v1960_v38 = vrot.slane %v1959_v35, 2  ;;  %vm2088_vm10 = vcmask 474112  }
 0x193   : > { %1853 = vst.msk [vmem:[#allocation2 + $0x35] ss:$8 sm:$0x7] %vm4537_vm3, %v1852_v49  ;;  %v1902_v33 = vcombine.low %v1882_v31, %v1889_v28  ;;  %v2086_v62 = vrot.slane %v2084_v44, 4  ;;  %v1990_v40 = vrot.slane %v1970_v52, %v4527_v39  ;;  %v2022_v63 = vcombine.high %v2019_v58, %v2019_v58 }
 0x194   : > { %v1954_v30 = vadd.f32 %v1953_v48, %v1952_v45  ;;  %v2041_v37 = vrot.slane %v2040_v55, 2  ;;  %v1961_v2 = vadd.f32 %v1960_v38, %v1959_v35  ;;  %v2024_v5 = vsel %vm256_vm1, %v2019_v58, 0.0  ;;  %v2156_v35 = vpop.permute.xlu0 %2155 }
 0x195   : > { %v1909_v57 = vrot.slane %v1902_v33, %v4527_v39  ;;  %v2090_v56 = vsel %vm2088_vm10, %v2084_v44, %v2086_v62  ;;  %v2025_v54 = vrot.slane %v2024_v5, 4  ;;  %v2031_v14 = vsel %vm256_vm1, %v2022_v63, 0.0 }
 0x196   : > { %v1955_v11 = vrot.slane %v1954_v30, 1  ;;  %v2042_v12 = vadd.f32 %v2041_v37, %v2040_v55  ;;  %v1962_v16 = vrot.slane %v1961_v2, 1  ;;  %v2032_v59 = vrot.slane %v2031_v14, 4  ;;  %v2232_v37 = vpop.permute.xlu1 %2231 }
 0x197   : > { %v1917_v61 = vcombine.low %v1909_v57, %v1916_v1  ;;  %v2094_v9 = vmul.f32 %v5021_v29, %v2090_v56  ;;  %v2026_v7 = vadd.f32 %v2025_v54, %v2024_v5  ;;  %v2085_v20 = vrot.slane %v2082_v8, 4 }
 0x198   : > { %v1956_v18 = vadd.f32 %v1955_v11, %v1954_v30  ;;  %v2043_v6 = vrot.slane %v2042_v12, 1  ;;  %v1963_v17 = vadd.f32 %v1962_v16, %v1961_v2  ;;  %v2033_v23 = vadd.f32 %v2032_v59, %v2031_v14 }
 0x199   : > { %v1924_v21 = vrot.slane %v1917_v61, %v4527_v39  ;;  %v2112_v24 = vsel %vm271_vm2, %v2094_v9, 0.0  ;;  %v2027_v25 = vrot.slane %v2026_v7, 2  ;;  %v2087_v3 = vsel %vm256_vm1, %v2085_v20, %v2086_v62 }
 0x19a   : > { %v2044_v53 = vadd.f32 %v2043_v6, %v2042_v12  ;;  %v2113_v26 = vrot.slane %v2112_v24, 4  ;;  %v1976_v32 = vcombine.low %v1956_v18, %v1963_v17  ;;  %v2034_v34 = vrot.slane %v2033_v23, 2 }
 0x19b   : > { %v1926_v1 = vadd.f32 %v1924_v21, %v1898_v22  ;;  %v2089_v15 = vsel %vm2088_vm10, %v2082_v8, %v2087_v3  ;;  %v2028_v27 = vadd.f32 %v2027_v25, %v2026_v7  ;;  %vm2162_vm11 = vcmask 465920   ;;  %v2230_v22 = vpop.permute.xlu0 %2229 }
 0x19c   : > { %v2064_v19 = vrot.slane %v2044_v53, %v4527_v39  ;;  %v2114_v36 = vadd.f32 %v2113_v26, %v2112_v24  ;;  %v2093_v10 = vmul.f32 %v5014_v4, %v2089_v15  ;;  %v1983_v60 = vrot.slane %v1976_v32, %v4527_v39  ;;  %v2046_v53 = vld [vmem:[#allocation2 + $0x48] ss:$8 sm:$0x7] }
 0x19d   : > { %1927 = vst.msk [vmem:[#allocation2 + $0x36] ss:$8 sm:$0x7] %vm4537_vm3, %v1926_v1  ;;  %v2035_v31 = vadd.f32 %v2034_v34, %v2033_v23  ;;  %v2160_v41 = vrot.slane %v2158_v13, 4  ;;  %v2029_v42 = vrot.slane %v2028_v27, 1  ;;  %v2159_v57 = vrot.slane %v2156_v35, 4 }
 0x19e   : > { %v2115_v43 = vrot.slane %v2114_v36, 2  ;;  %v2096_v45 = vcombine.high %v2093_v10, %v2093_v10  ;;  %v2098_v46 = vsel %vm256_vm1, %v2093_v10, 0.0  ;;  %v1991_v47 = vcombine.low %v1983_v60, %v1990_v40 }
 0x19f   : > { %v2036_v44 = vrot.slane %v2035_v31, 1  ;;  %v2099_v49 = vrot.slane %v2098_v46, 4  ;;  %v2164_v28 = vsel %vm2162_vm11, %v2158_v13, %v2160_v41  ;;  %v2030_v52 = vadd.f32 %v2029_v42, %v2028_v27 }
 0x1a0   : > { %v2116_v48 = vadd.f32 %v2115_v43, %v2114_v36  ;;  %v2105_v55 = vsel %vm256_vm1, %v2096_v45, 0.0  ;;  %v2168_v58 = vmul.f32 %v5021_v29, %v2164_v28  ;;  %v1998_v33 = vrot.slane %v1991_v47, %v4527_v39  ;;  %v2306_v28 = vpop.permute.xlu1 %2305 }
 0x1a1   : > { %v2037_v38 = vadd.f32 %v2036_v44, %v2035_v31  ;;  %v2100_v62 = vadd.f32 %v2099_v49, %v2098_v46  ;;  %v2106_v30 = vrot.slane %v2105_v55, 4  ;;  %vm2236_vm12 = vcmask 457728  }
 0x1a2   : > { %v2117_v63 = vrot.slane %v2116_v48, 1  ;;  %v2186_v40 = vsel %vm271_vm2, %v2168_v58, 0.0  ;;  %v2000_v2 = vadd.f32 %v1998_v33, %v1972_v50  ;;  %v2161_v54 = vsel %vm256_vm1, %v2159_v57, %v2160_v41 }
 0x1a3   : > { %v2050_v5 = vcombine.low %v2030_v52, %v2037_v38  ;;  %v2101_v56 = vrot.slane %v2100_v62, 2  ;;  %v2107_v8 = vadd.f32 %v2106_v30, %v2105_v55  ;;  %v2187_v12 = vrot.slane %v2186_v40, 4 }
 0x1a4   : > { %v5054_v11 = vadd.f32 %v2117_v63, %v2116_v48  ;;  %v2234_v14 = vrot.slane %v2232_v37, 4  ;;  %2001 = vst.msk [vmem:[#allocation2 + $0x37] ss:$8 sm:$0x7] %vm4537_vm3, %v2000_v2  ;;  %v2163_v9 = vsel %vm2162_vm11, %v2156_v35, %v2161_v54  ;;  %v2233_v13 = vrot.slane %v2230_v22, 4  ;;  %v2304_v35 = vpop.permute.xlu0 %2303 }
 0x1a5   : > { %v2057_v61 = vrot.slane %v2050_v5, %v4527_v39  ;;  %v2102_v16 = vadd.f32 %v2101_v56, %v2100_v62  ;;  %v2108_v59 = vrot.slane %v2107_v8, 2  ;;  %v2188_v6 = vadd.f32 %v2187_v12, %v2186_v40 }
 0x1a6   : > { %v2138_v18 = vrot.slane %v5054_v11, %v4527_v39  ;;  %v2167_v7 = vmul.f32 %v5014_v4, %v2163_v9  ;;  %v2238_v20 = vsel %vm2236_vm12, %v2232_v37, %v2234_v14  ;;  %v2235_v10 = vsel %vm256_vm1, %v2233_v13, %v2234_v14  ;;  %v2120_v14 = vld [vmem:[#allocation2 + $0x49] ss:$8 sm:$0x7] }
 0x1a7   : > { %v2065_v21 = vcombine.low %v2057_v61, %v2064_v19  ;;  %v2103_v17 = vrot.slane %v2102_v16, 1  ;;  %v2109_v23 = vadd.f32 %v2108_v59, %v2107_v8  ;;  %v2242_v24 = vmul.f32 %v5021_v29, %v2238_v20 }
 0x1a8   : > { %v2189_v25 = vrot.slane %v2188_v6, 2  ;;  %v2170_v26 = vcombine.high %v2167_v7, %v2167_v7  ;;  %v2172_v3 = vsel %vm256_vm1, %v2167_v7, 0.0  ;;  %v2237_v49 = vsel %vm2236_vm12, %v2230_v22, %v2235_v10 }
 0x1a9   : > { %v2072_v1 = vrot.slane %v2065_v21, %v4527_v39  ;;  %v2104_v32 = vadd.f32 %v2103_v17, %v2102_v16  ;;  %v2110_v34 = vrot.slane %v2109_v23, 1  ;;  %v2173_v15 = vrot.slane %v2172_v3, 4 }
 0x1aa   : > { %v2190_v27 = vadd.f32 %v2189_v25, %v2188_v6  ;;  %v2179_v36 = vsel %vm256_vm1, %v2170_v26, 0.0  ;;  %v2260_v19 = vsel %vm271_vm2, %v2242_v24, 0.0  ;;  %vm2310_vm13 = vcmask 326656   ;;  %v2380_v24 = vpop.permute.xlu1 %2379 }
 0x1ab   : > { %v2074_v60 = vadd.f32 %v2072_v1, %v2046_v53  ;;  %v2111_v31 = vadd.f32 %v2110_v34, %v2109_v23  ;;  %v2174_v41 = vadd.f32 %v2173_v15, %v2172_v3  ;;  %v2180_v42 = vrot.slane %v2179_v36, 4  ;;  %v3852_v43 = vld [vmem:[#allocation2 + $0x30] sm:$0xff]  ;;  %v3853_v45 = vld [vmem:[#allocation2 + $0x38] sm:$0xff]  ;;  %v3854_v46 = vld [vmem:[#allocation2 + $0x40] sm:$0xff] }
 0x1ac   : > { %v2191_v47 = vrot.slane %v2190_v27, 1  ;;  %v2261_v44 = vrot.slane %v2260_v19, 4  ;;  %v3873_v50 = vmul.f32 0.25, %v3852_v43  ;;  %v3874_v52 = vmul.f32 0.25, %v3853_v45 }
 0x1ad   : > { %v3875_v48 = vmul.f32 0.25, %v3854_v46  ;;  %2075 = vst.msk [vmem:[#allocation2 + $0x48] ss:$8 sm:$0x7] %vm4537_vm3, %v2074_v60  ;;  %v2124_v55 = vcombine.low %v2104_v32, %v2111_v31  ;;  %v2175_v33 = vrot.slane %v2174_v41, 2  ;;  %v2181_v38 = vadd.f32 %v2180_v42, %v2179_v36 }
 0x1ae   : > { %v5074_v58 = vadd.f32 %v2191_v47, %v2190_v27  ;;  %v2262_v62 = vadd.f32 %v2261_v44, %v2260_v19  ;;  %3895 = vst [vmem:[%s4823_s15 + $0x30] sm:$0xff] %v3873_v50  ;;  %3896 = vst [vmem:[%s4823_s15 + $0x38] sm:$0xff] %v3874_v52  ;;  %v2241_v37 = vmul.f32 %v5014_v4, %v2237_v49  ;;  %v2308_v63 = vrot.slane %v2306_v28, 4 }
 0x1af   : > { %3897 = vst.msk [vmem:[%s4823_s15 + $0x40] sm:$0xff] %vm226_vm0, %v3875_v48  ;;  %v2131_v30 = vrot.slane %v2124_v55, %v4527_v39  ;;  %v2307_v40 = vrot.slane %v2304_v35, 4  ;;  %v2176_v2 = vadd.f32 %v2175_v33, %v2174_v41  ;;  %v2182_v5 = vrot.slane %v2181_v38, 2  ;;  %v2378_v41 = vpop.permute.xlu0 %2377 }
 0x1b0   : > { %v2212_v57 = vrot.slane %v5074_v58, %v4527_v39  ;;  %v2263_v56 = vrot.slane %v2262_v62, 2  ;;  %v2244_v11 = vcombine.high %v2241_v37, %v2241_v37  ;;  %v2246_v12 = vsel %vm256_vm1, %v2241_v37, 0.0 }
 0x1b1   : > { %v2139_v8 = vcombine.low %v2131_v30, %v2138_v18  ;;  %v2312_v54 = vsel %vm2310_vm13, %v2306_v28, %v2308_v63  ;;  %v2177_v61 = vrot.slane %v2176_v2, 1  ;;  %v2183_v16 = vadd.f32 %v2182_v5, %v2181_v38 }
 0x1b2   : > { %v2264_v59 = vadd.f32 %v2263_v56, %v2262_v62  ;;  %v2247_v9 = vrot.slane %v2246_v12, 4  ;;  %v2253_v6 = vsel %vm256_vm1, %v2244_v11, 0.0  ;;  %v2316_v7 = vmul.f32 %v5021_v29, %v2312_v54  ;;  %v2194_v62 = vld [vmem:[#allocation2 + $0x4a] ss:$8 sm:$0x7]  ;;  %v2454_v11 = vpop.permute.xlu1 %2453 }
 0x1b3   : > { %v2146_v22 = vrot.slane %v2139_v8, %v4527_v39  ;;  %v2309_v20 = vsel %vm256_vm1, %v2307_v40, %v2308_v63  ;;  %v2178_v21 = vadd.f32 %v2177_v61, %v2176_v2  ;;  %v2184_v18 = vrot.slane %v2183_v16, 1 }
 0x1b4   : > { %v2265_v17 = vrot.slane %v2264_v59, 1  ;;  %v2248_v23 = vadd.f32 %v2247_v9, %v2246_v12  ;;  %v2254_v25 = vrot.slane %v2253_v6, 4  ;;  %v2334_v26 = vsel %vm271_vm2, %v2316_v7, 0.0 }
 0x1b5   : > { %v2148_v53 = vadd.f32 %v2146_v22, %v2120_v14  ;;  %v2311_v3 = vsel %vm2310_vm13, %v2304_v35, %v2309_v20  ;;  %v2185_v13 = vadd.f32 %v2184_v18, %v2183_v16  ;;  %v2335_v34 = vrot.slane %v2334_v26, 4  ;;  %v2452_v14 = vpop.permute.xlu0 %2451 }
 0x1b6   : > { %v5092_v1 = vadd.f32 %v2265_v17, %v2264_v59  ;;  %v2249_v32 = vrot.slane %v2248_v23, 2  ;;  %v2255_v15 = vadd.f32 %v2254_v25, %v2253_v6  ;;  %v2315_v27 = vmul.f32 %v5014_v4, %v2311_v3 }
 0x1b7   : > { %2149 = vst.msk [vmem:[#allocation2 + $0x49] ss:$8 sm:$0x7] %vm4537_vm3, %v2148_v53  ;;  %vm2384_vm14 = vcmask 318464   ;;  %v2382_v36 = vrot.slane %v2380_v24, 4  ;;  %v2198_v19 = vcombine.low %v2178_v21, %v2185_v13  ;;  %v2336_v31 = vadd.f32 %v2335_v34, %v2334_v26 }
 0x1b8   : > { %v2286_v10 = vrot.slane %v5092_v1, %v4527_v39  ;;  %v2250_v60 = vadd.f32 %v2249_v32, %v2248_v23  ;;  %v2256_v42 = vrot.slane %v2255_v15, 2  ;;  %v2318_v43 = vcombine.high %v2315_v27, %v2315_v27 }
 0x1b9   : > { %v2320_v45 = vsel %vm256_vm1, %v2315_v27, 0.0  ;;  %v2386_v46 = vsel %vm2384_vm14, %v2380_v24, %v2382_v36  ;;  %v2205_v47 = vrot.slane %v2198_v19, %v4527_v39  ;;  %v2337_v49 = vrot.slane %v2336_v31, 2  ;;  %v2268_v19 = vld [vmem:[#allocation2 + $0x4b] ss:$8 sm:$0x7] }
 0x1ba   : > { %v2251_v44 = vrot.slane %v2250_v60, 1  ;;  %v2321_v28 = vrot.slane %v2320_v45, 4  ;;  %v2257_v35 = vadd.f32 %v2256_v42, %v2255_v15  ;;  %v2327_v50 = vsel %vm256_vm1, %v2318_v43, 0.0 }
 0x1bb   : > { %v2390_v52 = vmul.f32 %v5021_v29, %v2386_v46  ;;  %v2381_v48 = vrot.slane %v2378_v41, 4  ;;  %v2213_v55 = vcombine.low %v2205_v47, %v2212_v57  ;;  %v2338_v33 = vadd.f32 %v2337_v49, %v2336_v31 }
 0x1bc   : > { %v2252_v58 = vadd.f32 %v2251_v44, %v2250_v60  ;;  %v2322_v38 = vadd.f32 %v2321_v28, %v2320_v45  ;;  %v2258_v30 = vrot.slane %v2257_v35, 1  ;;  %v2328_v37 = vrot.slane %v2327_v50, 4 }
 0x1bd   : > { %v2408_v63 = vsel %vm271_vm2, %v2390_v52, 0.0  ;;  %v2383_v40 = vsel %vm256_vm1, %v2381_v48, %v2382_v36  ;;  %v2220_v2 = vrot.slane %v2213_v55, %v4527_v39  ;;  %v2339_v5 = vrot.slane %v2338_v33, 1 }
 0x1be   : > { %v2323_v56 = vrot.slane %v2322_v38, 2  ;;  %v2409_v8 = vrot.slane %v2408_v63, 4  ;;  %v2259_v12 = vadd.f32 %v2258_v30, %v2257_v35  ;;  %v2329_v54 = vadd.f32 %v2328_v37, %v2327_v50  ;;  %v2528_v35 = vpop.permute.xlu1 %2527 }
 0x1bf   : > { %v2385_v57 = vsel %vm2384_vm14, %v2378_v41, %v2383_v40  ;;  %vm2458_vm15 = vcmask 310272   ;;  %v2222_v61 = vadd.f32 %v2220_v2, %v2194_v62  ;;  %v2340_v16 = vadd.f32 %v2339_v5, %v2338_v33  ;;  %v2526_v62 = vpop.permute.xlu0 %2525 }
 0x1c0   : > { %v2324_v59 = vadd.f32 %v2323_v56, %v2322_v38  ;;  %v2410_v9 = vadd.f32 %v2409_v8, %v2408_v63  ;;  %v2272_v22 = vcombine.low %v2252_v58, %v2259_v12  ;;  %v2330_v6 = vrot.slane %v2329_v54, 2 }
 0x1c1   : > { %v2389_v7 = vmul.f32 %v5014_v4, %v2385_v57  ;;  %v2456_v20 = vrot.slane %v2454_v11, 4  ;;  %2223 = vst.msk [vmem:[#allocation2 + $0x4a] ss:$8 sm:$0x7] %vm4537_vm3, %v2222_v61  ;;  %v2360_v21 = vrot.slane %v2340_v16, %v4527_v39  ;;  %v2455_v23 = vrot.slane %v2452_v14, 4 }
 0x1c2   : > { %v2325_v18 = vrot.slane %v2324_v59, 1  ;;  %v2411_v17 = vrot.slane %v2410_v9, 2  ;;  %v2279_v24 = vrot.slane %v2272_v22, %v4527_v39  ;;  %v2331_v53 = vadd.f32 %v2330_v6, %v2329_v54 }
 0x1c3   : > { %v2392_v25 = vcombine.high %v2389_v7, %v2389_v7  ;;  %v2394_v26 = vsel %vm256_vm1, %v2389_v7, 0.0  ;;  %v2460_v32 = vsel %vm2458_vm15, %v2454_v11, %v2456_v20  ;;  %v2457_v42 = vsel %vm256_vm1, %v2455_v23, %v2456_v20 }
 0x1c4   : > { %v2326_v3 = vadd.f32 %v2325_v18, %v2324_v59  ;;  %v2412_v13 = vadd.f32 %v2411_v17, %v2410_v9  ;;  %v2395_v1 = vrot.slane %v2394_v26, 4  ;;  %v2287_v34 = vcombine.low %v2279_v24, %v2286_v10 }
 0x1c5   : > { %v2332_v15 = vrot.slane %v2331_v53, 1  ;;  %v2401_v27 = vsel %vm256_vm1, %v2392_v25, 0.0  ;;  %v2464_v36 = vmul.f32 %v5021_v29, %v2460_v32  ;;  %v2459_v47 = vsel %vm2458_vm15, %v2452_v14, %v2457_v42  ;;  %v2342_v14 = vld [vmem:[#allocation2 + $0x4c] ss:$8 sm:$0x7]  ;;  %v2600_v42 = vpop.permute.xlu0 %2599 }
 0x1c6   : > { %v2413_v60 = vrot.slane %v2412_v13, 1  ;;  %v2396_v31 = vadd.f32 %v2395_v1, %v2394_v26  ;;  %v2402_v41 = vrot.slane %v2401_v27, 4  ;;  %v2294_v43 = vrot.slane %v2287_v34, %v4527_v39  ;;  %v2602_v34 = vpop.permute.xlu1 %2601 }
 0x1c7   : > { %v2333_v45 = vadd.f32 %v2332_v15, %v2331_v53  ;;  %v2482_v46 = vsel %vm271_vm2, %v2464_v36, 0.0  ;;  %v2463_v48 = vmul.f32 %v5014_v4, %v2459_v47  ;;  %vm2532_vm4 = vcmask 302080  }
 0x1c8   : > { %v5121_v44 = vadd.f32 %v2413_v60, %v2412_v13  ;;  %v2397_v10 = vrot.slane %v2396_v31, 2  ;;  %v2403_v49 = vadd.f32 %v2402_v41, %v2401_v27  ;;  %v2483_v28 = vrot.slane %v2482_v46, 4 }
 0x1c9   : > { %v2296_v50 = vadd.f32 %v2294_v43, %v2268_v19  ;;  %v2346_v52 = vcombine.low %v2326_v3, %v2333_v45  ;;  %v2466_v37 = vcombine.high %v2463_v48, %v2463_v48  ;;  %v2468_v63 = vsel %vm256_vm1, %v2463_v48, 0.0 }
 0x1ca   : > { %v2434_v55 = vrot.slane %v5121_v44, %v4527_v39  ;;  %v2398_v58 = vadd.f32 %v2397_v10, %v2396_v31  ;;  %v2404_v33 = vrot.slane %v2403_v49, 2  ;;  %v2484_v38 = vadd.f32 %v2483_v28, %v2482_v46 }
 0x1cb   : > { %2297 = vst.msk [vmem:[#allocation2 + $0x4b] ss:$8 sm:$0x7] %vm4537_vm3, %v2296_v50  ;;  %v2353_v30 = vrot.slane %v2346_v52, %v4527_v39  ;;  %v2530_v40 = vrot.slane %v2528_v35, 4  ;;  %v2469_v8 = vrot.slane %v2468_v63, 4  ;;  %v2475_v12 = vsel %vm256_vm1, %v2466_v37, 0.0 }
 0x1cc   : > { %v2399_v2 = vrot.slane %v2398_v58, 1  ;;  %v2405_v5 = vadd.f32 %v2404_v33, %v2403_v49  ;;  %v2485_v56 = vrot.slane %v2484_v38, 2  ;;  %v2529_v57 = vrot.slane %v2526_v62, 4 }
 0x1cd   : > { %v2361_v11 = vcombine.low %v2353_v30, %v2360_v21  ;;  %v2534_v54 = vsel %vm2532_vm4, %v2528_v35, %v2530_v40  ;;  %v2470_v9 = vadd.f32 %v2469_v8, %v2468_v63  ;;  %v2476_v6 = vrot.slane %v2475_v12, 4  ;;  %v2416_v35 = vld [vmem:[#allocation2 + $0x4d] ss:$8 sm:$0x7] }
 0x1ce   : > { %v2400_v61 = vadd.f32 %v2399_v2, %v2398_v58  ;;  %v2406_v16 = vrot.slane %v2405_v5, 1  ;;  %v2486_v59 = vadd.f32 %v2485_v56, %v2484_v38  ;;  %v2538_v7 = vmul.f32 %v5021_v29, %v2534_v54 }
 0x1cf   : > { %v2368_v22 = vrot.slane %v2361_v11, %v4527_v39  ;;  %v2531_v20 = vsel %vm256_vm1, %v2529_v57, %v2530_v40  ;;  %v2471_v21 = vrot.slane %v2470_v9, 2  ;;  %v2477_v53 = vadd.f32 %v2476_v6, %v2475_v12  ;;  %v2674_v11 = vpop.permute.xlu0 %2673 }
 0x1d0   : > { %v2407_v18 = vadd.f32 %v2406_v16, %v2405_v5  ;;  %v2487_v17 = vrot.slane %v2486_v59, 1  ;;  %v2533_v23 = vsel %vm2532_vm4, %v2526_v62, %v2531_v20  ;;  %v2556_v25 = vsel %vm271_vm2, %v2538_v7, 0.0 }
 0x1d1   : > { %v2370_v24 = vadd.f32 %v2368_v22, %v2342_v14  ;;  %v2537_v26 = vmul.f32 %v5014_v4, %v2533_v23  ;;  %v2472_v1 = vadd.f32 %v2471_v21, %v2470_v9  ;;  %v2557_v32 = vrot.slane %v2556_v25, 4 }
 0x1d2   : > { %v2420_v3 = vcombine.low %v2400_v61, %v2407_v18  ;;  %v2488_v13 = vadd.f32 %v2487_v17, %v2486_v59  ;;  %v2478_v15 = vrot.slane %v2477_v53, 2  ;;  %vm2606_vm5 = vcmask 293888  }
 0x1d3   : > { %2371 = vst.msk [vmem:[#allocation2 + $0x4c] ss:$8 sm:$0x7] %vm4537_vm3, %v2370_v24  ;;  %v2540_v27 = vcombine.high %v2537_v26, %v2537_v26  ;;  %v2542_v36 = vsel %vm256_vm1, %v2537_v26, 0.0  ;;  %v2473_v31 = vrot.slane %v2472_v1, 1  ;;  %v2558_v41 = vadd.f32 %v2557_v32, %v2556_v25 }
 0x1d4   : > { %v2427_v19 = vrot.slane %v2420_v3, %v4527_v39  ;;  %v2508_v60 = vrot.slane %v2488_v13, %v4527_v39  ;;  %v2479_v43 = vadd.f32 %v2478_v15, %v2477_v53  ;;  %v2543_v45 = vrot.slane %v2542_v36, 4  ;;  %v2490_v3 = vld [vmem:[#allocation2 + $0x4e] ss:$8 sm:$0x7] }
 0x1d5   : > { %v2549_v46 = vsel %vm256_vm1, %v2540_v27, 0.0  ;;  %v2604_v47 = vrot.slane %v2602_v34, 4  ;;  %v2474_v10 = vadd.f32 %v2473_v31, %v2472_v1  ;;  %v2559_v49 = vrot.slane %v2558_v41, 2 }
 0x1d6   : > { %v2435_v44 = vcombine.low %v2427_v19, %v2434_v55  ;;  %v2550_v28 = vrot.slane %v2549_v46, 4  ;;  %v2480_v50 = vrot.slane %v2479_v43, 1  ;;  %v2544_v52 = vadd.f32 %v2543_v45, %v2542_v36  ;;  %v2676_v55 = vpop.permute.xlu1 %2675 }
 0x1d7   : > { %v2608_v48 = vsel %vm2606_vm5, %v2602_v34, %v2604_v47  ;;  %v2603_v58 = vrot.slane %v2600_v42, 4  ;;  %v2560_v38 = vadd.f32 %v2559_v49, %v2558_v41  ;;  %vm2680_vm6 = vcmask 285696  }
 0x1d8   : > { %v2442_v33 = vrot.slane %v2435_v44, %v4527_v39  ;;  %v2551_v62 = vadd.f32 %v2550_v28, %v2549_v46  ;;  %v2612_v30 = vmul.f32 %v5021_v29, %v2608_v48  ;;  %v2481_v37 = vadd.f32 %v2480_v50, %v2479_v43 }
 0x1d9   : > { %v2545_v63 = vrot.slane %v2544_v52, 2  ;;  %v2605_v40 = vsel %vm256_vm1, %v2603_v58, %v2604_v47  ;;  %v2561_v5 = vrot.slane %v2560_v38, 1  ;;  %v2678_v9 = vrot.slane %v2676_v55, 4  ;;  %v2748_v58 = vpop.permute.xlu0 %2747 }
 0x1da   : > { %v2444_v2 = vadd.f32 %v2442_v33, %v2416_v35  ;;  %v2552_v56 = vrot.slane %v2551_v62, 2  ;;  %v2630_v8 = vsel %vm271_vm2, %v2612_v30, 0.0  ;;  %v2494_v12 = vcombine.low %v2474_v10, %v2481_v37  ;;  %v2750_v31 = vpop.permute.xlu1 %2749  ;;  %v2564_v37 = vld [vmem:[#allocation2 + $0x4f] ss:$8 sm:$0x7] }
 0x1db   : > { %v2546_v54 = vadd.f32 %v2545_v63, %v2544_v52  ;;  %v2631_v57 = vrot.slane %v2630_v8, 4  ;;  %v2607_v14 = vsel %vm2606_vm5, %v2600_v42, %v2605_v40  ;;  %v2562_v61 = vadd.f32 %v2561_v5, %v2560_v38 }
 0x1dc   : > { %2445 = vst.msk [vmem:[#allocation2 + $0x4d] ss:$8 sm:$0x7] %vm4537_vm3, %v2444_v2  ;;  %v2553_v16 = vadd.f32 %v2552_v56, %v2551_v62  ;;  %v2611_v59 = vmul.f32 %v5014_v4, %v2607_v14  ;;  %v2501_v22 = vrot.slane %v2494_v12, %v4527_v39  ;;  %v2677_v20 = vrot.slane %v2674_v11, 4 }
 0x1dd   : > { %v2547_v6 = vrot.slane %v2546_v54, 1  ;;  %v2632_v7 = vadd.f32 %v2631_v57, %v2630_v8  ;;  %v2582_v18 = vrot.slane %v2562_v61, %v4527_v39  ;;  %v2682_v32 = vsel %vm2680_vm6, %v2676_v55, %v2678_v9 }
 0x1de   : > { %v2554_v17 = vrot.slane %v2553_v16, 1  ;;  %v2614_v21 = vcombine.high %v2611_v59, %v2611_v59  ;;  %v2616_v23 = vsel %vm256_vm1, %v2611_v59, 0.0  ;;  %v2509_v24 = vcombine.low %v2501_v22, %v2508_v60  ;;  %v2824_v61 = vpop.permute.xlu1 %2823 }
 0x1df   : > { %v2548_v53 = vadd.f32 %v2547_v6, %v2546_v54  ;;  %v2633_v25 = vrot.slane %v2632_v7, 2  ;;  %v2617_v26 = vrot.slane %v2616_v23, 4  ;;  %v2679_v34 = vsel %vm256_vm1, %v2677_v20, %v2678_v9 }
 0x1e0   : > { %v2555_v13 = vadd.f32 %v2554_v17, %v2553_v16  ;;  %v2623_v1 = vsel %vm256_vm1, %v2614_v21, 0.0  ;;  %v2516_v15 = vrot.slane %v2509_v24, %v4527_v39  ;;  %v2686_v60 = vmul.f32 %v5021_v29, %v2682_v32  ;;  %v2822_v17 = vpop.permute.xlu0 %2821 }
 0x1e1   : > { %v2634_v27 = vadd.f32 %v2633_v25, %v2632_v7  ;;  %v2618_v36 = vadd.f32 %v2617_v26, %v2616_v23  ;;  %v2624_v19 = vrot.slane %v2623_v1, 4  ;;  %v2681_v42 = vsel %vm2680_vm6, %v2674_v11, %v2679_v34 }
 0x1e2   : > { %v2568_v41 = vcombine.low %v2548_v53, %v2555_v13  ;;  %vm2754_vm10 = vcmask 277504   ;;  %v2518_v43 = vadd.f32 %v2516_v15, %v2490_v3  ;;  %v2704_v10 = vsel %vm271_vm2, %v2686_v60, 0.0 }
 0x1e3   : > { %v2635_v45 = vrot.slane %v2634_v27, 1  ;;  %v2619_v46 = vrot.slane %v2618_v36, 2  ;;  %v2625_v47 = vadd.f32 %v2624_v19, %v2623_v1  ;;  %v2685_v49 = vmul.f32 %v5014_v4, %v2681_v42 }
 0x1e4   : > { %v2575_v44 = vrot.slane %v2568_v41, %v4527_v39  ;;  %v2752_v28 = vrot.slane %v2750_v31, 4  ;;  %2519 = vst.msk [vmem:[#allocation2 + $0x4e] ss:$8 sm:$0x7] %vm4537_vm3, %v2518_v43  ;;  %v2705_v48 = vrot.slane %v2704_v10, 4  ;;  %v2751_v22 = vrot.slane %v2748_v58, 4 }
 0x1e5   : > { %v2636_v35 = vadd.f32 %v2635_v45, %v2634_v27  ;;  %v2620_v50 = vadd.f32 %v2619_v46, %v2618_v36  ;;  %v2626_v52 = vrot.slane %v2625_v47, 2  ;;  %v2688_v38 = vcombine.high %v2685_v49, %v2685_v49 }
 0x1e6   : > { %v2583_v33 = vcombine.low %v2575_v44, %v2582_v18  ;;  %v2690_v62 = vsel %vm256_vm1, %v2685_v49, 0.0  ;;  %v2756_v30 = vsel %vm2754_vm10, %v2750_v31, %v2752_v28  ;;  %v2706_v2 = vadd.f32 %v2705_v48, %v2704_v10  ;;  %v2638_v44 = vld [vmem:[#allocation2 + $0x60] ss:$8 sm:$0x7] }
 0x1e7   : > { %v2656_v63 = vrot.slane %v2636_v35, %v4527_v39  ;;  %v2621_v40 = vrot.slane %v2620_v50, 1  ;;  %v2627_v55 = vadd.f32 %v2626_v52, %v2625_v47  ;;  %v2691_v56 = vrot.slane %v2690_v62, 4 }
 0x1e8   : > { %v2590_v5 = vrot.slane %v2583_v33, %v4527_v39  ;;  %v2697_v8 = vsel %vm256_vm1, %v2688_v38, 0.0  ;;  %v2760_v11 = vmul.f32 %v5021_v29, %v2756_v30  ;;  %v2707_v57 = vrot.slane %v2706_v2, 2 }
 0x1e9   : > { %v2622_v12 = vadd.f32 %v2621_v40, %v2620_v50  ;;  %v2628_v54 = vrot.slane %v2627_v55, 1  ;;  %v2698_v14 = vrot.slane %v2697_v8, 4  ;;  %v2692_v59 = vadd.f32 %v2691_v56, %v2690_v62 }
 0x1ea   : > { %v2592_v16 = vadd.f32 %v2590_v5, %v2564_v37  ;;  %v2778_v9 = vsel %vm271_vm2, %v2760_v11, 0.0  ;;  %v2708_v7 = vadd.f32 %v2707_v57, %v2706_v2  ;;  %v2753_v23 = vsel %vm256_vm1, %v2751_v22, %v2752_v28  ;;  %v2896_v11 = vpop.permute.xlu0 %2895 }
 0x1eb   : > { %v2629_v6 = vadd.f32 %v2628_v54, %v2627_v55  ;;  %v2699_v20 = vadd.f32 %v2698_v14, %v2697_v8  ;;  %v2779_v18 = vrot.slane %v2778_v9, 4  ;;  %v2693_v21 = vrot.slane %v2692_v59, 2  ;;  %v2898_v8 = vpop.permute.xlu1 %2897 }
 0x1ec   : > { %2593 = vst.msk [vmem:[#allocation2 + $0x4f] ss:$8 sm:$0x7] %vm4537_vm3, %v2592_v16  ;;  %vm2828_vm11 = vcmask 146432   ;;  %v2826_v24 = vrot.slane %v2824_v61, 4  ;;  %v2709_v25 = vrot.slane %v2708_v7, 1  ;;  %v2755_v1 = vsel %vm2754_vm10, %v2748_v58, %v2753_v23 }
 0x1ed   : > { %v2642_v53 = vcombine.low %v2622_v12, %v2629_v6  ;;  %v2700_v26 = vrot.slane %v2699_v20, 2  ;;  %v2780_v3 = vadd.f32 %v2779_v18, %v2778_v9  ;;  %v2694_v13 = vadd.f32 %v2693_v21, %v2692_v59  ;;  %v2712_v23 = vld [vmem:[#allocation2 + $0x61] ss:$8 sm:$0x7] }
 0x1ee   : > { %v2830_v32 = vsel %vm2828_vm11, %v2824_v61, %v2826_v24  ;;  %v2825_v34 = vrot.slane %v2822_v17, 4  ;;  %v2710_v27 = vadd.f32 %v2709_v25, %v2708_v7  ;;  %v2759_v41 = vmul.f32 %v5014_v4, %v2755_v1 }
 0x1ef   : > { %v2649_v15 = vrot.slane %v2642_v53, %v4527_v39  ;;  %v2701_v36 = vadd.f32 %v2700_v26, %v2699_v20  ;;  %v2781_v19 = vrot.slane %v2780_v3, 2  ;;  %v2695_v31 = vrot.slane %v2694_v13, 1 }
 0x1f0   : > { %v2834_v60 = vmul.f32 %v5021_v29, %v2830_v32  ;;  %v2827_v42 = vsel %vm256_vm1, %v2825_v34, %v2826_v24  ;;  %v2730_v45 = vrot.slane %v2710_v27, %v4527_v39  ;;  %v2762_v49 = vcombine.high %v2759_v41, %v2759_v41 }
 0x1f1   : > { %v2657_v43 = vcombine.low %v2649_v15, %v2656_v63  ;;  %v2702_v46 = vrot.slane %v2701_v36, 1  ;;  %v2782_v47 = vadd.f32 %v2781_v19, %v2780_v3  ;;  %v2696_v10 = vadd.f32 %v2695_v31, %v2694_v13 }
 0x1f2   : > { %v2764_v28 = vsel %vm256_vm1, %v2759_v41, 0.0  ;;  %v2852_v35 = vsel %vm271_vm2, %v2834_v60, 0.0  ;;  %v2771_v40 = vsel %vm256_vm1, %v2762_v49, 0.0  ;;  %v2829_v57 = vsel %vm2828_vm11, %v2822_v17, %v2827_v42 }
 0x1f3   : > { %v3855_v50 = vld [vmem:[#allocation2 + $0x48] sm:$0xff]  ;;  %v3856_v52 = vld [vmem:[#allocation2 + $0x50] sm:$0xff]  ;;  %v3857_v48 = vld [vmem:[#allocation2 + $0x58] sm:$0xff]  ;;  %v2664_v58 = vrot.slane %v2657_v43, %v4527_v39  ;;  %v2703_v33 = vadd.f32 %v2702_v46, %v2701_v36  ;;  %v2783_v38 = vrot.slane %v2782_v47, 1  ;;  %v2765_v62 = vrot.slane %v2764_v28, 4  ;;  %v2972_v36 = vpop.permute.xlu1 %2971 }
 0x1f4   : > { %v3876_v30 = vmul.f32 0.25, %v3855_v50  ;;  %v3877_v37 = vmul.f32 0.25, %v3856_v52  ;;  %v3878_v63 = vmul.f32 0.25, %v3857_v48  ;;  %v2772_v12 = vrot.slane %v2771_v40, 4  ;;  %v5212_v48 = vld [vmem:[%s4455_s28] sm:$0xff] }
 0x1f5   : > { %v2666_v55 = vadd.f32 %v2664_v58, %v2638_v44  ;;  %v2716_v2 = vcombine.low %v2696_v10, %v2703_v33  ;;  %v5188_v5 = vadd.f32 %v2783_v38, %v2782_v47  ;;  %v2766_v56 = vadd.f32 %v2765_v62, %v2764_v28  ;;  %v2970_v47 = vpop.permute.xlu0 %2969 }
 0x1f6   : > { %3898 = vst [vmem:[%s4823_s15 + $0x48] sm:$0xff] %v3876_v30  ;;  %3899 = vst [vmem:[%s4823_s15 + $0x50] sm:$0xff] %v3877_v37  ;;  %v2853_v54 = vrot.slane %v2852_v35, 4  ;;  %vm2902_vm12 = vcmask 138240   ;;  %v2833_v59 = vmul.f32 %v5014_v4, %v2829_v57  ;;  %v2773_v9 = vadd.f32 %v2772_v12, %v2771_v40 }
 0x1f7   : > { %3900 = vst.msk [vmem:[%s4823_s15 + $0x58] sm:$0xff] %vm226_vm0, %v3878_v63  ;;  %v2723_v14 = vrot.slane %v2716_v2, %v4527_v39  ;;  %v2804_v61 = vrot.slane %v5188_v5, %v4527_v39  ;;  %v2767_v16 = vrot.slane %v2766_v56, 2  ;;  %v2900_v6 = vrot.slane %v2898_v8, 4 }
 0x1f8   : > { %2667 = vst.msk [vmem:[#allocation2 + $0x60] ss:$8 sm:$0x7] %vm4537_vm3, %v2666_v55  ;;  %v2854_v22 = vadd.f32 %v2853_v54, %v2852_v35  ;;  %v2899_v7 = vrot.slane %v2896_v11, 4  ;;  %v2836_v21 = vcombine.high %v2833_v59, %v2833_v59  ;;  %v2838_v17 = vsel %vm256_vm1, %v2833_v59, 0.0 }
 0x1f9   : > { %v2731_v20 = vcombine.low %v2723_v14, %v2730_v45  ;;  %v2768_v18 = vadd.f32 %v2767_v16, %v2766_v56  ;;  %v2774_v24 = vrot.slane %v2773_v9, 2  ;;  %v2839_v25 = vrot.slane %v2838_v17, 4  ;;  %v5219_v56 = vld [vmem:[%s4455_s28 + $0x8] sm:$0xf] }
 0x1fa   : > { %v2855_v53 = vrot.slane %v2854_v22, 2  ;;  %v2904_v26 = vsel %vm2902_vm12, %v2898_v8, %v2900_v6  ;;  %v2845_v4 = vsel %vm256_vm1, %v2836_v21, 0.0  ;;  %v2901_v60 = vsel %vm256_vm1, %v2899_v7, %v2900_v6  ;;  %v2786_v21 = vld [vmem:[#allocation2 + $0x62] ss:$8 sm:$0x7] }
 0x1fb   : > { %v2738_v3 = vrot.slane %v2731_v20, %v4527_v39  ;;  %v2769_v13 = vrot.slane %v2768_v18, 1  ;;  %v2908_v1 = vmul.f32 %v5021_v29, %v2904_v26  ;;  %v2775_v32 = vadd.f32 %v2774_v24, %v2773_v9 }
 0x1fc   : > { %v2856_v34 = vadd.f32 %v2855_v53, %v2854_v22  ;;  %v2840_v15 = vadd.f32 %v2839_v25, %v2838_v17  ;;  %v2846_v27 = vrot.slane %v2845_v4, 4  ;;  %v2903_v44 = vsel %vm2902_vm12, %v2896_v11, %v2901_v60 }
 0x1fd   : > { %v2740_v19 = vadd.f32 %v2738_v3, %v2712_v23  ;;  %v2770_v31 = vadd.f32 %v2769_v13, %v2768_v18  ;;  %v2926_v41 = vsel %vm271_vm2, %v2908_v1, 0.0  ;;  %v2776_v42 = vrot.slane %v2775_v32, 1  ;;  %v3046_v18 = vpop.permute.xlu1 %3045 }
 0x1fe   : > { %v2857_v43 = vrot.slane %v2856_v34, 1  ;;  %v2841_v45 = vrot.slane %v2840_v15, 2  ;;  %v2847_v46 = vadd.f32 %v2846_v27, %v2845_v4  ;;  %v2927_v29 = vrot.slane %v2926_v41, 4  ;;  %v3044_v27 = vpop.permute.xlu0 %3043 }
 0x1ff   : > { %2741 = vst.msk [vmem:[#allocation2 + $0x61] ss:$8 sm:$0x7] %vm4537_vm3, %v2740_v19  ;;  %vm2976_vm13 = vcmask 130048   ;;  %v2974_v10 = vrot.slane %v2972_v36, 4  ;;  %v2777_v49 = vadd.f32 %v2776_v42, %v2775_v32  ;;  %v2907_v58 = vmul.f32 %v5212_v48, %v2903_v44 }
 0x200   : > { %v2858_v28 = vadd.f32 %v2857_v43, %v2856_v34  ;;  %v2842_v35 = vadd.f32 %v2841_v45, %v2840_v15  ;;  %v2848_v50 = vrot.slane %v2847_v46, 2  ;;  %v2928_v52 = vadd.f32 %v2927_v29, %v2926_v41 }
 0x201   : > { %v2978_v33 = vsel %vm2976_vm13, %v2972_v36, %v2974_v10  ;;  %v2973_v38 = vrot.slane %v2970_v47, 4  ;;  %v2790_v62 = vcombine.low %v2770_v31, %v2777_v49  ;;  %v2910_v55 = vcombine.high %v2907_v58, %v2907_v58 }
 0x202   : > { %v2878_v30 = vrot.slane %v2858_v28, %v4527_v39  ;;  %v2843_v37 = vrot.slane %v2842_v35, 1  ;;  %v2849_v63 = vadd.f32 %v2848_v50, %v2847_v46  ;;  %v2929_v40 = vrot.slane %v2928_v52, 2  ;;  %v2860_v46 = vld [vmem:[#allocation2 + $0x63] ss:$8 sm:$0x7] }
 0x203   : > { %v2912_v2 = vsel %vm256_vm1, %v2907_v58, 0.0  ;;  %v2982_v8 = vmul.f32 %v5219_v56, %v2978_v33  ;;  %v2797_v11 = vrot.slane %v2790_v62, %v4527_v39  ;;  %v2919_v16 = vsel %vm256_vm1, %v2910_v55, 0.0 }
 0x204   : > { %v2844_v12 = vadd.f32 %v2843_v37, %v2842_v35  ;;  %v2850_v54 = vrot.slane %v2849_v63, 1  ;;  %v2913_v57 = vrot.slane %v2912_v2, 4  ;;  %v2930_v14 = vadd.f32 %v2929_v40, %v2928_v52 }
 0x205   : > { %v3000_v59 = vsel %vm271_vm2, %v2982_v8, 0.0  ;;  %v2975_v9 = vsel %vm256_vm1, %v2973_v38, %v2974_v10  ;;  %v2805_v22 = vcombine.low %v2797_v11, %v2804_v61  ;;  %v2920_v20 = vrot.slane %v2919_v16, 4 }
 0x206   : > { %v2851_v6 = vadd.f32 %v2850_v54, %v2849_v63  ;;  %v2914_v7 = vadd.f32 %v2913_v57, %v2912_v2  ;;  %v2931_v17 = vrot.slane %v2930_v14, 1  ;;  %v3001_v23 = vrot.slane %v3000_v59, 4  ;;  %v3120_v57 = vpop.permute.xlu1 %3119 }
 0x207   : > { %v2977_v24 = vsel %vm2976_vm13, %v2970_v47, %v2975_v9  ;;  %vm3050_vm14 = vcmask 121856   ;;  %v2812_v53 = vrot.slane %v2805_v22, %v4527_v39  ;;  %v2921_v3 = vadd.f32 %v2920_v20, %v2919_v16 }
 0x208   : > { %v2864_v25 = vcombine.low %v2844_v12, %v2851_v6  ;;  %v2915_v26 = vrot.slane %v2914_v7, 2  ;;  %v2932_v13 = vadd.f32 %v2931_v17, %v2930_v14  ;;  %v3002_v4 = vadd.f32 %v3001_v23, %v3000_v59  ;;  %v3118_v14 = vpop.permute.xlu0 %3117 }
 0x209   : > { %v2981_v5 = vmul.f32 %v5212_v48, %v2977_v24  ;;  %v3048_v61 = vrot.slane %v3046_v18, 4  ;;  %v2814_v1 = vadd.f32 %v2812_v53, %v2786_v21  ;;  %v2922_v15 = vrot.slane %v2921_v3, 2 }
 0x20a   : > { %v2871_v32 = vrot.slane %v2864_v25, %v4527_v39  ;;  %v2916_v34 = vadd.f32 %v2915_v26, %v2914_v7  ;;  %v2952_v36 = vrot.slane %v2932_v13, %v4527_v39  ;;  %v3003_v19 = vrot.slane %v3002_v4, 2  ;;  %v2934_v13 = vld [vmem:[#allocation2 + $0x64] ss:$8 sm:$0x7] }
 0x20b   : > { %v2984_v31 = vcombine.high %v2981_v5, %v2981_v5  ;;  %v2986_v41 = vsel %vm256_vm1, %v2981_v5, 0.0  ;;  %2815 = vst.msk [vmem:[#allocation2 + $0x62] ss:$8 sm:$0x7] %vm4537_vm3, %v2814_v1  ;;  %v2923_v43 = vadd.f32 %v2922_v15, %v2921_v3  ;;  %v3052_v44 = vsel %vm3050_vm14, %v3046_v18, %v3048_v61 }
 0x20c   : > { %v2879_v60 = vcombine.low %v2871_v32, %v2878_v30  ;;  %v2917_v42 = vrot.slane %v2916_v34, 1  ;;  %v2987_v45 = vrot.slane %v2986_v41, 4  ;;  %v3004_v47 = vadd.f32 %v3003_v19, %v3002_v4 }
 0x20d   : > { %v2993_v29 = vsel %vm256_vm1, %v2984_v31, 0.0  ;;  %v3047_v10 = vrot.slane %v3044_v27, 4  ;;  %v2924_v35 = vrot.slane %v2923_v43, 1  ;;  %v3056_v33 = vmul.f32 %v5219_v56, %v3052_v44 }
 0x20e   : > { %v2886_v49 = vrot.slane %v2879_v60, %v4527_v39  ;;  %v2918_v28 = vadd.f32 %v2917_v42, %v2916_v34  ;;  %v2988_v50 = vadd.f32 %v2987_v45, %v2986_v41  ;;  %v3005_v52 = vrot.slane %v3004_v47, 1  ;;  %v3194_v41 = vpop.permute.xlu1 %3193  ;;  %v3192_v60 = vpop.permute.xlu0 %3191 }
 0x20f   : > { %v2994_v58 = vrot.slane %v2993_v29, 4  ;;  %v3049_v38 = vsel %vm256_vm1, %v3047_v10, %v3048_v61  ;;  %v2925_v30 = vadd.f32 %v2924_v35, %v2923_v43  ;;  %v3074_v2 = vsel %vm271_vm2, %v3056_v33, 0.0 }
 0x210   : > { %v2888_v62 = vadd.f32 %v2886_v49, %v2860_v46  ;;  %v2989_v37 = vrot.slane %v2988_v50, 2  ;;  %v3051_v63 = vsel %vm3050_vm14, %v3044_v27, %v3049_v38  ;;  %v5243_v40 = vadd.f32 %v3005_v52, %v3004_v47 }
 0x211   : > { %v2995_v55 = vadd.f32 %v2994_v58, %v2993_v29  ;;  %v3055_v8 = vmul.f32 %v5212_v48, %v3051_v63  ;;  %v2938_v11 = vcombine.low %v2918_v28, %v2925_v30  ;;  %v3075_v54 = vrot.slane %v3074_v2, 4 }
 0x212   : > { %2889 = vst.msk [vmem:[#allocation2 + $0x63] ss:$8 sm:$0x7] %vm4537_vm3, %v2888_v62  ;;  %v2990_v12 = vadd.f32 %v2989_v37, %v2988_v50  ;;  %vm3124_vm15 = vcmask 113664   ;;  %v3026_v16 = vrot.slane %v5243_v40, %v4527_v39  ;;  %v3122_v23 = vrot.slane %v3120_v57, 4 }
 0x213   : > { %v2996_v59 = vrot.slane %v2995_v55, 2  ;;  %v3058_v9 = vcombine.high %v3055_v8, %v3055_v8  ;;  %v3060_v22 = vsel %vm256_vm1, %v3055_v8, 0.0  ;;  %v2945_v6 = vrot.slane %v2938_v11, %v4527_v39  ;;  %v3268_v11 = vpop.permute.xlu1 %3267 }
 0x214   : > { %v2991_v7 = vrot.slane %v2990_v12, 1  ;;  %v3076_v20 = vadd.f32 %v3075_v54, %v3074_v2  ;;  %v3061_v18 = vrot.slane %v3060_v22, 4  ;;  %v3121_v24 = vrot.slane %v3118_v14, 4 }
 0x215   : > { %v2997_v21 = vadd.f32 %v2996_v59, %v2995_v55  ;;  %v3067_v17 = vsel %vm256_vm1, %v3058_v9, 0.0  ;;  %v2953_v53 = vcombine.low %v2945_v6, %v2952_v36  ;;  %v3126_v61 = vsel %vm3124_vm15, %v3120_v57, %v3122_v23 }
 0x216   : > { %v2992_v25 = vadd.f32 %v2991_v7, %v2990_v12  ;;  %v3077_v26 = vrot.slane %v3076_v20, 2  ;;  %v3062_v3 = vadd.f32 %v3061_v18, %v3060_v22  ;;  %v3068_v5 = vrot.slane %v3067_v17, 4  ;;  %v3008_v12 = vld [vmem:[#allocation2 + $0x65] ss:$8 sm:$0x7] }
 0x217   : > { %v2998_v4 = vrot.slane %v2997_v21, 1  ;;  %v3123_v1 = vsel %vm256_vm1, %v3121_v24, %v3122_v23  ;;  %v2960_v32 = vrot.slane %v2953_v53, %v4527_v39  ;;  %v3130_v27 = vmul.f32 %v5219_v56, %v3126_v61 }
 0x218   : > { %v3078_v34 = vadd.f32 %v3077_v26, %v3076_v20  ;;  %v3063_v15 = vrot.slane %v3062_v3, 2  ;;  %v3069_v31 = vadd.f32 %v3068_v5, %v3067_v17  ;;  %v3125_v36 = vsel %vm3124_vm15, %v3118_v14, %v3123_v1 }
 0x219   : > { %v2999_v19 = vadd.f32 %v2998_v4, %v2997_v21  ;;  %vm3198_vm4 = vcmask 105472   ;;  %v2962_v42 = vadd.f32 %v2960_v32, %v2934_v13  ;;  %v3148_v46 = vsel %vm271_vm2, %v3130_v27, 0.0  ;;  %v3266_v27 = vpop.permute.xlu0 %3265 }
 0x21a   : > { %v3079_v43 = vrot.slane %v3078_v34, 1  ;;  %v3064_v45 = vadd.f32 %v3063_v15, %v3062_v3  ;;  %v3070_v29 = vrot.slane %v3069_v31, 2  ;;  %v3149_v44 = vrot.slane %v3148_v46, 4 }
 0x21b   : > { %v3012_v47 = vcombine.low %v2992_v25, %v2999_v19  ;;  %v3129_v10 = vmul.f32 %v5212_v48, %v3125_v36  ;;  %2963 = vst.msk [vmem:[#allocation2 + $0x64] ss:$8 sm:$0x7] %vm4537_vm3, %v2962_v42  ;;  %v3196_v35 = vrot.slane %v3194_v41, 4  ;;  %v3195_v50 = vrot.slane %v3192_v60, 4 }
 0x21c   : > { %v3080_v49 = vadd.f32 %v3079_v43, %v3078_v34  ;;  %v3065_v28 = vrot.slane %v3064_v45, 1  ;;  %v3071_v58 = vadd.f32 %v3070_v29, %v3069_v31  ;;  %v3150_v33 = vadd.f32 %v3149_v44, %v3148_v46 }
 0x21d   : > { %v3019_v52 = vrot.slane %v3012_v47, %v4527_v39  ;;  %v3132_v38 = vcombine.high %v3129_v10, %v3129_v10  ;;  %v3134_v37 = vsel %vm256_vm1, %v3129_v10, 0.0  ;;  %v3200_v63 = vsel %vm3198_vm4, %v3194_v41, %v3196_v35  ;;  %v3082_v41 = vld [vmem:[#allocation2 + $0x66] ss:$8 sm:$0x7] }
 0x21e   : > { %v3100_v62 = vrot.slane %v3080_v49, %v4527_v39  ;;  %v3066_v30 = vadd.f32 %v3065_v28, %v3064_v45  ;;  %v3072_v55 = vrot.slane %v3071_v58, 1  ;;  %v3151_v2 = vrot.slane %v3150_v33, 2 }
 0x21f   : > { %v3027_v40 = vcombine.low %v3019_v52, %v3026_v16  ;;  %v3135_v8 = vrot.slane %v3134_v37, 4  ;;  %v3141_v54 = vsel %vm256_vm1, %v3132_v38, 0.0  ;;  %v3204_v57 = vmul.f32 %v5219_v56, %v3200_v63 }
 0x220   : > { %v3197_v14 = vsel %vm256_vm1, %v3195_v50, %v3196_v35  ;;  %vm3272_vm5 = vcmask 97280   ;;  %v3073_v9 = vadd.f32 %v3072_v55, %v3071_v58  ;;  %v3152_v22 = vadd.f32 %v3151_v2, %v3150_v33  ;;  %v3342_v50 = vpop.permute.xlu1 %3341 }
 0x221   : > { %v3034_v59 = vrot.slane %v3027_v40, %v4527_v39  ;;  %v3136_v6 = vadd.f32 %v3135_v8, %v3134_v37  ;;  %v3142_v7 = vrot.slane %v3141_v54, 4  ;;  %v3222_v16 = vsel %vm271_vm2, %v3204_v57, 0.0  ;;  %v3340_v40 = vpop.permute.xlu0 %3339 }
 0x222   : > { %v3199_v20 = vsel %vm3198_vm4, %v3192_v60, %v3197_v14  ;;  %v3270_v18 = vrot.slane %v3268_v11, 4  ;;  %v3086_v17 = vcombine.low %v3066_v30, %v3073_v9  ;;  %v3153_v23 = vrot.slane %v3152_v22, 1 }
 0x223   : > { %v3036_v21 = vadd.f32 %v3034_v59, %v3008_v12  ;;  %v3137_v24 = vrot.slane %v3136_v6, 2  ;;  %v3143_v53 = vadd.f32 %v3142_v7, %v3141_v54  ;;  %v3223_v25 = vrot.slane %v3222_v16, 4 }
 0x224   : > { %v3203_v26 = vmul.f32 %v5212_v48, %v3199_v20  ;;  %v3274_v3 = vsel %vm3272_vm5, %v3268_v11, %v3270_v18  ;;  %v3093_v13 = vrot.slane %v3086_v17, %v4527_v39  ;;  %v3154_v4 = vadd.f32 %v3153_v23, %v3152_v22 }
 0x225   : > { %3037 = vst.msk [vmem:[#allocation2 + $0x65] ss:$8 sm:$0x7] %vm4537_vm3, %v3036_v21  ;;  %v3138_v5 = vadd.f32 %v3137_v24, %v3136_v6  ;;  %v3278_v61 = vmul.f32 %v5219_v56, %v3274_v3  ;;  %v3144_v1 = vrot.slane %v3143_v53, 2  ;;  %v3224_v32 = vadd.f32 %v3223_v25, %v3222_v16 }
 0x226   : > { %v3206_v34 = vcombine.high %v3203_v26, %v3203_v26  ;;  %v3208_v15 = vsel %vm256_vm1, %v3203_v26, 0.0  ;;  %v3101_v19 = vcombine.low %v3093_v13, %v3100_v62  ;;  %v3174_v47 = vrot.slane %v3154_v4, %v4527_v39  ;;  %v3156_v13 = vld [vmem:[#allocation2 + $0x67] ss:$8 sm:$0x7] }
 0x227   : > { %v3139_v31 = vrot.slane %v3138_v5, 1  ;;  %v3209_v36 = vrot.slane %v3208_v15, 4  ;;  %v3145_v60 = vadd.f32 %v3144_v1, %v3143_v53  ;;  %v3225_v42 = vrot.slane %v3224_v32, 2 }
 0x228   : > { %v3215_v43 = vsel %vm256_vm1, %v3206_v34, 0.0  ;;  %v3296_v45 = vsel %vm271_vm2, %v3278_v61, 0.0  ;;  %v3108_v46 = vrot.slane %v3101_v19, %v4527_v39  ;;  %v3269_v35 = vrot.slane %v3266_v27, 4 }
 0x229   : > { %v3210_v29 = vadd.f32 %v3209_v36, %v3208_v15  ;;  %v3216_v44 = vrot.slane %v3215_v43, 4  ;;  %v3146_v10 = vrot.slane %v3145_v60, 1  ;;  %v3226_v49 = vadd.f32 %v3225_v42, %v3224_v32  ;;  %v3414_v32 = vpop.permute.xlu1 %3413  ;;  %v3412_v42 = vpop.permute.xlu0 %3411 }
 0x22a   : > { %v3297_v28 = vrot.slane %v3296_v45, 4  ;;  %v3110_v52 = vadd.f32 %v3108_v46, %v3082_v41  ;;  %v3140_v58 = vadd.f32 %v3139_v31, %v3138_v5  ;;  %v3271_v63 = vsel %vm256_vm1, %v3269_v35, %v3270_v18 }
 0x22b   : > { %v3211_v33 = vrot.slane %v3210_v29, 2  ;;  %v3217_v38 = vadd.f32 %v3216_v44, %v3215_v43  ;;  %v3147_v62 = vadd.f32 %v3146_v10, %v3145_v60  ;;  %v3227_v30 = vrot.slane %v3226_v49, 1 }
 0x22c   : > { %v3298_v37 = vadd.f32 %v3297_v28, %v3296_v45  ;;  %3111 = vst.msk [vmem:[#allocation2 + $0x66] ss:$8 sm:$0x7] %vm4537_vm3, %v3110_v52  ;;  %v3273_v8 = vsel %vm3272_vm5, %v3266_v27, %v3271_v63  ;;  %v3350_v11 = vmul.f32 %v5219_v56, %v3342_v50  ;;  %v3344_v14 = vrot.slane %v3342_v50, 4 }
 0x22d   : > { %v3212_v55 = vadd.f32 %v3211_v33, %v3210_v29  ;;  %v3218_v2 = vrot.slane %v3217_v38, 2  ;;  %v3160_v12 = vcombine.low %v3140_v58, %v3147_v62  ;;  %v3277_v57 = vmul.f32 %v5212_v48, %v3273_v8  ;;  %v3230_v62 = vld [vmem:[#allocation2 + $0x78] ss:$8 sm:$0x7] }
 0x22e   : > { %v3299_v54 = vrot.slane %v3298_v37, 2  ;;  %v3368_v22 = vsel %vm271_vm2, %v3350_v11, 0.0  ;;  %v3343_v6 = vrot.slane %v3340_v40, 4  ;;  %v3228_v16 = vadd.f32 %v3227_v30, %v3226_v49 }
 0x22f   : > { %v3213_v59 = vrot.slane %v3212_v55, 1  ;;  %v3219_v9 = vadd.f32 %v3218_v2, %v3217_v38  ;;  %v3167_v7 = vrot.slane %v3160_v12, %v4527_v39  ;;  %v3280_v18 = vcombine.high %v3277_v57, %v3277_v57  ;;  %v3486_v12 = vpop.permute.xlu1 %3485 }
 0x230   : > { %v3300_v20 = vadd.f32 %v3299_v54, %v3298_v37  ;;  %v3282_v23 = vsel %vm256_vm1, %v3277_v57, 0.0  ;;  %v3369_v24 = vrot.slane %v3368_v22, 4  ;;  %v3345_v1 = vsel %vm256_vm1, %v3343_v6, %v3344_v14 }
 0x231   : > { %v3214_v21 = vadd.f32 %v3213_v59, %v3212_v55  ;;  %v3220_v17 = vrot.slane %v3219_v9, 1  ;;  %v3175_v53 = vcombine.low %v3167_v7, %v3174_v47  ;;  %v3283_v26 = vrot.slane %v3282_v23, 4 }
 0x232   : > { %v3301_v25 = vrot.slane %v3300_v20, 1  ;;  %v3289_v3 = vsel %vm256_vm1, %v3280_v18, 0.0  ;;  %v3370_v61 = vadd.f32 %v3369_v24, %v3368_v22  ;;  %v3248_v15 = vrot.slane %v3228_v16, %v4527_v39 }
 0x233   : > { %v3221_v4 = vadd.f32 %v3220_v17, %v3219_v9  ;;  %v3290_v5 = vrot.slane %v3289_v3, 4  ;;  %v3182_v34 = vrot.slane %v3175_v53, %v4527_v39  ;;  %v3284_v27 = vadd.f32 %v3283_v26, %v3282_v23  ;;  %v3484_v9 = vpop.permute.xlu0 %3483 }
 0x234   : > { %v3346_v19 = vsel %vm544_vm7, %v3340_v40, %v3345_v1  ;;  %v3371_v41 = vrot.slane %v3370_v61, 2  ;;  %v3302_v45 = vadd.f32 %v3301_v25, %v3300_v20  ;;  %v3416_v47 = vrot.slane %v3414_v32, 4 }
 0x235   : > { %v3234_v31 = vcombine.low %v3214_v21, %v3221_v4  ;;  %v3291_v36 = vadd.f32 %v3290_v5, %v3289_v3  ;;  %v3349_v60 = vmul.f32 %v5212_v48, %v3346_v19  ;;  %v3184_v43 = vadd.f32 %v3182_v34, %v3156_v13 }
 0x236   : > { %v3285_v46 = vrot.slane %v3284_v27, 2  ;;  %v5300_v10 = vadd.f32 %v3371_v41, %v3370_v61  ;;  %v3422_v50 = vmul.f32 %v5219_v56, %v3414_v32  ;;  %v3415_v52 = vrot.slane %v3412_v42, 4 }
 0x237   : > { %v3241_v29 = vrot.slane %v3234_v31, %v4527_v39  ;;  %v3292_v44 = vrot.slane %v3291_v36, 2  ;;  %v3352_v49 = vcombine.high %v3349_v60, %v3349_v60  ;;  %3185 = vst.msk [vmem:[#allocation2 + $0x67] ss:$8 sm:$0x7] %vm4537_vm3, %v3184_v43  ;;  %v3354_v35 = vsel %vm256_vm1, %v3349_v60, 0.0 }
 0x238   : > { %v3286_v28 = vadd.f32 %v3285_v46, %v3284_v27  ;;  %v3355_v38 = vrot.slane %v3354_v35, 4  ;;  %v3440_v63 = vsel %vm271_vm2, %v3422_v50, 0.0  ;;  %v3417_v40 = vsel %vm256_vm1, %v3415_v52, %v3416_v47 }
 0x239   : > { %v3249_v58 = vcombine.low %v3241_v29, %v3248_v15  ;;  %v3293_v33 = vadd.f32 %v3292_v44, %v3291_v36  ;;  %v3361_v37 = vsel %vm256_vm1, %v3352_v49, 0.0  ;;  %v3322_v2 = vrot.slane %v3302_v45, %v4527_v39  ;;  %v3304_v45 = vld [vmem:[#allocation2 + $0x79] ss:$8 sm:$0x7] }
 0x23a   : > { %v3287_v30 = vrot.slane %v3286_v28, 1  ;;  %v3356_v11 = vadd.f32 %v3355_v38, %v3354_v35  ;;  %v3373_v54 = vrot.slane %v5300_v10, 1  ;;  %v3362_v57 = vrot.slane %v3361_v37, 4 }
 0x23b   : > { %v3256_v55 = vrot.slane %v3249_v58, %v4527_v39  ;;  %v3294_v8 = vrot.slane %v3293_v33, 1  ;;  %v3441_v14 = vrot.slane %v3440_v63, 4  ;;  %v3418_v59 = vsel %vm617_vm8, %v3412_v42, %v3417_v40  ;;  %v3558_v40 = vpop.permute.xlu1 %3557 }
 0x23c   : > { %v3288_v6 = vadd.f32 %v3287_v30, %v3286_v28  ;;  %v3357_v16 = vrot.slane %v3356_v11, 2  ;;  %v3363_v20 = vadd.f32 %v3362_v57, %v3361_v37  ;;  %v3421_v21 = vmul.f32 %v5212_v48, %v3418_v59 }
 0x23d   : > { %v3258_v22 = vadd.f32 %v3256_v55, %v3230_v62  ;;  %v3295_v7 = vadd.f32 %v3294_v8, %v3293_v33  ;;  %v3442_v18 = vadd.f32 %v3441_v14, %v3440_v63  ;;  %v3488_v17 = vrot.slane %v3486_v12, 4 }
 0x23e   : > { %v3858_v23 = vld [vmem:[#allocation2 + $0x60] sm:$0xff]  ;;  %v3859_v24 = vld [vmem:[#allocation2 + $0x68] sm:$0xff]  ;;  %v3860_v53 = vld [vmem:[#allocation2 + $0x70] sm:$0xff]  ;;  %v3358_v26 = vadd.f32 %v3357_v16, %v3356_v11  ;;  %v3494_v3 = vmul.f32 %v5219_v56, %v3486_v12  ;;  %v3487_v13 = vrot.slane %v3484_v9, 4  ;;  %v3364_v1 = vrot.slane %v3363_v20, 2 }
 0x23f   : > { %3259 = vst.msk [vmem:[#allocation2 + $0x78] ss:$8 sm:$0x7] %vm4537_vm3, %v3258_v22  ;;  %v3308_v25 = vcombine.low %v3288_v6, %v3295_v7  ;;  %v3879_v4 = vmul.f32 0.25, %v3858_v23  ;;  %v3880_v5 = vmul.f32 0.25, %v3859_v24  ;;  %v3881_v61 = vmul.f32 0.25, %v3860_v53  ;;  %v3556_v6 = vpop.permute.xlu0 %3555 }
 0x240   : > { %v3359_v34 = vrot.slane %v3358_v26, 1  ;;  %v3443_v15 = vrot.slane %v3442_v18, 2  ;;  %v3424_v27 = vcombine.high %v3421_v21, %v3421_v21  ;;  %v3365_v19 = vadd.f32 %v3364_v1, %v3363_v20  ;;  %v3376_v53 = vld [vmem:[#allocation2 + $0x7a] ss:$8 sm:$0x7] }
 0x241   : > { %v3315_v32 = vrot.slane %v3308_v25, %v4527_v39  ;;  %3901 = vst [vmem:[%s4823_s15 + $0x60] sm:$0xff] %v3879_v4  ;;  %3902 = vst [vmem:[%s4823_s15 + $0x68] sm:$0xff] %v3880_v5  ;;  %v3426_v31 = vsel %vm256_vm1, %v3421_v21, 0.0  ;;  %v3512_v36 = vsel %vm271_vm2, %v3494_v3, 0.0  ;;  %v3489_v41 = vsel %vm256_vm1, %v3487_v13, %v3488_v17 }
 0x242   : > { %3903 = vst.msk [vmem:[%s4823_s15 + $0x70] sm:$0xff] %vm226_vm0, %v3881_v61  ;;  %v3444_v42 = vadd.f32 %v3443_v15, %v3442_v18  ;;  %v3427_v43 = vrot.slane %v3426_v31, 4  ;;  %v3366_v46 = vrot.slane %v3365_v19, 1  ;;  %v3433_v47 = vsel %vm256_vm1, %v3424_v27, 0.0  ;;  %v3631_v27 = vpop.permute.xlu1 %3630 }
 0x243   : > { %v3323_v60 = vcombine.low %v3315_v32, %v3322_v2  ;;  %v3513_v29 = vrot.slane %v3512_v36, 4  ;;  %v3490_v44 = vsel %vm690_vm9, %v3484_v9, %v3489_v41  ;;  %v3374_v28 = vadd.f32 %v3373_v54, %v5300_v10 }
 0x244   : > { %v3428_v35 = vadd.f32 %v3427_v43, %v3426_v31  ;;  %v3434_v50 = vrot.slane %v3433_v47, 4  ;;  %v3360_v52 = vadd.f32 %v3359_v34, %v3358_v26  ;;  %v3367_v58 = vadd.f32 %v3366_v46, %v3365_v19 }
 0x245   : > { %v3330_v49 = vrot.slane %v3323_v60, %v4527_v39  ;;  %v3514_v33 = vadd.f32 %v3513_v29, %v3512_v36  ;;  %v3493_v38 = vmul.f32 %v5212_v48, %v3490_v44  ;;  %v3445_v30 = vrot.slane %v3444_v42, 1  ;;  %v3629_v60 = vpop.permute.xlu0 %3628 }
 0x246   : > { %v3429_v37 = vrot.slane %v3428_v35, 2  ;;  %v3435_v63 = vadd.f32 %v3434_v50, %v3433_v47  ;;  %v3380_v55 = vcombine.low %v3360_v52, %v3367_v58  ;;  %v3394_v10 = vrot.slane %v3374_v28, %v4527_v39 }
 0x247   : > { %v3332_v62 = vadd.f32 %v3330_v49, %v3304_v45  ;;  %v3515_v2 = vrot.slane %v3514_v33, 2  ;;  %v3496_v8 = vcombine.high %v3493_v38, %v3493_v38  ;;  %v3498_v11 = vsel %vm256_vm1, %v3493_v38, 0.0 }
 0x248   : > { %v3430_v12 = vadd.f32 %v3429_v37, %v3428_v35  ;;  %v3436_v54 = vrot.slane %v3435_v63, 2  ;;  %v3499_v57 = vrot.slane %v3498_v11, 4  ;;  %v3387_v14 = vrot.slane %v3380_v55, %v4527_v39  ;;  %v3448_v55 = vld [vmem:[#allocation2 + $0x7b] ss:$8 sm:$0x7] }
 0x249   : > { %3333 = vst.msk [vmem:[#allocation2 + $0x79] ss:$8 sm:$0x7] %vm4537_vm3, %v3332_v62  ;;  %v3516_v59 = vadd.f32 %v3515_v2, %v3514_v33  ;;  %v3505_v9 = vsel %vm256_vm1, %v3496_v8, 0.0  ;;  %v3567_v22 = vmul.f32 %v5219_v56, %v3558_v40  ;;  %v3446_v17 = vadd.f32 %v3445_v30, %v3444_v42 }
 0x24a   : > { %v3431_v7 = vrot.slane %v3430_v12, 1  ;;  %v3437_v16 = vadd.f32 %v3436_v54, %v3435_v63  ;;  %v3500_v20 = vadd.f32 %v3499_v57, %v3498_v11  ;;  %v3506_v18 = vrot.slane %v3505_v9, 4 }
 0x24b   : > { %v3395_v21 = vcombine.low %v3387_v14, %v3394_v10  ;;  %v3560_v23 = vrot.slane %v3558_v40, 4  ;;  %v3585_v24 = vsel %vm271_vm2, %v3567_v22, 0.0  ;;  %v3517_v26 = vrot.slane %v3516_v59, 1  ;;  %v3704_v40 = vpop.permute.xlu1 %3703 }
 0x24c   : > { %v3438_v25 = vrot.slane %v3437_v16, 1  ;;  %v3501_v3 = vrot.slane %v3500_v20, 2  ;;  %v3507_v13 = vadd.f32 %v3506_v18, %v3505_v9  ;;  %v3586_v5 = vrot.slane %v3585_v24, 4 }
 0x24d   : > { %v3402_v4 = vrot.slane %v3395_v21, %v4527_v39  ;;  %vm3562_vm7 = vcmask 990208   ;;  %v3559_v61 = vrot.slane %v3556_v6, 4  ;;  %v3432_v1 = vadd.f32 %v3431_v7, %v3430_v12 }
 0x24e   : > { %v3439_v32 = vadd.f32 %v3438_v25, %v3437_v16  ;;  %v3502_v34 = vadd.f32 %v3501_v3, %v3500_v20  ;;  %v3508_v15 = vrot.slane %v3507_v13, 2  ;;  %v3466_v31 = vrot.slane %v3446_v17, %v4527_v39  ;;  %v3520_v3 = vld [vmem:[#allocation2 + $0x7c] ss:$8 sm:$0x7] }
 0x24f   : > { %v3404_v19 = vadd.f32 %v3402_v4, %v3376_v53  ;;  %v3587_v36 = vadd.f32 %v3586_v5, %v3585_v24  ;;  %v3561_v41 = vsel %vm256_vm1, %v3559_v61, %v3560_v23  ;;  %v3633_v44 = vrot.slane %v3631_v27, 4 }
 0x250   : > { %v3452_v42 = vcombine.low %v3432_v1, %v3439_v32  ;;  %v3503_v43 = vrot.slane %v3502_v34, 1  ;;  %v3509_v45 = vadd.f32 %v3508_v15, %v3507_v13  ;;  %v3563_v46 = vsel %vm3562_vm7, %v3556_v6, %v3561_v41 }
 0x251   : > { %3405 = vst.msk [vmem:[#allocation2 + $0x7a] ss:$8 sm:$0x7] %vm4537_vm3, %v3404_v19  ;;  %v3588_v47 = vrot.slane %v3587_v36, 2  ;;  %v3566_v29 = vmul.f32 %v5212_v48, %v3563_v46  ;;  %v3640_v49 = vmul.f32 %v5219_v56, %v3631_v27  ;;  %v3518_v35 = vadd.f32 %v3517_v26, %v3516_v59  ;;  %v3702_v26 = vpop.permute.xlu0 %3701 }
 0x252   : > { %v3459_v28 = vrot.slane %v3452_v42, %v4527_v39  ;;  %v3510_v50 = vrot.slane %v3509_v45, 1  ;;  %v3632_v52 = vrot.slane %v3629_v60, 4  ;;  %vm3635_vm8 = vcmask 982016  }
 0x253   : > { %v3569_v58 = vcombine.high %v3566_v29, %v3566_v29  ;;  %v3571_v33 = vsel %vm256_vm1, %v3566_v29, 0.0  ;;  %v3658_v38 = vsel %vm271_vm2, %v3640_v49, 0.0  ;;  %v3504_v30 = vadd.f32 %v3503_v43, %v3502_v34 }
 0x254   : > { %v3467_v62 = vcombine.low %v3459_v28, %v3466_v31  ;;  %v3511_v37 = vadd.f32 %v3510_v50, %v3509_v45  ;;  %v3572_v63 = vrot.slane %v3571_v33, 4  ;;  %v3589_v2 = vadd.f32 %v3588_v47, %v3587_v36  ;;  %v3777_v47 = vpop.permute.xlu1 %3776 }
 0x255   : > { %v3578_v8 = vsel %vm256_vm1, %v3569_v58, 0.0  ;;  %v3659_v11 = vrot.slane %v3658_v38, 4  ;;  %v3634_v10 = vsel %vm256_vm1, %v3632_v52, %v3633_v44  ;;  %v3538_v59 = vrot.slane %v3518_v35, %v4527_v39 }
 0x256   : > { %v3474_v12 = vrot.slane %v3467_v62, %v4527_v39  ;;  %v3524_v54 = vcombine.low %v3504_v30, %v3511_v37  ;;  %v3573_v57 = vadd.f32 %v3572_v63, %v3571_v33  ;;  %v3579_v14 = vrot.slane %v3578_v8, 4 }
 0x257   : > { %v3636_v9 = vsel %vm3635_vm8, %v3629_v60, %v3634_v10  ;;  %v3713_v22 = vmul.f32 %v5219_v56, %v3704_v40  ;;  %v3660_v18 = vadd.f32 %v3659_v11, %v3658_v38  ;;  %v3590_v24 = vrot.slane %v3589_v2, 1 }
 0x258   : > { %v3476_v6 = vadd.f32 %v3474_v12, %v3448_v55  ;;  %v3531_v7 = vrot.slane %v3524_v54, %v4527_v39  ;;  %v3574_v16 = vrot.slane %v3573_v57, 2  ;;  %v3580_v20 = vadd.f32 %v3579_v14, %v3578_v8  ;;  %v3775_v54 = vpop.permute.xlu0 %3774 }
 0x259   : > { %v3639_v21 = vmul.f32 %v5212_v48, %v3636_v9  ;;  %v3731_v17 = vsel %vm271_vm2, %v3713_v22, 0.0  ;;  %v3706_v5 = vrot.slane %v3704_v40, 4  ;;  %v3661_v27 = vrot.slane %v3660_v18, 2  ;;  %v3593_v22 = vld [vmem:[#allocation2 + $0x7d] ss:$8 sm:$0x7] }
 0x25a   : > { %3477 = vst.msk [vmem:[#allocation2 + $0x7b] ss:$8 sm:$0x7] %vm4537_vm3, %v3476_v6  ;;  %v3539_v23 = vcombine.low %v3531_v7, %v3538_v59  ;;  %v3575_v53 = vadd.f32 %v3574_v16, %v3573_v57  ;;  %v3581_v25 = vrot.slane %v3580_v20, 2  ;;  %v3732_v61 = vrot.slane %v3731_v17, 4 }
 0x25b   : > { %v3642_v13 = vcombine.high %v3639_v21, %v3639_v21  ;;  %v3644_v4 = vsel %vm256_vm1, %v3639_v21, 0.0  ;;  %vm3708_vm9 = vcmask 973824   ;;  %v3705_v31 = vrot.slane %v3702_v26, 4 }
 0x25c   : > { %v3546_v1 = vrot.slane %v3539_v23, %v4527_v39  ;;  %v3576_v32 = vrot.slane %v3575_v53, 1  ;;  %v3582_v34 = vadd.f32 %v3581_v25, %v3580_v20  ;;  %v3645_v15 = vrot.slane %v3644_v4, 4 }
 0x25d   : > { %v3651_v19 = vsel %vm256_vm1, %v3642_v13, 0.0  ;;  %v3591_v42 = vadd.f32 %v3590_v24, %v3589_v2  ;;  %v3733_v45 = vadd.f32 %v3732_v61, %v3731_v17  ;;  %v3707_v46 = vsel %vm256_vm1, %v3705_v31, %v3706_v5 }
 0x25e   : > { %v3548_v36 = vadd.f32 %v3546_v1, %v3520_v3  ;;  %v3583_v41 = vrot.slane %v3582_v34, 1  ;;  %v3646_v60 = vadd.f32 %v3645_v15, %v3644_v4  ;;  %v3652_v43 = vrot.slane %v3651_v19, 4 }
 0x25f   : > { %v3577_v29 = vadd.f32 %v3576_v32, %v3575_v53  ;;  %v3709_v28 = vsel %vm3708_vm9, %v3702_v26, %v3707_v46  ;;  %v3662_v35 = vadd.f32 %v3661_v27, %v3660_v18  ;;  %v3786_v38 = vmul.f32 %v5219_v56, %v3777_v47 }
 0x260   : > { %3549 = vst.msk [vmem:[#allocation2 + $0x7c] ss:$8 sm:$0x7] %vm4537_vm3, %v3548_v36  ;;  %v3584_v44 = vadd.f32 %v3583_v41, %v3582_v34  ;;  %v3647_v49 = vrot.slane %v3646_v60, 2  ;;  %v3653_v50 = vadd.f32 %v3652_v43, %v3651_v19  ;;  %v3712_v52 = vmul.f32 %v5212_v48, %v3709_v28 }
 0x261   : > { %vm245_vm6 = vcmask 778240   ;;  %v3734_v30 = vrot.slane %v3733_v45, 2  ;;  %v3611_v40 = vrot.slane %v3591_v42, %v4527_v39  ;;  %v3804_v8 = vsel %vm271_vm2, %v3786_v38, 0.0  ;;  %v3666_v43 = vld [vmem:[#allocation2 + $0x7e] ss:$8 sm:$0x7] }
 0x262   : > { %v3597_v58 = vcombine.low %v3577_v29, %v3584_v44  ;;  %v3648_v33 = vadd.f32 %v3647_v49, %v3646_v60  ;;  %v3654_v62 = vrot.slane %v3653_v50, 2  ;;  %v3715_v37 = vcombine.high %v3712_v52, %v3712_v52  ;;  %246 = vst.msk [vmem:[#allocation2 + $0xa0] sm:$0x1] %vm245_vm6, %v4264_v0 }
 0x263   : > { %v3717_v63 = vsel %vm256_vm1, %v3712_v52, 0.0  ;;  %v3663_v11 = vrot.slane %v3662_v35, 1  ;;  %v3779_v9 = vrot.slane %v3777_v47, 4  ;;  %v3735_v0 = vadd.f32 %v3734_v30, %v3733_v45 }
 0x264   : > { %v3604_v55 = vrot.slane %v3597_v58, %v4527_v39  ;;  %v3718_v2 = vrot.slane %v3717_v63, 4  ;;  %v3649_v10 = vrot.slane %v3648_v33, 1  ;;  %v3655_v12 = vadd.f32 %v3654_v62, %v3653_v50 }
 0x265   : > { %v3724_v56 = vsel %vm256_vm1, %v3715_v37, 0.0  ;;  %v3805_v7 = vrot.slane %v3804_v8, 4  ;;  %vm3781_vm10 = vcmask 965632   ;;  %v3778_v21 = vrot.slane %v3775_v54, 4 }
 0x266   : > { %v3612_v57 = vcombine.low %v3604_v55, %v3611_v40  ;;  %v3719_v14 = vadd.f32 %v3718_v2, %v3717_v63  ;;  %v3725_v59 = vrot.slane %v3724_v56, 4  ;;  %v3656_v6 = vrot.slane %v3655_v12, 1  ;;  %v3739_v63 = vld [vmem:[#allocation2 + $0x7f] ss:$8 sm:$0x7] }
 0x267   : > { %v3664_v17 = vadd.f32 %v3663_v11, %v3662_v35  ;;  %v3650_v23 = vadd.f32 %v3649_v10, %v3648_v33  ;;  %v3780_v3 = vsel %vm256_vm1, %v3778_v21, %v3779_v9  ;;  %v3806_v4 = vadd.f32 %v3805_v7, %v3804_v8 }
 0x268   : > { %v3619_v16 = vrot.slane %v3612_v57, %v4527_v39  ;;  %v3720_v20 = vrot.slane %v3719_v14, 2  ;;  %v3726_v18 = vadd.f32 %v3725_v59, %v3724_v56  ;;  %v3657_v24 = vadd.f32 %v3656_v6, %v3655_v12 }
 0x269   : > { %v3782_v5 = vsel %vm3781_vm10, %v3775_v54, %v3780_v3  ;;  %v3736_v61 = vrot.slane %v3735_v0, 1  ;;  %v3684_v15 = vrot.slane %v3664_v17, %v4527_v39  ;;  %v3807_v60 = vrot.slane %v3806_v4, 2 }
 0x26a   : > { %v3621_v53 = vadd.f32 %v3619_v16, %v3593_v22  ;;  %v3721_v25 = vadd.f32 %v3720_v20, %v3719_v14  ;;  %v3727_v26 = vrot.slane %v3726_v18, 2  ;;  %v3670_v13 = vcombine.low %v3650_v23, %v3657_v24  ;;  %v3812_v22 = vld [vmem:[#allocation2 + $0x90] ss:$8 sm:$0x7] }
 0x26b   : > { %v3785_v34 = vmul.f32 %v5212_v48, %v3782_v5  ;;  %v3737_v45 = vadd.f32 %v3736_v61, %v3735_v0  ;;  %v3808_v50 = vadd.f32 %v3807_v60, %v3806_v4 }
 0x26c   : > { %3622 = vst.msk [vmem:[#allocation2 + $0x7d] ss:$8 sm:$0x7] %vm4537_vm3, %v3621_v53  ;;  %v3722_v1 = vrot.slane %v3721_v25, 1  ;;  %v3728_v32 = vadd.f32 %v3727_v26, %v3726_v18  ;;  %v3677_v27 = vrot.slane %v3670_v13, %v4527_v39 }
 0x26d   : > { %v3788_v31 = vcombine.high %v3785_v34, %v3785_v34  ;;  %v3790_v36 = vsel %vm256_vm1, %v3785_v34, 0.0  ;;  %v3757_v33 = vrot.slane %v3737_v45, %v4527_v39  ;;  %v3809_v40 = vrot.slane %v3808_v50, 1 }
 0x26e   : > { %v3729_v19 = vrot.slane %v3728_v32, 1  ;;  %v3685_v41 = vcombine.low %v3677_v27, %v3684_v15  ;;  %v3791_v42 = vrot.slane %v3790_v36, 4  ;;  %v3723_v46 = vadd.f32 %v3722_v1, %v3721_v25 }
 0x26f   : > { %v3797_v29 = vsel %vm256_vm1, %v3788_v31, 0.0  ;;  %v3810_v12 = vadd.f32 %v3809_v40, %v3808_v50 }
 0x270   : > { %v3730_v47 = vadd.f32 %v3729_v19, %v3728_v32  ;;  %v3692_v44 = vrot.slane %v3685_v41, %v4527_v39  ;;  %v3792_v48 = vadd.f32 %v3791_v42, %v3790_v36  ;;  %v3798_v49 = vrot.slane %v3797_v29, 4 }
 0x271   : > { %v3830_v14 = vrot.slane %v3810_v12, %v4527_v39 }
 0x272   : > { %v3743_v28 = vcombine.low %v3723_v46, %v3730_v47  ;;  %v3694_v35 = vadd.f32 %v3692_v44, %v3666_v43  ;;  %v3793_v52 = vrot.slane %v3792_v48, 2  ;;  %v3799_v58 = vadd.f32 %v3798_v49, %v3797_v29 }
 0x274   : > { %v3750_v38 = vrot.slane %v3743_v28, %v4527_v39  ;;  %3695 = vst.msk [vmem:[#allocation2 + $0x7e] ss:$8 sm:$0x7] %vm4537_vm3, %v3694_v35  ;;  %v3794_v62 = vadd.f32 %v3793_v52, %v3792_v48  ;;  %v3800_v30 = vrot.slane %v3799_v58, 2 }
 0x276   : > { %v3758_v37 = vcombine.low %v3750_v38, %v3757_v33  ;;  %v3795_v55 = vrot.slane %v3794_v62, 1  ;;  %v3801_v2 = vadd.f32 %v3800_v30, %v3799_v58 }
 0x278   : > { %v3765_v8 = vrot.slane %v3758_v37, %v4527_v39  ;;  %v3802_v11 = vrot.slane %v3801_v2, 1  ;;  %v3796_v56 = vadd.f32 %v3795_v55, %v3794_v62 }
 0x27a   : > { %v3767_v10 = vadd.f32 %v3765_v8, %v3739_v63  ;;  %v3803_v54 = vadd.f32 %v3802_v11, %v3801_v2 }
 0x27c   : > { %3768 = vst.msk [vmem:[#allocation2 + $0x7f] ss:$8 sm:$0x7] %vm4537_vm3, %v3767_v10  ;;  %v3816_v57 = vcombine.low %v3796_v56, %v3803_v54 }
 0x27e   : > { %v3823_v59 = vrot.slane %v3816_v57, %v4527_v39 }
 0x280   : > { %v3831_v9 = vcombine.low %v3823_v59, %v3830_v14 }
 0x282   : > { %v3838_v16 = vrot.slane %v3831_v9, %v4527_v39 }
 0x283   : > { %v3861_v6 = vld [vmem:[#allocation2 + $0x78] sm:$0xff]  ;;  %v3862_v0 = vld [vmem:[#allocation2 + $0x80] sm:$0xff]  ;;  %v3863_v7 = vld [vmem:[#allocation2 + $0x88] sm:$0xff] }
 0x284   : > { %v3882_v20 = vmul.f32 0.25, %v3861_v6  ;;  %v3883_v18 = vmul.f32 0.25, %v3862_v0  ;;  %v3884_v21 = vmul.f32 0.25, %v3863_v7  ;;  %v3840_v17 = vadd.f32 %v3838_v16, %v3812_v22 }
 0x286   : > { %3904 = vst [vmem:[%s4823_s15 + $0x78] sm:$0xff] %v3882_v20  ;;  %3905 = vst [vmem:[%s4823_s15 + $0x80] sm:$0xff] %v3883_v18 }
 0x287   : > { %3906 = vst.msk [vmem:[%s4823_s15 + $0x88] sm:$0xff] %vm226_vm0, %v3884_v21 }
 0x288   : > { %3841 = vst.msk [vmem:[#allocation2 + $0x90] ss:$8 sm:$0x7] %vm4537_vm3, %v3840_v17 }
 0x28f   : > { %v3864_v23 = vld [vmem:[#allocation2 + $0x90] sm:$0x1]  ;;  %v3865_v24 = vld [vmem:[#allocation2 + $0x98] sm:$0x1]  ;;  %v3866_v53 = vld [vmem:[#allocation2 + $0xa0] sm:$0x1] }
 0x290   : > { %v3885_v25 = vmul.f32 0.25, %v3864_v23  ;;  %v3886_v26 = vmul.f32 0.25, %v3865_v24  ;;  %v3887_v3 = vmul.f32 0.25, %v3866_v53 }
 0x292   : > { %3907 = vst [vmem:[%s4823_s15 + $0x90] sm:$0x1] %v3885_v25  ;;  %3908 = vst [vmem:[%s4823_s15 + $0x98] sm:$0x1] %v3886_v26 }
 0x293   : > { %3910 = vst.msk [vmem:[%s4823_s15 + $0xa0] sm:$0x1] %vm245_vm6, %v3887_v3 }
 0x294 PF: > { %s18_s14 = sadd.s32 1, %s4260_s14   ;;  %s5435_s9 = smov %s4244_s10 }
 0x295   : > { %p15_p9 = scmp.ge.s32.totalorder %s18_s14, 4   ;;  %s5436_s10 = smov %s4248_s11 }
 0x296   : > { %s5437_s11 = smov %s4371_s20  ;;  %s5438_s12 = smov %s4256_s13 }
 0x297   : > { %s5439_s13 = smov %s5441_s16  ;;  %17 = sbr.rel (!%p15_p9) target bundleno = 6 (0x6), region = 137 }
 0x29e   :  { %3932 = vsyncpa [#allocation4], 1 }
 0x29f   :  { %3934 = vsyncpa [#allocation4 + $0x1], 1 }
 0x2a0   :  { %3935 = vsyncpa [#allocation6], 1 }
 0x2a1   :  { %3937 = vsyncpa [#allocation6 + $0x1], 1 }

</bundles_post_ra>
